<compile_context>
chip_gen: v5e
topology: v5e:2x2
jax: 0.10.0
libtpu: 0.0.40
codegen_flags: <defaults>
</compile_context>

<pallas_src>
import jax
import jax.numpy as jnp
from jax import lax
from jax.experimental import pallas as pl
from jax.experimental.pallas import tpu as pltpu

EPS = 1e-5                     # PyTorch BatchNorm default eps
COMPUTE_DTYPE = jnp.bfloat16   # MXU operand dtype (accumulation stays float32)
K = 5                          # both convs use 5x5 kernels


# ---------------------------------------------------------------------------
# Shared math helper (used inside the Pallas kernel and in the XLA reference).
# ---------------------------------------------------------------------------
def bn_relu6(y, gamma, beta):
    """Training-mode BatchNorm (batch stats, two-pass variance) + ReLU6, f32."""
    mean = jnp.mean(y, axis=0, keepdims=True)
    d = y - mean
    var = jnp.mean(d * d, axis=0, keepdims=True)       # biased var, like torch
    inv = lax.rsqrt(var + EPS)
    return jnp.clip(d * inv * gamma + beta, 0.0, 6.0)


# ---------------------------------------------------------------------------
# The single fused Pallas kernel: whole forward pass, everything in VMEM.
# ---------------------------------------------------------------------------
def _make_kernel(n, oh1, ow1, oh2, ow2):
    def kernel(p1_ref,                                   # (ow1*n*oh1, C*25) bf16
               w1_ref, b1_ref, g1_ref, bt1_ref,          # conv1 weight/bias/BN
               w2_ref, b2_ref, g2_ref, bt2_ref,          # conv2 (5, 25, 50) + BN
               wf1_ref, bf1_ref, gf1_ref, btf1_ref,      # fc1 (1250, 100) + BN
               wf2_ref, bf2_ref,                         # fc2 (100, R)
               out_ref,                                  # (n, R) f32
               y1s_ref, pat_ref, flat_ref):              # VMEM scratch
        f32 = jnp.float32
        cdt = COMPUTE_DTYPE
        c1 = w1_ref.shape[1]           # 5
        c2 = w2_ref.shape[2]           # 50
        m2 = n * oh2 * ow2             # 50 conv2 output rows

        # ---- conv1 as ONE GEMM + BatchNorm2d + ReLU6 ---------------------
        y1 = jnp.dot(p1_ref[...], w1_ref[...], preferred_element_type=f32)
        y1 = bn_relu6(y1 + b1_ref[...], g1_ref[...], bt1_ref[...])

        # ---- relayout y1 rows (ow1, n, oh1) -> y1s[(n, oh1), (ow1, c1)] ---
        y1_3d = y1.reshape(ow1, n * oh1, c1)
        for wcol in range(ow1):
            y1s_ref[:, wcol * c1:(wcol + 1) * c1] = y1_3d[wcol]

        # ---- conv2 im2col: one contiguous (K, K*c1) block copy per output
        #      position (no gather GEMM, no O(batch^2) operand).
        for b in range(n):
            for i in range(oh2):
                for j in range(ow2):
                    r2 = (i * ow2 + j) * n + b           # position-major rows
                    blk = y1s_ref[b * oh1 + 2 * i: b * oh1 + 2 * i + K,
                                  2 * j * c1: 2 * j * c1 + K * c1]
                    pat_ref[r2 * K:(r2 + 1) * K, :] = blk

        # ---- conv2 as K GEMMs (one per kernel row, contraction = K*c1 = 25)
        z2 = jnp.zeros((m2, c2), f32)
        for ki in range(K):
            lhs = pat_ref[pl.ds(ki, m2, stride=K), :].astype(cdt)
            z2 = z2 + jnp.dot(lhs, w2_ref[ki], preferred_element_type=f32)
        y2 = bn_relu6(z2 + b2_ref[...], g2_ref[...], bt2_ref[...])  # (m2, c2)

        # ---- Flatten into (n, 1250) in (position, channel) order; the torch
        #      (C, H, W) flatten order is folded into the pre-permuted wf1.
        for p in range(oh2 * ow2):
            flat_ref[:, p * c2:(p + 1) * c2] = y2[p * n:(p + 1) * n, :]

        # ---- fc1 as ONE K=1250 GEMM + BatchNorm1d + ReLU6 -----------------
        h = jnp.dot(flat_ref[...].astype(cdt), wf1_ref[...],
                    preferred_element_type=f32)
        h = bn_relu6(h + bf1_ref[...], gf1_ref[...], btf1_ref[...])

        # ---- fc2 -----------------------------------------------------------
        out_ref[...] = (
            jnp.dot(h.astype(cdt), wf2_ref[...], preferred_element_type=f32)
            + bf2_ref[...])

    return kernel


# ---------------------------------------------------------------------------
# XLA glue: conv1 im2col of the raw NCHW input (tiny, data movement only).
# ---------------------------------------------------------------------------
def im2col(x, ksize, stride, padding):
    """x: (N, C, H, W) -> patches (N*OH*OW, C*K*K), column order (c, kh, kw)."""
    N, C, H, W = x.shape
    xp = jnp.pad(x, ((0, 0), (0, 0), (padding, padding), (padding, padding)))
    Hp, Wp = H + 2 * padding, W + 2 * padding
    OH = (Hp - ksize) // stride + 1
    OW = (Wp - ksize) // stride + 1
    taps = []
    for i in range(ksize):
        for j in range(ksize):
            taps.append(xp[:, :, i: i + stride * OH: stride,
                           j: j + stride * OW: stride])
    p = jnp.stack(taps, axis=2)                      # (N, C, K*K, OH, OW)
    p = p.reshape(N, C * ksize * ksize, OH, OW)      # cols flatten (c, kh, kw)
    p = p.transpose(0, 2, 3, 1).reshape(N * OH * OW, C * ksize * ksize)
    return p, OH, OW


def conv1_patches(x):
    """conv1 patches with rows re-ordered (ow1, n, oh1) so the in-kernel
    y1 -> y1s relayout is 13 leading-axis slices (no minor-dim reshape)."""
    p, oh1, ow1 = im2col(x, K, 2, 1)
    n = x.shape[0]
    p = p.reshape(n, oh1, ow1, -1).transpose(2, 0, 1, 3)
    return p.reshape(ow1 * n * oh1, -1), oh1, ow1


# ---------------------------------------------------------------------------
# Parameters (deterministic in-script init; shapes match the PyTorch module).
# ---------------------------------------------------------------------------
def init_params(key, C, representation_dim):
    ks = jax.random.split(key, 6)
    p = {}
    # Conv2d(C, 5, 5, padding=1, stride=2)
    p["w1"] = 0.1 * jax.random.normal(ks[0], (5, C, 5, 5), jnp.float32)
    p["b1"] = 0.1 * jax.random.normal(ks[1], (5,), jnp.float32)
    p["g1"] = jnp.ones((5,), jnp.float32)
    p["beta1"] = jnp.zeros((5,), jnp.float32)
    # Conv2d(5, 50, 5, stride=2)
    p["w2"] = 0.1 * jax.random.normal(ks[2], (50, 5, 5, 5), jnp.float32)
    p["b2"] = 0.1 * jax.random.normal(ks[3], (50,), jnp.float32)
    p["g2"] = jnp.ones((50,), jnp.float32)
    p["beta2"] = jnp.zeros((50,), jnp.float32)
    # Linear(50*5*5 = 1250, 100)
    p["wf1"] = 0.05 * jax.random.normal(ks[4], (100, 1250), jnp.float32)
    p["bf1"] = jnp.zeros((100,), jnp.float32)
    p["gf1"] = jnp.ones((100,), jnp.float32)
    p["betaf1"] = jnp.zeros((100,), jnp.float32)
    # Linear(100, representation_dim)
    p["wf2"] = 0.1 * jax.random.normal(ks[5], (representation_dim, 100), jnp.float32)
    p["bf2"] = jnp.zeros((representation_dim,), jnp.float32)
    return p


def prepare_params(params, input_shape):
    """One-time weight re-layout / casting so the hot path has no transposes."""
    _, _, H, W = input_shape
    cdt = COMPUTE_DTYPE
    f32 = jnp.float32
    oh1 = (H + 2 - K) // 2 + 1
    ow1 = (W + 2 - K) // 2 + 1
    oh2 = (oh1 - K) // 2 + 1
    ow2 = (ow1 - K) // 2 + 1
    assert 50 * oh2 * ow2 == 1250, "ImageEncoderVec requires 28x28 spatial input"

    prep = {}
    # conv1: (5, C, 5, 5) -> (C*25, 5), rows ordered (c_in, kh, kw)
    prep["w1"] = params["w1"].reshape(5, -1).T.astype(cdt)
    prep["b1"] = params["b1"][None, :].astype(f32)
    prep["g1"] = params["g1"][None, :].astype(f32)
    prep["beta1"] = params["beta1"][None, :].astype(f32)
    # conv2: (50, 5, 5, 5) -> (ki, kj*5 + c_in, c_out) = (5, 25, 50)
    prep["w2"] = jnp.transpose(params["w2"], (2, 3, 1, 0)).reshape(K, K * 5, 50).astype(cdt)
    prep["b2"] = params["b2"][None, :].astype(f32)
    prep["g2"] = params["g2"][None, :].astype(f32)
    prep["beta2"] = params["beta2"][None, :].astype(f32)
    # fc1: fold torch Flatten (c2, oh2, ow2) order into the weight:
    #   (100, 1250) -> (100, 50, 25) -> (pos, c2, feat) -> (1250, 100)
    prep["wf1"] = jnp.transpose(
        params["wf1"].reshape(100, 50, oh2 * ow2), (2, 1, 0)).reshape(
            oh2 * ow2 * 50, 100).astype(cdt)
    prep["bf1"] = params["bf1"][None, :].astype(f32)
    prep["gf1"] = params["gf1"][None, :].astype(f32)
    prep["betaf1"] = params["betaf1"][None, :].astype(f32)
    # fc2
    prep["wf2"] = params["wf2"].T.astype(cdt)
    prep["bf2"] = params["bf2"][None, :].astype(f32)
    return prep


# ---------------------------------------------------------------------------
# Forward pass == ImageEncoderVec.forward (one fused pallas_call)
# ---------------------------------------------------------------------------
def _vmem_spec():
    return pl.BlockSpec(memory_space=pltpu.MemorySpace.VMEM)


def encoder_forward(prep, x):
    """x: (N, C, H, W) float32 -> (N, representation_dim) float32."""
    n, C, H, W = x.shape
    rep = prep["wf2"].shape[1]
    oh1 = (H + 2 - K) // 2 + 1
    ow1 = (W + 2 - K) // 2 + 1
    oh2 = (oh1 - K) // 2 + 1
    ow2 = (ow1 - K) // 2 + 1
    c1, c2 = 5, 50

    p1, _, _ = conv1_patches(x)                    # the only XLA glue left
    p1 = p1.astype(COMPUTE_DTYPE)

    operands = (
        p1,
        prep["w1"], prep["b1"], prep["g1"], prep["beta1"],
        prep["w2"], prep["b2"], prep["g2"], prep["beta2"],
        prep["wf1"], prep["bf1"], prep["gf1"], prep["betaf1"],
        prep["wf2"], prep["bf2"],
    )
    flops = 2 * (n * oh1 * ow1 * 25 * C * c1
                 + n * oh2 * ow2 * 25 * c1 * c2
                 + n * oh2 * ow2 * c2 * 100
                 + n * 100 * rep)
    bytes_accessed = int(sum(o.size * o.dtype.itemsize for o in operands)
                         + n * rep * 4)

    return pl.pallas_call(
        _make_kernel(n, oh1, ow1, oh2, ow2),
        out_shape=jax.ShapeDtypeStruct((n, rep), jnp.float32),
        in_specs=[_vmem_spec() for _ in operands],
        out_specs=_vmem_spec(),
        scratch_shapes=[
            pltpu.VMEM((n * oh1, ow1 * c1), jnp.float32),          # y1 relayout
            pltpu.VMEM((n * oh2 * ow2 * K, K * c1), jnp.float32),  # conv2 patches
            pltpu.VMEM((n, oh2 * ow2 * c2), jnp.float32),          # fc1 input
        ],
        compiler_params=pltpu.CompilerParams(vmem_limit_bytes=8 * 1024 * 1024),
        cost_estimate=pl.CostEstimate(flops=flops, transcendentals=256,
                                      bytes_accessed=bytes_accessed),
    )(*operands)


# ---------------------------------------------------------------------------
# Plain-XLA reference (same bf16-operand / f32-accumulate mixing) — used only
# for the in-script numerical self-check of the weight/layout re-arrangements.
# ---------------------------------------------------------------------------
def reference_forward(params, x):
    cdt = COMPUTE_DTYPE
    f32 = jnp.float32
    n = x.shape[0]
    p1, oh1, ow1 = im2col(x, K, 2, 1)
    y1 = jnp.dot(p1.astype(cdt), params["w1"].reshape(5, -1).T.astype(cdt),
                 preferred_element_type=f32) + params["b1"][None, :]
    y1 = bn_relu6(y1, params["g1"][None, :], params["beta1"][None, :])
    x1 = y1.reshape(n, oh1, ow1, 5).transpose(0, 3, 1, 2)
    p2, oh2, ow2 = im2col(x1, K, 2, 0)
    y2 = jnp.dot(p2.astype(cdt), params["w2"].reshape(50, -1).T.astype(cdt),
                 preferred_element_type=f32) + params["b2"][None, :]
    y2 = bn_relu6(y2, params["g2"][None, :], params["beta2"][None, :])
    flat = y2.reshape(n, oh2, ow2, 50).transpose(0, 3, 1, 2).reshape(n, -1)
    h = jnp.dot(flat.astype(cdt), params["wf1"].T.astype(cdt),
                preferred_element_type=f32) + params["bf1"][None, :]
    h = bn_relu6(h, params["gf1"][None, :], params["betaf1"][None, :])
    return jnp.dot(h.astype(cdt), params["wf2"].T.astype(cdt),
                   preferred_element_type=f32) + params["bf2"][None, :]


if __name__ == "__main__":
    key = jax.random.PRNGKey(0)
    k_x, k_p = jax.random.split(key)

    # Linear(50*5*5, 100) after the two strided convs forces a 28x28 input.
    batch, C, H, W = 2, 4, 28, 28
    representation_dim = 32

    x = jax.random.normal(k_x, (batch, C, H, W), jnp.float32)
    params = init_params(k_p, C, representation_dim)
    prep = prepare_params(params, (batch, C, H, W))

    forward = jax.jit(encoder_forward)
    out = forward(prep, x)
    jax.block_until_ready(out)

    assert out.shape == (batch, representation_dim), out.shape
    assert bool(jnp.all(jnp.isfinite(out)))

    # Self-check of the fused kernel against the straightforward XLA reference
    # (identical bf16/f32 mixing, so only fp-order noise is expected).
    ref = reference_forward(params, x)
    err = float(jnp.max(jnp.abs(out - ref)))
    assert bool(jnp.allclose(out, ref, atol=5e-2, rtol=5e-2)), err

    print("KERNEL_OK")
</pallas_src>

<mosaic_0001>
module attributes {stable_mosaic.version = 11 : i64} {
  func.func @kernel(%arg0: memref<338x100xbf16, #tpu.memory_space<vmem>>, %arg1: memref<100x5xbf16, #tpu.memory_space<vmem>>, %arg2: memref<1x5xf32, #tpu.memory_space<vmem>>, %arg3: memref<1x5xf32, #tpu.memory_space<vmem>>, %arg4: memref<1x5xf32, #tpu.memory_space<vmem>>, %arg5: memref<5x25x50xbf16, #tpu.memory_space<vmem>>, %arg6: memref<1x50xf32, #tpu.memory_space<vmem>>, %arg7: memref<1x50xf32, #tpu.memory_space<vmem>>, %arg8: memref<1x50xf32, #tpu.memory_space<vmem>>, %arg9: memref<1250x100xbf16, #tpu.memory_space<vmem>>, %arg10: memref<1x100xf32, #tpu.memory_space<vmem>>, %arg11: memref<1x100xf32, #tpu.memory_space<vmem>>, %arg12: memref<1x100xf32, #tpu.memory_space<vmem>>, %arg13: memref<100x32xbf16, #tpu.memory_space<vmem>>, %arg14: memref<1x32xf32, #tpu.memory_space<vmem>>, %arg15: memref<2x32xf32, #tpu.memory_space<vmem>>, %arg16: memref<26x65xf32, #tpu.memory_space<vmem>>, %arg17: memref<250x25xf32, #tpu.memory_space<vmem>>, %arg18: memref<2x1250xf32, #tpu.memory_space<vmem>>) attributes {dimension_semantics = [], scalar_prefetch = 0 : i64, scratch_operands = 3 : i64, tpu.core_type = #tpu.core_type<tc>} {
    %c0 = arith.constant 0 : index
    %c0_0 = arith.constant 0 : index
    %0 = vector.load %arg0[%c0, %c0_0] : memref<338x100xbf16, #tpu.memory_space<vmem>>, vector<338x100xbf16>
    %c0_1 = arith.constant 0 : index
    %c0_2 = arith.constant 0 : index
    %1 = vector.load %arg1[%c0_1, %c0_2] : memref<100x5xbf16, #tpu.memory_space<vmem>>, vector<100x5xbf16>
    %cst = arith.constant dense<0.000000e+00> : vector<338x5xf32>
    %2 = tpu.matmul %0, %1, %cst {dimension_numbers = #tpu.dot_dimension_numbers<[1], [0], [0], [1], [0, 0, 1, 1], [], []>} : vector<338x100xbf16>, vector<100x5xbf16>, vector<338x5xf32> -> vector<338x5xf32>
    %c0_3 = arith.constant 0 : index
    %c0_4 = arith.constant 0 : index
    %3 = vector.load %arg2[%c0_3, %c0_4] : memref<1x5xf32, #tpu.memory_space<vmem>>, vector<1x5xf32>
    %4 = vector.broadcast %3 : vector<1x5xf32> to vector<338x5xf32>
    %5 = arith.addf %2, %4 : vector<338x5xf32>
    %c0_5 = arith.constant 0 : index
    %c0_6 = arith.constant 0 : index
    %6 = vector.load %arg3[%c0_5, %c0_6] : memref<1x5xf32, #tpu.memory_space<vmem>>, vector<1x5xf32>
    %c0_7 = arith.constant 0 : index
    %c0_8 = arith.constant 0 : index
    %7 = vector.load %arg4[%c0_7, %c0_8] : memref<1x5xf32, #tpu.memory_space<vmem>>, vector<1x5xf32>
    %cst_9 = arith.constant dense<0.000000e+00> : vector<5xf32>
    %8 = vector.multi_reduction <add>, %5, %cst_9 [0] : vector<338x5xf32> to vector<5xf32>
    %9 = vector.shape_cast %8 : vector<5xf32> to vector<1x5xf32>
    %cst_10 = arith.constant 3.380000e+02 : f32
    %10 = vector.broadcast %cst_10 : f32 to vector<1x5xf32>
    %11 = arith.divf %9, %10 : vector<1x5xf32>
    %12 = vector.broadcast %11 : vector<1x5xf32> to vector<338x5xf32>
    %13 = arith.subf %5, %12 : vector<338x5xf32>
    %14 = arith.mulf %13, %13 : vector<338x5xf32>
    %cst_11 = arith.constant dense<0.000000e+00> : vector<5xf32>
    %15 = vector.multi_reduction <add>, %14, %cst_11 [0] : vector<338x5xf32> to vector<5xf32>
    %16 = vector.shape_cast %15 : vector<5xf32> to vector<1x5xf32>
    %cst_12 = arith.constant 3.380000e+02 : f32
    %17 = vector.broadcast %cst_12 : f32 to vector<1x5xf32>
    %18 = arith.divf %16, %17 : vector<1x5xf32>
    %cst_13 = arith.constant 9.99999974E-6 : f32
    %19 = vector.broadcast %cst_13 : f32 to vector<1x5xf32>
    %20 = arith.addf %18, %19 : vector<1x5xf32>
    %21 = math.rsqrt %20 : vector<1x5xf32>
    %22 = vector.broadcast %21 : vector<1x5xf32> to vector<338x5xf32>
    %23 = arith.mulf %13, %22 : vector<338x5xf32>
    %24 = vector.broadcast %6 : vector<1x5xf32> to vector<338x5xf32>
    %25 = arith.mulf %23, %24 : vector<338x5xf32>
    %26 = vector.broadcast %7 : vector<1x5xf32> to vector<338x5xf32>
    %27 = arith.addf %25, %26 : vector<338x5xf32>
    %cst_14 = arith.constant 0.000000e+00 : f32
    %cst_15 = arith.constant 6.000000e+00 : f32
    %28 = vector.broadcast %cst_14 : f32 to vector<338x5xf32>
    %29 = arith.maximumf %28, %27 : vector<338x5xf32>
    %30 = vector.broadcast %cst_15 : f32 to vector<338x5xf32>
    %31 = arith.minimumf %30, %29 : vector<338x5xf32>
    %32 = vector.shape_cast %31 : vector<338x5xf32> to vector<13x26x5xf32>
    %33 = vector.extract_strided_slice %32 {offsets = [0, 0, 0], sizes = [1, 26, 5], strides = [1, 1, 1]} : vector<13x26x5xf32> to vector<1x26x5xf32>
    %34 = vector.shape_cast %33 : vector<1x26x5xf32> to vector<26x5xf32>
    %c0_16 = arith.constant 0 : index
    %c0_17 = arith.constant 0 : index
    %35 = vector.load %arg16[%c0_16, %c0_17] : memref<26x65xf32, #tpu.memory_space<vmem>>, vector<26x5xf32>
    tpu.vector_store %arg16[%c0_16, %c0_17], %34 {strides = array<i32>} : memref<26x65xf32, #tpu.memory_space<vmem>>, vector<26x5xf32>,
    %36 = vector.extract_strided_slice %32 {offsets = [1, 0, 0], sizes = [1, 26, 5], strides = [1, 1, 1]} : vector<13x26x5xf32> to vector<1x26x5xf32>
    %37 = vector.shape_cast %36 : vector<1x26x5xf32> to vector<26x5xf32>
    %c0_18 = arith.constant 0 : index
    %c5 = arith.constant 5 : index
    %38 = vector.load %arg16[%c0_18, %c5] : memref<26x65xf32, #tpu.memory_space<vmem>>, vector<26x5xf32>
    tpu.vector_store %arg16[%c0_18, %c5], %37 {strides = array<i32>} : memref<26x65xf32, #tpu.memory_space<vmem>>, vector<26x5xf32>,
    %39 = vector.extract_strided_slice %32 {offsets = [2, 0, 0], sizes = [1, 26, 5], strides = [1, 1, 1]} : vector<13x26x5xf32> to vector<1x26x5xf32>
    %40 = vector.shape_cast %39 : vector<1x26x5xf32> to vector<26x5xf32>
    %c0_19 = arith.constant 0 : index
    %c10 = arith.constant 10 : index
    %41 = vector.load %arg16[%c0_19, %c10] : memref<26x65xf32, #tpu.memory_space<vmem>>, vector<26x5xf32>
    tpu.vector_store %arg16[%c0_19, %c10], %40 {strides = array<i32>} : memref<26x65xf32, #tpu.memory_space<vmem>>, vector<26x5xf32>,
    %42 = vector.extract_strided_slice %32 {offsets = [3, 0, 0], sizes = [1, 26, 5], strides = [1, 1, 1]} : vector<13x26x5xf32> to vector<1x26x5xf32>
    %43 = vector.shape_cast %42 : vector<1x26x5xf32> to vector<26x5xf32>
    %c0_20 = arith.constant 0 : index
    %c15 = arith.constant 15 : index
    %44 = vector.load %arg16[%c0_20, %c15] : memref<26x65xf32, #tpu.memory_space<vmem>>, vector<26x5xf32>
    tpu.vector_store %arg16[%c0_20, %c15], %43 {strides = array<i32>} : memref<26x65xf32, #tpu.memory_space<vmem>>, vector<26x5xf32>,
    %45 = vector.extract_strided_slice %32 {offsets = [4, 0, 0], sizes = [1, 26, 5], strides = [1, 1, 1]} : vector<13x26x5xf32> to vector<1x26x5xf32>
    %46 = vector.shape_cast %45 : vector<1x26x5xf32> to vector<26x5xf32>
    %c0_21 = arith.constant 0 : index
    %c20 = arith.constant 20 : index
    %47 = vector.load %arg16[%c0_21, %c20] : memref<26x65xf32, #tpu.memory_space<vmem>>, vector<26x5xf32>
    tpu.vector_store %arg16[%c0_21, %c20], %46 {strides = array<i32>} : memref<26x65xf32, #tpu.memory_space<vmem>>, vector<26x5xf32>,
    %48 = vector.extract_strided_slice %32 {offsets = [5, 0, 0], sizes = [1, 26, 5], strides = [1, 1, 1]} : vector<13x26x5xf32> to vector<1x26x5xf32>
    %49 = vector.shape_cast %48 : vector<1x26x5xf32> to vector<26x5xf32>
    %c0_22 = arith.constant 0 : index
    %c25 = arith.constant 25 : index
    %50 = vector.load %arg16[%c0_22, %c25] : memref<26x65xf32, #tpu.memory_space<vmem>>, vector<26x5xf32>
    tpu.vector_store %arg16[%c0_22, %c25], %49 {strides = array<i32>} : memref<26x65xf32, #tpu.memory_space<vmem>>, vector<26x5xf32>,
    %51 = vector.extract_strided_slice %32 {offsets = [6, 0, 0], sizes = [1, 26, 5], strides = [1, 1, 1]} : vector<13x26x5xf32> to vector<1x26x5xf32>
    %52 = vector.shape_cast %51 : vector<1x26x5xf32> to vector<26x5xf32>
    %c0_23 = arith.constant 0 : index
    %c30 = arith.constant 30 : index
    %53 = vector.load %arg16[%c0_23, %c30] : memref<26x65xf32, #tpu.memory_space<vmem>>, vector<26x5xf32>
    tpu.vector_store %arg16[%c0_23, %c30], %52 {strides = array<i32>} : memref<26x65xf32, #tpu.memory_space<vmem>>, vector<26x5xf32>,
    %54 = vector.extract_strided_slice %32 {offsets = [7, 0, 0], sizes = [1, 26, 5], strides = [1, 1, 1]} : vector<13x26x5xf32> to vector<1x26x5xf32>
    %55 = vector.shape_cast %54 : vector<1x26x5xf32> to vector<26x5xf32>
    %c0_24 = arith.constant 0 : index
    %c35 = arith.constant 35 : index
    %56 = vector.load %arg16[%c0_24, %c35] : memref<26x65xf32, #tpu.memory_space<vmem>>, vector<26x5xf32>
    tpu.vector_store %arg16[%c0_24, %c35], %55 {strides = array<i32>} : memref<26x65xf32, #tpu.memory_space<vmem>>, vector<26x5xf32>,
    %57 = vector.extract_strided_slice %32 {offsets = [8, 0, 0], sizes = [1, 26, 5], strides = [1, 1, 1]} : vector<13x26x5xf32> to vector<1x26x5xf32>
    %58 = vector.shape_cast %57 : vector<1x26x5xf32> to vector<26x5xf32>
    %c0_25 = arith.constant 0 : index
    %c40 = arith.constant 40 : index
    %59 = vector.load %arg16[%c0_25, %c40] : memref<26x65xf32, #tpu.memory_space<vmem>>, vector<26x5xf32>
    tpu.vector_store %arg16[%c0_25, %c40], %58 {strides = array<i32>} : memref<26x65xf32, #tpu.memory_space<vmem>>, vector<26x5xf32>,
    %60 = vector.extract_strided_slice %32 {offsets = [9, 0, 0], sizes = [1, 26, 5], strides = [1, 1, 1]} : vector<13x26x5xf32> to vector<1x26x5xf32>
    %61 = vector.shape_cast %60 : vector<1x26x5xf32> to vector<26x5xf32>
    %c0_26 = arith.constant 0 : index
    %c45 = arith.constant 45 : index
    %62 = vector.load %arg16[%c0_26, %c45] : memref<26x65xf32, #tpu.memory_space<vmem>>, vector<26x5xf32>
    tpu.vector_store %arg16[%c0_26, %c45], %61 {strides = array<i32>} : memref<26x65xf32, #tpu.memory_space<vmem>>, vector<26x5xf32>,
    %63 = vector.extract_strided_slice %32 {offsets = [10, 0, 0], sizes = [1, 26, 5], strides = [1, 1, 1]} : vector<13x26x5xf32> to vector<1x26x5xf32>
    %64 = vector.shape_cast %63 : vector<1x26x5xf32> to vector<26x5xf32>
    %c0_27 = arith.constant 0 : index
    %c50 = arith.constant 50 : index
    %65 = vector.load %arg16[%c0_27, %c50] : memref<26x65xf32, #tpu.memory_space<vmem>>, vector<26x5xf32>
    tpu.vector_store %arg16[%c0_27, %c50], %64 {strides = array<i32>} : memref<26x65xf32, #tpu.memory_space<vmem>>, vector<26x5xf32>,
    %66 = vector.extract_strided_slice %32 {offsets = [11, 0, 0], sizes = [1, 26, 5], strides = [1, 1, 1]} : vector<13x26x5xf32> to vector<1x26x5xf32>
    %67 = vector.shape_cast %66 : vector<1x26x5xf32> to vector<26x5xf32>
    %c0_28 = arith.constant 0 : index
    %c55 = arith.constant 55 : index
    %68 = vector.load %arg16[%c0_28, %c55] : memref<26x65xf32, #tpu.memory_space<vmem>>, vector<26x5xf32>
    tpu.vector_store %arg16[%c0_28, %c55], %67 {strides = array<i32>} : memref<26x65xf32, #tpu.memory_space<vmem>>, vector<26x5xf32>,
    %69 = vector.extract_strided_slice %32 {offsets = [12, 0, 0], sizes = [1, 26, 5], strides = [1, 1, 1]} : vector<13x26x5xf32> to vector<1x26x5xf32>
    %70 = vector.shape_cast %69 : vector<1x26x5xf32> to vector<26x5xf32>
    %c0_29 = arith.constant 0 : index
    %c60 = arith.constant 60 : index
    %71 = vector.load %arg16[%c0_29, %c60] : memref<26x65xf32, #tpu.memory_space<vmem>>, vector<26x5xf32>
    tpu.vector_store %arg16[%c0_29, %c60], %70 {strides = array<i32>} : memref<26x65xf32, #tpu.memory_space<vmem>>, vector<26x5xf32>,
    %c0_30 = arith.constant 0 : index
    %c0_31 = arith.constant 0 : index
    %72 = vector.load %arg16[%c0_30, %c0_31] : memref<26x65xf32, #tpu.memory_space<vmem>>, vector<5x25xf32>
    %c0_32 = arith.constant 0 : index
    %c0_33 = arith.constant 0 : index
    %73 = vector.load %arg17[%c0_32, %c0_33] : memref<250x25xf32, #tpu.memory_space<vmem>>, vector<5x25xf32>
    tpu.vector_store %arg17[%c0_32, %c0_33], %72 {strides = array<i32>} : memref<250x25xf32, #tpu.memory_space<vmem>>, vector<5x25xf32>,
    %c0_34 = arith.constant 0 : index
    %c10_35 = arith.constant 10 : index
    %74 = vector.load %arg16[%c0_34, %c10_35] : memref<26x65xf32, #tpu.memory_space<vmem>>, vector<5x25xf32>
    %c10_36 = arith.constant 10 : index
    %c0_37 = arith.constant 0 : index
    %75 = vector.load %arg17[%c10_36, %c0_37] : memref<250x25xf32, #tpu.memory_space<vmem>>, vector<5x25xf32>
    tpu.vector_store %arg17[%c10_36, %c0_37], %74 {strides = array<i32>} : memref<250x25xf32, #tpu.memory_space<vmem>>, vector<5x25xf32>,
    %c0_38 = arith.constant 0 : index
    %c20_39 = arith.constant 20 : index
    %76 = vector.load %arg16[%c0_38, %c20_39] : memref<26x65xf32, #tpu.memory_space<vmem>>, vector<5x25xf32>
    %c20_40 = arith.constant 20 : index
    %c0_41 = arith.constant 0 : index
    %77 = vector.load %arg17[%c20_40, %c0_41] : memref<250x25xf32, #tpu.memory_space<vmem>>, vector<5x25xf32>
    tpu.vector_store %arg17[%c20_40, %c0_41], %76 {strides = array<i32>} : memref<250x25xf32, #tpu.memory_space<vmem>>, vector<5x25xf32>,
    %c0_42 = arith.constant 0 : index
    %c30_43 = arith.constant 30 : index
    %78 = vector.load %arg16[%c0_42, %c30_43] : memref<26x65xf32, #tpu.memory_space<vmem>>, vector<5x25xf32>
    %c30_44 = arith.constant 30 : index
    %c0_45 = arith.constant 0 : index
    %79 = vector.load %arg17[%c30_44, %c0_45] : memref<250x25xf32, #tpu.memory_space<vmem>>, vector<5x25xf32>
    tpu.vector_store %arg17[%c30_44, %c0_45], %78 {strides = array<i32>} : memref<250x25xf32, #tpu.memory_space<vmem>>, vector<5x25xf32>,
    %c0_46 = arith.constant 0 : index
    %c40_47 = arith.constant 40 : index
    %80 = vector.load %arg16[%c0_46, %c40_47] : memref<26x65xf32, #tpu.memory_space<vmem>>, vector<5x25xf32>
    %c40_48 = arith.constant 40 : index
    %c0_49 = arith.constant 0 : index
    %81 = vector.load %arg17[%c40_48, %c0_49] : memref<250x25xf32, #tpu.memory_space<vmem>>, vector<5x25xf32>
    tpu.vector_store %arg17[%c40_48, %c0_49], %80 {strides = array<i32>} : memref<250x25xf32, #tpu.memory_space<vmem>>, vector<5x25xf32>,
    %c2 = arith.constant 2 : index
    %c0_50 = arith.constant 0 : index
    %82 = vector.load %arg16[%c2, %c0_50] : memref<26x65xf32, #tpu.memory_space<vmem>>, vector<5x25xf32>
    %c50_51 = arith.constant 50 : index
    %c0_52 = arith.constant 0 : index
    %83 = vector.load %arg17[%c50_51, %c0_52] : memref<250x25xf32, #tpu.memory_space<vmem>>, vector<5x25xf32>
    tpu.vector_store %arg17[%c50_51, %c0_52], %82 {strides = array<i32>} : memref<250x25xf32, #tpu.memory_space<vmem>>, vector<5x25xf32>,
    %c2_53 = arith.constant 2 : index
    %c10_54 = arith.constant 10 : index
    %84 = vector.load %arg16[%c2_53, %c10_54] : memref<26x65xf32, #tpu.memory_space<vmem>>, vector<5x25xf32>
    %c60_55 = arith.constant 60 : index
    %c0_56 = arith.constant 0 : index
    %85 = vector.load %arg17[%c60_55, %c0_56] : memref<250x25xf32, #tpu.memory_space<vmem>>, vector<5x25xf32>
    tpu.vector_store %arg17[%c60_55, %c0_56], %84 {strides = array<i32>} : memref<250x25xf32, #tpu.memory_space<vmem>>, vector<5x25xf32>,
    %c2_57 = arith.constant 2 : index
    %c20_58 = arith.constant 20 : index
    %86 = vector.load %arg16[%c2_57, %c20_58] : memref<26x65xf32, #tpu.memory_space<vmem>>, vector<5x25xf32>
    %c70 = arith.constant 70 : index
    %c0_59 = arith.constant 0 : index
    %87 = vector.load %arg17[%c70, %c0_59] : memref<250x25xf32, #tpu.memory_space<vmem>>, vector<5x25xf32>
    tpu.vector_store %arg17[%c70, %c0_59], %86 {strides = array<i32>} : memref<250x25xf32, #tpu.memory_space<vmem>>, vector<5x25xf32>,
    %c2_60 = arith.constant 2 : index
    %c30_61 = arith.constant 30 : index
    %88 = vector.load %arg16[%c2_60, %c30_61] : memref<26x65xf32, #tpu.memory_space<vmem>>, vector<5x25xf32>
    %c80 = arith.constant 80 : index
    %c0_62 = arith.constant 0 : index
    %89 = vector.load %arg17[%c80, %c0_62] : memref<250x25xf32, #tpu.memory_space<vmem>>, vector<5x25xf32>
    tpu.vector_store %arg17[%c80, %c0_62], %88 {strides = array<i32>} : memref<250x25xf32, #tpu.memory_space<vmem>>, vector<5x25xf32>,
    %c2_63 = arith.constant 2 : index
    %c40_64 = arith.constant 40 : index
    %90 = vector.load %arg16[%c2_63, %c40_64] : memref<26x65xf32, #tpu.memory_space<vmem>>, vector<5x25xf32>
    %c90 = arith.constant 90 : index
    %c0_65 = arith.constant 0 : index
    %91 = vector.load %arg17[%c90, %c0_65] : memref<250x25xf32, #tpu.memory_space<vmem>>, vector<5x25xf32>
    tpu.vector_store %arg17[%c90, %c0_65], %90 {strides = array<i32>} : memref<250x25xf32, #tpu.memory_space<vmem>>, vector<5x25xf32>,
    %c4 = arith.constant 4 : index
    %c0_66 = arith.constant 0 : index
    %92 = vector.load %arg16[%c4, %c0_66] : memref<26x65xf32, #tpu.memory_space<vmem>>, vector<5x25xf32>
    %c100 = arith.constant 100 : index
    %c0_67 = arith.constant 0 : index
    %93 = vector.load %arg17[%c100, %c0_67] : memref<250x25xf32, #tpu.memory_space<vmem>>, vector<5x25xf32>
    tpu.vector_store %arg17[%c100, %c0_67], %92 {strides = array<i32>} : memref<250x25xf32, #tpu.memory_space<vmem>>, vector<5x25xf32>,
    %c4_68 = arith.constant 4 : index
    %c10_69 = arith.constant 10 : index
    %94 = vector.load %arg16[%c4_68, %c10_69] : memref<26x65xf32, #tpu.memory_space<vmem>>, vector<5x25xf32>
    %c110 = arith.constant 110 : index
    %c0_70 = arith.constant 0 : index
    %95 = vector.load %arg17[%c110, %c0_70] : memref<250x25xf32, #tpu.memory_space<vmem>>, vector<5x25xf32>
    tpu.vector_store %arg17[%c110, %c0_70], %94 {strides = array<i32>} : memref<250x25xf32, #tpu.memory_space<vmem>>, vector<5x25xf32>,
    %c4_71 = arith.constant 4 : index
    %c20_72 = arith.constant 20 : index
    %96 = vector.load %arg16[%c4_71, %c20_72] : memref<26x65xf32, #tpu.memory_space<vmem>>, vector<5x25xf32>
    %c120 = arith.constant 120 : index
    %c0_73 = arith.constant 0 : index
    %97 = vector.load %arg17[%c120, %c0_73] : memref<250x25xf32, #tpu.memory_space<vmem>>, vector<5x25xf32>
    tpu.vector_store %arg17[%c120, %c0_73], %96 {strides = array<i32>} : memref<250x25xf32, #tpu.memory_space<vmem>>, vector<5x25xf32>,
    %c4_74 = arith.constant 4 : index
    %c30_75 = arith.constant 30 : index
    %98 = vector.load %arg16[%c4_74, %c30_75] : memref<26x65xf32, #tpu.memory_space<vmem>>, vector<5x25xf32>
    %c130 = arith.constant 130 : index
    %c0_76 = arith.constant 0 : index
    %99 = vector.load %arg17[%c130, %c0_76] : memref<250x25xf32, #tpu.memory_space<vmem>>, vector<5x25xf32>
    tpu.vector_store %arg17[%c130, %c0_76], %98 {strides = array<i32>} : memref<250x25xf32, #tpu.memory_space<vmem>>, vector<5x25xf32>,
    %c4_77 = arith.constant 4 : index
    %c40_78 = arith.constant 40 : index
    %100 = vector.load %arg16[%c4_77, %c40_78] : memref<26x65xf32, #tpu.memory_space<vmem>>, vector<5x25xf32>
    %c140 = arith.constant 140 : index
    %c0_79 = arith.constant 0 : index
    %101 = vector.load %arg17[%c140, %c0_79] : memref<250x25xf32, #tpu.memory_space<vmem>>, vector<5x25xf32>
    tpu.vector_store %arg17[%c140, %c0_79], %100 {strides = array<i32>} : memref<250x25xf32, #tpu.memory_space<vmem>>, vector<5x25xf32>,
    %c6 = arith.constant 6 : index
    %c0_80 = arith.constant 0 : index
    %102 = vector.load %arg16[%c6, %c0_80] : memref<26x65xf32, #tpu.memory_space<vmem>>, vector<5x25xf32>
    %c150 = arith.constant 150 : index
    %c0_81 = arith.constant 0 : index
    %103 = vector.load %arg17[%c150, %c0_81] : memref<250x25xf32, #tpu.memory_space<vmem>>, vector<5x25xf32>
    tpu.vector_store %arg17[%c150, %c0_81], %102 {strides = array<i32>} : memref<250x25xf32, #tpu.memory_space<vmem>>, vector<5x25xf32>,
    %c6_82 = arith.constant 6 : index
    %c10_83 = arith.constant 10 : index
    %104 = vector.load %arg16[%c6_82, %c10_83] : memref<26x65xf32, #tpu.memory_space<vmem>>, vector<5x25xf32>
    %c160 = arith.constant 160 : index
    %c0_84 = arith.constant 0 : index
    %105 = vector.load %arg17[%c160, %c0_84] : memref<250x25xf32, #tpu.memory_space<vmem>>, vector<5x25xf32>
    tpu.vector_store %arg17[%c160, %c0_84], %104 {strides = array<i32>} : memref<250x25xf32, #tpu.memory_space<vmem>>, vector<5x25xf32>,
    %c6_85 = arith.constant 6 : index
    %c20_86 = arith.constant 20 : index
    %106 = vector.load %arg16[%c6_85, %c20_86] : memref<26x65xf32, #tpu.memory_space<vmem>>, vector<5x25xf32>
    %c170 = arith.constant 170 : index
    %c0_87 = arith.constant 0 : index
    %107 = vector.load %arg17[%c170, %c0_87] : memref<250x25xf32, #tpu.memory_space<vmem>>, vector<5x25xf32>
    tpu.vector_store %arg17[%c170, %c0_87], %106 {strides = array<i32>} : memref<250x25xf32, #tpu.memory_space<vmem>>, vector<5x25xf32>,
    %c6_88 = arith.constant 6 : index
    %c30_89 = arith.constant 30 : index
    %108 = vector.load %arg16[%c6_88, %c30_89] : memref<26x65xf32, #tpu.memory_space<vmem>>, vector<5x25xf32>
    %c180 = arith.constant 180 : index
    %c0_90 = arith.constant 0 : index
    %109 = vector.load %arg17[%c180, %c0_90] : memref<250x25xf32, #tpu.memory_space<vmem>>, vector<5x25xf32>
    tpu.vector_store %arg17[%c180, %c0_90], %108 {strides = array<i32>} : memref<250x25xf32, #tpu.memory_space<vmem>>, vector<5x25xf32>,
    %c6_91 = arith.constant 6 : index
    %c40_92 = arith.constant 40 : index
    %110 = vector.load %arg16[%c6_91, %c40_92] : memref<26x65xf32, #tpu.memory_space<vmem>>, vector<5x25xf32>
    %c190 = arith.constant 190 : index
    %c0_93 = arith.constant 0 : index
    %111 = vector.load %arg17[%c190, %c0_93] : memref<250x25xf32, #tpu.memory_space<vmem>>, vector<5x25xf32>
    tpu.vector_store %arg17[%c190, %c0_93], %110 {strides = array<i32>} : memref<250x25xf32, #tpu.memory_space<vmem>>, vector<5x25xf32>,
    %c8 = arith.constant 8 : index
    %c0_94 = arith.constant 0 : index
    %112 = vector.load %arg16[%c8, %c0_94] : memref<26x65xf32, #tpu.memory_space<vmem>>, vector<5x25xf32>
    %c200 = arith.constant 200 : index
    %c0_95 = arith.constant 0 : index
    %113 = vector.load %arg17[%c200, %c0_95] : memref<250x25xf32, #tpu.memory_space<vmem>>, vector<5x25xf32>
    tpu.vector_store %arg17[%c200, %c0_95], %112 {strides = array<i32>} : memref<250x25xf32, #tpu.memory_space<vmem>>, vector<5x25xf32>,
    %c8_96 = arith.constant 8 : index
    %c10_97 = arith.constant 10 : index
    %114 = vector.load %arg16[%c8_96, %c10_97] : memref<26x65xf32, #tpu.memory_space<vmem>>, vector<5x25xf32>
    %c210 = arith.constant 210 : index
    %c0_98 = arith.constant 0 : index
    %115 = vector.load %arg17[%c210, %c0_98] : memref<250x25xf32, #tpu.memory_space<vmem>>, vector<5x25xf32>
    tpu.vector_store %arg17[%c210, %c0_98], %114 {strides = array<i32>} : memref<250x25xf32, #tpu.memory_space<vmem>>, vector<5x25xf32>,
    %c8_99 = arith.constant 8 : index
    %c20_100 = arith.constant 20 : index
    %116 = vector.load %arg16[%c8_99, %c20_100] : memref<26x65xf32, #tpu.memory_space<vmem>>, vector<5x25xf32>
    %c220 = arith.constant 220 : index
    %c0_101 = arith.constant 0 : index
    %117 = vector.load %arg17[%c220, %c0_101] : memref<250x25xf32, #tpu.memory_space<vmem>>, vector<5x25xf32>
    tpu.vector_store %arg17[%c220, %c0_101], %116 {strides = array<i32>} : memref<250x25xf32, #tpu.memory_space<vmem>>, vector<5x25xf32>,
    %c8_102 = arith.constant 8 : index
    %c30_103 = arith.constant 30 : index
    %118 = vector.load %arg16[%c8_102, %c30_103] : memref<26x65xf32, #tpu.memory_space<vmem>>, vector<5x25xf32>
    %c230 = arith.constant 230 : index
    %c0_104 = arith.constant 0 : index
    %119 = vector.load %arg17[%c230, %c0_104] : memref<250x25xf32, #tpu.memory_space<vmem>>, vector<5x25xf32>
    tpu.vector_store %arg17[%c230, %c0_104], %118 {strides = array<i32>} : memref<250x25xf32, #tpu.memory_space<vmem>>, vector<5x25xf32>,
    %c8_105 = arith.constant 8 : index
    %c40_106 = arith.constant 40 : index
    %120 = vector.load %arg16[%c8_105, %c40_106] : memref<26x65xf32, #tpu.memory_space<vmem>>, vector<5x25xf32>
    %c240 = arith.constant 240 : index
    %c0_107 = arith.constant 0 : index
    %121 = vector.load %arg17[%c240, %c0_107] : memref<250x25xf32, #tpu.memory_space<vmem>>, vector<5x25xf32>
    tpu.vector_store %arg17[%c240, %c0_107], %120 {strides = array<i32>} : memref<250x25xf32, #tpu.memory_space<vmem>>, vector<5x25xf32>,
    %c13 = arith.constant 13 : index
    %c0_108 = arith.constant 0 : index
    %122 = vector.load %arg16[%c13, %c0_108] : memref<26x65xf32, #tpu.memory_space<vmem>>, vector<5x25xf32>
    %c5_109 = arith.constant 5 : index
    %c0_110 = arith.constant 0 : index
    %123 = vector.load %arg17[%c5_109, %c0_110] : memref<250x25xf32, #tpu.memory_space<vmem>>, vector<5x25xf32>
    tpu.vector_store %arg17[%c5_109, %c0_110], %122 {strides = array<i32>} : memref<250x25xf32, #tpu.memory_space<vmem>>, vector<5x25xf32>,
    %c13_111 = arith.constant 13 : index
    %c10_112 = arith.constant 10 : index
    %124 = vector.load %arg16[%c13_111, %c10_112] : memref<26x65xf32, #tpu.memory_space<vmem>>, vector<5x25xf32>
    %c15_113 = arith.constant 15 : index
    %c0_114 = arith.constant 0 : index
    %125 = vector.load %arg17[%c15_113, %c0_114] : memref<250x25xf32, #tpu.memory_space<vmem>>, vector<5x25xf32>
    tpu.vector_store %arg17[%c15_113, %c0_114], %124 {strides = array<i32>} : memref<250x25xf32, #tpu.memory_space<vmem>>, vector<5x25xf32>,
    %c13_115 = arith.constant 13 : index
    %c20_116 = arith.constant 20 : index
    %126 = vector.load %arg16[%c13_115, %c20_116] : memref<26x65xf32, #tpu.memory_space<vmem>>, vector<5x25xf32>
    %c25_117 = arith.constant 25 : index
    %c0_118 = arith.constant 0 : index
    %127 = vector.load %arg17[%c25_117, %c0_118] : memref<250x25xf32, #tpu.memory_space<vmem>>, vector<5x25xf32>
    tpu.vector_store %arg17[%c25_117, %c0_118], %126 {strides = array<i32>} : memref<250x25xf32, #tpu.memory_space<vmem>>, vector<5x25xf32>,
    %c13_119 = arith.constant 13 : index
    %c30_120 = arith.constant 30 : index
    %128 = vector.load %arg16[%c13_119, %c30_120] : memref<26x65xf32, #tpu.memory_space<vmem>>, vector<5x25xf32>
    %c35_121 = arith.constant 35 : index
    %c0_122 = arith.constant 0 : index
    %129 = vector.load %arg17[%c35_121, %c0_122] : memref<250x25xf32, #tpu.memory_space<vmem>>, vector<5x25xf32>
    tpu.vector_store %arg17[%c35_121, %c0_122], %128 {strides = array<i32>} : memref<250x25xf32, #tpu.memory_space<vmem>>, vector<5x25xf32>,
    %c13_123 = arith.constant 13 : index
    %c40_124 = arith.constant 40 : index
    %130 = vector.load %arg16[%c13_123, %c40_124] : memref<26x65xf32, #tpu.memory_space<vmem>>, vector<5x25xf32>
    %c45_125 = arith.constant 45 : index
    %c0_126 = arith.constant 0 : index
    %131 = vector.load %arg17[%c45_125, %c0_126] : memref<250x25xf32, #tpu.memory_space<vmem>>, vector<5x25xf32>
    tpu.vector_store %arg17[%c45_125, %c0_126], %130 {strides = array<i32>} : memref<250x25xf32, #tpu.memory_space<vmem>>, vector<5x25xf32>,
    %c15_127 = arith.constant 15 : index
    %c0_128 = arith.constant 0 : index
    %132 = vector.load %arg16[%c15_127, %c0_128] : memref<26x65xf32, #tpu.memory_space<vmem>>, vector<5x25xf32>
    %c55_129 = arith.constant 55 : index
    %c0_130 = arith.constant 0 : index
    %133 = vector.load %arg17[%c55_129, %c0_130] : memref<250x25xf32, #tpu.memory_space<vmem>>, vector<5x25xf32>
    tpu.vector_store %arg17[%c55_129, %c0_130], %132 {strides = array<i32>} : memref<250x25xf32, #tpu.memory_space<vmem>>, vector<5x25xf32>,
    %c15_131 = arith.constant 15 : index
    %c10_132 = arith.constant 10 : index
    %134 = vector.load %arg16[%c15_131, %c10_132] : memref<26x65xf32, #tpu.memory_space<vmem>>, vector<5x25xf32>
    %c65 = arith.constant 65 : index
    %c0_133 = arith.constant 0 : index
    %135 = vector.load %arg17[%c65, %c0_133] : memref<250x25xf32, #tpu.memory_space<vmem>>, vector<5x25xf32>
    tpu.vector_store %arg17[%c65, %c0_133], %134 {strides = array<i32>} : memref<250x25xf32, #tpu.memory_space<vmem>>, vector<5x25xf32>,
    %c15_134 = arith.constant 15 : index
    %c20_135 = arith.constant 20 : index
    %136 = vector.load %arg16[%c15_134, %c20_135] : memref<26x65xf32, #tpu.memory_space<vmem>>, vector<5x25xf32>
    %c75 = arith.constant 75 : index
    %c0_136 = arith.constant 0 : index
    %137 = vector.load %arg17[%c75, %c0_136] : memref<250x25xf32, #tpu.memory_space<vmem>>, vector<5x25xf32>
    tpu.vector_store %arg17[%c75, %c0_136], %136 {strides = array<i32>} : memref<250x25xf32, #tpu.memory_space<vmem>>, vector<5x25xf32>,
    %c15_137 = arith.constant 15 : index
    %c30_138 = arith.constant 30 : index
    %138 = vector.load %arg16[%c15_137, %c30_138] : memref<26x65xf32, #tpu.memory_space<vmem>>, vector<5x25xf32>
    %c85 = arith.constant 85 : index
    %c0_139 = arith.constant 0 : index
    %139 = vector.load %arg17[%c85, %c0_139] : memref<250x25xf32, #tpu.memory_space<vmem>>, vector<5x25xf32>
    tpu.vector_store %arg17[%c85, %c0_139], %138 {strides = array<i32>} : memref<250x25xf32, #tpu.memory_space<vmem>>, vector<5x25xf32>,
    %c15_140 = arith.constant 15 : index
    %c40_141 = arith.constant 40 : index
    %140 = vector.load %arg16[%c15_140, %c40_141] : memref<26x65xf32, #tpu.memory_space<vmem>>, vector<5x25xf32>
    %c95 = arith.constant 95 : index
    %c0_142 = arith.constant 0 : index
    %141 = vector.load %arg17[%c95, %c0_142] : memref<250x25xf32, #tpu.memory_space<vmem>>, vector<5x25xf32>
    tpu.vector_store %arg17[%c95, %c0_142], %140 {strides = array<i32>} : memref<250x25xf32, #tpu.memory_space<vmem>>, vector<5x25xf32>,
    %c17 = arith.constant 17 : index
    %c0_143 = arith.constant 0 : index
    %142 = vector.load %arg16[%c17, %c0_143] : memref<26x65xf32, #tpu.memory_space<vmem>>, vector<5x25xf32>
    %c105 = arith.constant 105 : index
    %c0_144 = arith.constant 0 : index
    %143 = vector.load %arg17[%c105, %c0_144] : memref<250x25xf32, #tpu.memory_space<vmem>>, vector<5x25xf32>
    tpu.vector_store %arg17[%c105, %c0_144], %142 {strides = array<i32>} : memref<250x25xf32, #tpu.memory_space<vmem>>, vector<5x25xf32>,
    %c17_145 = arith.constant 17 : index
    %c10_146 = arith.constant 10 : index
    %144 = vector.load %arg16[%c17_145, %c10_146] : memref<26x65xf32, #tpu.memory_space<vmem>>, vector<5x25xf32>
    %c115 = arith.constant 115 : index
    %c0_147 = arith.constant 0 : index
    %145 = vector.load %arg17[%c115, %c0_147] : memref<250x25xf32, #tpu.memory_space<vmem>>, vector<5x25xf32>
    tpu.vector_store %arg17[%c115, %c0_147], %144 {strides = array<i32>} : memref<250x25xf32, #tpu.memory_space<vmem>>, vector<5x25xf32>,
    %c17_148 = arith.constant 17 : index
    %c20_149 = arith.constant 20 : index
    %146 = vector.load %arg16[%c17_148, %c20_149] : memref<26x65xf32, #tpu.memory_space<vmem>>, vector<5x25xf32>
    %c125 = arith.constant 125 : index
    %c0_150 = arith.constant 0 : index
    %147 = vector.load %arg17[%c125, %c0_150] : memref<250x25xf32, #tpu.memory_space<vmem>>, vector<5x25xf32>
    tpu.vector_store %arg17[%c125, %c0_150], %146 {strides = array<i32>} : memref<250x25xf32, #tpu.memory_space<vmem>>, vector<5x25xf32>,
    %c17_151 = arith.constant 17 : index
    %c30_152 = arith.constant 30 : index
    %148 = vector.load %arg16[%c17_151, %c30_152] : memref<26x65xf32, #tpu.memory_space<vmem>>, vector<5x25xf32>
    %c135 = arith.constant 135 : index
    %c0_153 = arith.constant 0 : index
    %149 = vector.load %arg17[%c135, %c0_153] : memref<250x25xf32, #tpu.memory_space<vmem>>, vector<5x25xf32>
    tpu.vector_store %arg17[%c135, %c0_153], %148 {strides = array<i32>} : memref<250x25xf32, #tpu.memory_space<vmem>>, vector<5x25xf32>,
    %c17_154 = arith.constant 17 : index
    %c40_155 = arith.constant 40 : index
    %150 = vector.load %arg16[%c17_154, %c40_155] : memref<26x65xf32, #tpu.memory_space<vmem>>, vector<5x25xf32>
    %c145 = arith.constant 145 : index
    %c0_156 = arith.constant 0 : index
    %151 = vector.load %arg17[%c145, %c0_156] : memref<250x25xf32, #tpu.memory_space<vmem>>, vector<5x25xf32>
    tpu.vector_store %arg17[%c145, %c0_156], %150 {strides = array<i32>} : memref<250x25xf32, #tpu.memory_space<vmem>>, vector<5x25xf32>,
    %c19 = arith.constant 19 : index
    %c0_157 = arith.constant 0 : index
    %152 = vector.load %arg16[%c19, %c0_157] : memref<26x65xf32, #tpu.memory_space<vmem>>, vector<5x25xf32>
    %c155 = arith.constant 155 : index
    %c0_158 = arith.constant 0 : index
    %153 = vector.load %arg17[%c155, %c0_158] : memref<250x25xf32, #tpu.memory_space<vmem>>, vector<5x25xf32>
    tpu.vector_store %arg17[%c155, %c0_158], %152 {strides = array<i32>} : memref<250x25xf32, #tpu.memory_space<vmem>>, vector<5x25xf32>,
    %c19_159 = arith.constant 19 : index
    %c10_160 = arith.constant 10 : index
    %154 = vector.load %arg16[%c19_159, %c10_160] : memref<26x65xf32, #tpu.memory_space<vmem>>, vector<5x25xf32>
    %c165 = arith.constant 165 : index
    %c0_161 = arith.constant 0 : index
    %155 = vector.load %arg17[%c165, %c0_161] : memref<250x25xf32, #tpu.memory_space<vmem>>, vector<5x25xf32>
    tpu.vector_store %arg17[%c165, %c0_161], %154 {strides = array<i32>} : memref<250x25xf32, #tpu.memory_space<vmem>>, vector<5x25xf32>,
    %c19_162 = arith.constant 19 : index
    %c20_163 = arith.constant 20 : index
    %156 = vector.load %arg16[%c19_162, %c20_163] : memref<26x65xf32, #tpu.memory_space<vmem>>, vector<5x25xf32>
    %c175 = arith.constant 175 : index
    %c0_164 = arith.constant 0 : index
    %157 = vector.load %arg17[%c175, %c0_164] : memref<250x25xf32, #tpu.memory_space<vmem>>, vector<5x25xf32>
    tpu.vector_store %arg17[%c175, %c0_164], %156 {strides = array<i32>} : memref<250x25xf32, #tpu.memory_space<vmem>>, vector<5x25xf32>,
    %c19_165 = arith.constant 19 : index
    %c30_166 = arith.constant 30 : index
    %158 = vector.load %arg16[%c19_165, %c30_166] : memref<26x65xf32, #tpu.memory_space<vmem>>, vector<5x25xf32>
    %c185 = arith.constant 185 : index
    %c0_167 = arith.constant 0 : index
    %159 = vector.load %arg17[%c185, %c0_167] : memref<250x25xf32, #tpu.memory_space<vmem>>, vector<5x25xf32>
    tpu.vector_store %arg17[%c185, %c0_167], %158 {strides = array<i32>} : memref<250x25xf32, #tpu.memory_space<vmem>>, vector<5x25xf32>,
    %c19_168 = arith.constant 19 : index
    %c40_169 = arith.constant 40 : index
    %160 = vector.load %arg16[%c19_168, %c40_169] : memref<26x65xf32, #tpu.memory_space<vmem>>, vector<5x25xf32>
    %c195 = arith.constant 195 : index
    %c0_170 = arith.constant 0 : index
    %161 = vector.load %arg17[%c195, %c0_170] : memref<250x25xf32, #tpu.memory_space<vmem>>, vector<5x25xf32>
    tpu.vector_store %arg17[%c195, %c0_170], %160 {strides = array<i32>} : memref<250x25xf32, #tpu.memory_space<vmem>>, vector<5x25xf32>,
    %c21 = arith.constant 21 : index
    %c0_171 = arith.constant 0 : index
    %162 = vector.load %arg16[%c21, %c0_171] : memref<26x65xf32, #tpu.memory_space<vmem>>, vector<5x25xf32>
    %c205 = arith.constant 205 : index
    %c0_172 = arith.constant 0 : index
    %163 = vector.load %arg17[%c205, %c0_172] : memref<250x25xf32, #tpu.memory_space<vmem>>, vector<5x25xf32>
    tpu.vector_store %arg17[%c205, %c0_172], %162 {strides = array<i32>} : memref<250x25xf32, #tpu.memory_space<vmem>>, vector<5x25xf32>,
    %c21_173 = arith.constant 21 : index
    %c10_174 = arith.constant 10 : index
    %164 = vector.load %arg16[%c21_173, %c10_174] : memref<26x65xf32, #tpu.memory_space<vmem>>, vector<5x25xf32>
    %c215 = arith.constant 215 : index
    %c0_175 = arith.constant 0 : index
    %165 = vector.load %arg17[%c215, %c0_175] : memref<250x25xf32, #tpu.memory_space<vmem>>, vector<5x25xf32>
    tpu.vector_store %arg17[%c215, %c0_175], %164 {strides = array<i32>} : memref<250x25xf32, #tpu.memory_space<vmem>>, vector<5x25xf32>,
    %c21_176 = arith.constant 21 : index
    %c20_177 = arith.constant 20 : index
    %166 = vector.load %arg16[%c21_176, %c20_177] : memref<26x65xf32, #tpu.memory_space<vmem>>, vector<5x25xf32>
    %c225 = arith.constant 225 : index
    %c0_178 = arith.constant 0 : index
    %167 = vector.load %arg17[%c225, %c0_178] : memref<250x25xf32, #tpu.memory_space<vmem>>, vector<5x25xf32>
    tpu.vector_store %arg17[%c225, %c0_178], %166 {strides = array<i32>} : memref<250x25xf32, #tpu.memory_space<vmem>>, vector<5x25xf32>,
    %c21_179 = arith.constant 21 : index
    %c30_180 = arith.constant 30 : index
    %168 = vector.load %arg16[%c21_179, %c30_180] : memref<26x65xf32, #tpu.memory_space<vmem>>, vector<5x25xf32>
    %c235 = arith.constant 235 : index
    %c0_181 = arith.constant 0 : index
    %169 = vector.load %arg17[%c235, %c0_181] : memref<250x25xf32, #tpu.memory_space<vmem>>, vector<5x25xf32>
    tpu.vector_store %arg17[%c235, %c0_181], %168 {strides = array<i32>} : memref<250x25xf32, #tpu.memory_space<vmem>>, vector<5x25xf32>,
    %c21_182 = arith.constant 21 : index
    %c40_183 = arith.constant 40 : index
    %170 = vector.load %arg16[%c21_182, %c40_183] : memref<26x65xf32, #tpu.memory_space<vmem>>, vector<5x25xf32>
    %c245 = arith.constant 245 : index
    %c0_184 = arith.constant 0 : index
    %171 = vector.load %arg17[%c245, %c0_184] : memref<250x25xf32, #tpu.memory_space<vmem>>, vector<5x25xf32>
    tpu.vector_store %arg17[%c245, %c0_184], %170 {strides = array<i32>} : memref<250x25xf32, #tpu.memory_space<vmem>>, vector<5x25xf32>,
    %cst_185 = arith.constant 0.000000e+00 : f32
    %172 = vector.broadcast %cst_185 : f32 to vector<50x50xf32>
    %c0_186 = arith.constant 0 : index
    %c0_187 = arith.constant 0 : index
    %173 = tpu.strided_load %arg17[%c0_186, %c0_187] {strides = array<i32: 5, 1>} : memref<250x25xf32, #tpu.memory_space<vmem>>, vector<50x25xf32>
    %174 = arith.truncf %173 : vector<50x25xf32> to vector<50x25xbf16>
    %c0_188 = arith.constant 0 : index
    %c0_189 = arith.constant 0 : index
    %c0_190 = arith.constant 0 : index
    %175 = vector.load %arg5[%c0_188, %c0_189, %c0_190] : memref<5x25x50xbf16, #tpu.memory_space<vmem>>, vector<1x25x50xbf16>
    %176 = vector.shape_cast %175 : vector<1x25x50xbf16> to vector<25x50xbf16>
    %cst_191 = arith.constant dense<0.000000e+00> : vector<50x50xf32>
    %177 = tpu.matmul %174, %176, %cst_191 {dimension_numbers = #tpu.dot_dimension_numbers<[1], [0], [0], [1], [0, 0, 1, 1], [], []>} : vector<50x25xbf16>, vector<25x50xbf16>, vector<50x50xf32> -> vector<50x50xf32>
    %178 = arith.addf %172, %177 : vector<50x50xf32>
    %c1 = arith.constant 1 : index
    %c0_192 = arith.constant 0 : index
    %179 = tpu.strided_load %arg17[%c1, %c0_192] {strides = array<i32: 5, 1>} : memref<250x25xf32, #tpu.memory_space<vmem>>, vector<50x25xf32>
    %180 = arith.truncf %179 : vector<50x25xf32> to vector<50x25xbf16>
    %c1_193 = arith.constant 1 : index
    %c0_194 = arith.constant 0 : index
    %c0_195 = arith.constant 0 : index
    %181 = vector.load %arg5[%c1_193, %c0_194, %c0_195] : memref<5x25x50xbf16, #tpu.memory_space<vmem>>, vector<1x25x50xbf16>
    %182 = vector.shape_cast %181 : vector<1x25x50xbf16> to vector<25x50xbf16>
    %cst_196 = arith.constant dense<0.000000e+00> : vector<50x50xf32>
    %183 = tpu.matmul %180, %182, %cst_196 {dimension_numbers = #tpu.dot_dimension_numbers<[1], [0], [0], [1], [0, 0, 1, 1], [], []>} : vector<50x25xbf16>, vector<25x50xbf16>, vector<50x50xf32> -> vector<50x50xf32>
    %184 = arith.addf %178, %183 : vector<50x50xf32>
    %c2_197 = arith.constant 2 : index
    %c0_198 = arith.constant 0 : index
    %185 = tpu.strided_load %arg17[%c2_197, %c0_198] {strides = array<i32: 5, 1>} : memref<250x25xf32, #tpu.memory_space<vmem>>, vector<50x25xf32>
    %186 = arith.truncf %185 : vector<50x25xf32> to vector<50x25xbf16>
    %c2_199 = arith.constant 2 : index
    %c0_200 = arith.constant 0 : index
    %c0_201 = arith.constant 0 : index
    %187 = vector.load %arg5[%c2_199, %c0_200, %c0_201] : memref<5x25x50xbf16, #tpu.memory_space<vmem>>, vector<1x25x50xbf16>
    %188 = vector.shape_cast %187 : vector<1x25x50xbf16> to vector<25x50xbf16>
    %cst_202 = arith.constant dense<0.000000e+00> : vector<50x50xf32>
    %189 = tpu.matmul %186, %188, %cst_202 {dimension_numbers = #tpu.dot_dimension_numbers<[1], [0], [0], [1], [0, 0, 1, 1], [], []>} : vector<50x25xbf16>, vector<25x50xbf16>, vector<50x50xf32> -> vector<50x50xf32>
    %190 = arith.addf %184, %189 : vector<50x50xf32>
    %c3 = arith.constant 3 : index
    %c0_203 = arith.constant 0 : index
    %191 = tpu.strided_load %arg17[%c3, %c0_203] {strides = array<i32: 5, 1>} : memref<250x25xf32, #tpu.memory_space<vmem>>, vector<50x25xf32>
    %192 = arith.truncf %191 : vector<50x25xf32> to vector<50x25xbf16>
    %c3_204 = arith.constant 3 : index
    %c0_205 = arith.constant 0 : index
    %c0_206 = arith.constant 0 : index
    %193 = vector.load %arg5[%c3_204, %c0_205, %c0_206] : memref<5x25x50xbf16, #tpu.memory_space<vmem>>, vector<1x25x50xbf16>
    %194 = vector.shape_cast %193 : vector<1x25x50xbf16> to vector<25x50xbf16>
    %cst_207 = arith.constant dense<0.000000e+00> : vector<50x50xf32>
    %195 = tpu.matmul %192, %194, %cst_207 {dimension_numbers = #tpu.dot_dimension_numbers<[1], [0], [0], [1], [0, 0, 1, 1], [], []>} : vector<50x25xbf16>, vector<25x50xbf16>, vector<50x50xf32> -> vector<50x50xf32>
    %196 = arith.addf %190, %195 : vector<50x50xf32>
    %c4_208 = arith.constant 4 : index
    %c0_209 = arith.constant 0 : index
    %197 = tpu.strided_load %arg17[%c4_208, %c0_209] {strides = array<i32: 5, 1>} : memref<250x25xf32, #tpu.memory_space<vmem>>, vector<50x25xf32>
    %198 = arith.truncf %197 : vector<50x25xf32> to vector<50x25xbf16>
    %c4_210 = arith.constant 4 : index
    %c0_211 = arith.constant 0 : index
    %c0_212 = arith.constant 0 : index
    %199 = vector.load %arg5[%c4_210, %c0_211, %c0_212] : memref<5x25x50xbf16, #tpu.memory_space<vmem>>, vector<1x25x50xbf16>
    %200 = vector.shape_cast %199 : vector<1x25x50xbf16> to vector<25x50xbf16>
    %cst_213 = arith.constant dense<0.000000e+00> : vector<50x50xf32>
    %201 = tpu.matmul %198, %200, %cst_213 {dimension_numbers = #tpu.dot_dimension_numbers<[1], [0], [0], [1], [0, 0, 1, 1], [], []>} : vector<50x25xbf16>, vector<25x50xbf16>, vector<50x50xf32> -> vector<50x50xf32>
    %202 = arith.addf %196, %201 : vector<50x50xf32>
    %c0_214 = arith.constant 0 : index
    %c0_215 = arith.constant 0 : index
    %203 = vector.load %arg6[%c0_214, %c0_215] : memref<1x50xf32, #tpu.memory_space<vmem>>, vector<1x50xf32>
    %204 = vector.broadcast %203 : vector<1x50xf32> to vector<50x50xf32>
    %205 = arith.addf %202, %204 : vector<50x50xf32>
    %c0_216 = arith.constant 0 : index
    %c0_217 = arith.constant 0 : index
    %206 = vector.load %arg7[%c0_216, %c0_217] : memref<1x50xf32, #tpu.memory_space<vmem>>, vector<1x50xf32>
    %c0_218 = arith.constant 0 : index
    %c0_219 = arith.constant 0 : index
    %207 = vector.load %arg8[%c0_218, %c0_219] : memref<1x50xf32, #tpu.memory_space<vmem>>, vector<1x50xf32>
    %cst_220 = arith.constant dense<0.000000e+00> : vector<50xf32>
    %208 = vector.multi_reduction <add>, %205, %cst_220 [0] : vector<50x50xf32> to vector<50xf32>
    %209 = vector.shape_cast %208 : vector<50xf32> to vector<1x50xf32>
    %cst_221 = arith.constant 5.000000e+01 : f32
    %210 = vector.broadcast %cst_221 : f32 to vector<1x50xf32>
    %211 = arith.divf %209, %210 : vector<1x50xf32>
    %212 = vector.broadcast %211 : vector<1x50xf32> to vector<50x50xf32>
    %213 = arith.subf %205, %212 : vector<50x50xf32>
    %214 = arith.mulf %213, %213 : vector<50x50xf32>
    %cst_222 = arith.constant dense<0.000000e+00> : vector<50xf32>
    %215 = vector.multi_reduction <add>, %214, %cst_222 [0] : vector<50x50xf32> to vector<50xf32>
    %216 = vector.shape_cast %215 : vector<50xf32> to vector<1x50xf32>
    %cst_223 = arith.constant 5.000000e+01 : f32
    %217 = vector.broadcast %cst_223 : f32 to vector<1x50xf32>
    %218 = arith.divf %216, %217 : vector<1x50xf32>
    %cst_224 = arith.constant 9.99999974E-6 : f32
    %219 = vector.broadcast %cst_224 : f32 to vector<1x50xf32>
    %220 = arith.addf %218, %219 : vector<1x50xf32>
    %221 = math.rsqrt %220 : vector<1x50xf32>
    %222 = vector.broadcast %221 : vector<1x50xf32> to vector<50x50xf32>
    %223 = arith.mulf %213, %222 : vector<50x50xf32>
    %224 = vector.broadcast %206 : vector<1x50xf32> to vector<50x50xf32>
    %225 = arith.mulf %223, %224 : vector<50x50xf32>
    %226 = vector.broadcast %207 : vector<1x50xf32> to vector<50x50xf32>
    %227 = arith.addf %225, %226 : vector<50x50xf32>
    %cst_225 = arith.constant 0.000000e+00 : f32
    %cst_226 = arith.constant 6.000000e+00 : f32
    %228 = vector.broadcast %cst_225 : f32 to vector<50x50xf32>
    %229 = arith.maximumf %228, %227 : vector<50x50xf32>
    %230 = vector.broadcast %cst_226 : f32 to vector<50x50xf32>
    %231 = arith.minimumf %230, %229 : vector<50x50xf32>
    %232 = vector.extract_strided_slice %231 {offsets = [0, 0], sizes = [2, 50], strides = [1, 1]} : vector<50x50xf32> to vector<2x50xf32>
    %c0_227 = arith.constant 0 : index
    %c0_228 = arith.constant 0 : index
    %233 = vector.load %arg18[%c0_227, %c0_228] : memref<2x1250xf32, #tpu.memory_space<vmem>>, vector<2x50xf32>
    tpu.vector_store %arg18[%c0_227, %c0_228], %232 {strides = array<i32>} : memref<2x1250xf32, #tpu.memory_space<vmem>>, vector<2x50xf32>,
    %234 = vector.extract_strided_slice %231 {offsets = [2, 0], sizes = [2, 50], strides = [1, 1]} : vector<50x50xf32> to vector<2x50xf32>
    %c0_229 = arith.constant 0 : index
    %c50_230 = arith.constant 50 : index
    %235 = vector.load %arg18[%c0_229, %c50_230] : memref<2x1250xf32, #tpu.memory_space<vmem>>, vector<2x50xf32>
    tpu.vector_store %arg18[%c0_229, %c50_230], %234 {strides = array<i32>} : memref<2x1250xf32, #tpu.memory_space<vmem>>, vector<2x50xf32>,
    %236 = vector.extract_strided_slice %231 {offsets = [4, 0], sizes = [2, 50], strides = [1, 1]} : vector<50x50xf32> to vector<2x50xf32>
    %c0_231 = arith.constant 0 : index
    %c100_232 = arith.constant 100 : index
    %237 = vector.load %arg18[%c0_231, %c100_232] : memref<2x1250xf32, #tpu.memory_space<vmem>>, vector<2x50xf32>
    tpu.vector_store %arg18[%c0_231, %c100_232], %236 {strides = array<i32>} : memref<2x1250xf32, #tpu.memory_space<vmem>>, vector<2x50xf32>,
    %238 = vector.extract_strided_slice %231 {offsets = [6, 0], sizes = [2, 50], strides = [1, 1]} : vector<50x50xf32> to vector<2x50xf32>
    %c0_233 = arith.constant 0 : index
    %c150_234 = arith.constant 150 : index
    %239 = vector.load %arg18[%c0_233, %c150_234] : memref<2x1250xf32, #tpu.memory_space<vmem>>, vector<2x50xf32>
    tpu.vector_store %arg18[%c0_233, %c150_234], %238 {strides = array<i32>} : memref<2x1250xf32, #tpu.memory_space<vmem>>, vector<2x50xf32>,
    %240 = vector.extract_strided_slice %231 {offsets = [8, 0], sizes = [2, 50], strides = [1, 1]} : vector<50x50xf32> to vector<2x50xf32>
    %c0_235 = arith.constant 0 : index
    %c200_236 = arith.constant 200 : index
    %241 = vector.load %arg18[%c0_235, %c200_236] : memref<2x1250xf32, #tpu.memory_space<vmem>>, vector<2x50xf32>
    tpu.vector_store %arg18[%c0_235, %c200_236], %240 {strides = array<i32>} : memref<2x1250xf32, #tpu.memory_space<vmem>>, vector<2x50xf32>,
    %242 = vector.extract_strided_slice %231 {offsets = [10, 0], sizes = [2, 50], strides = [1, 1]} : vector<50x50xf32> to vector<2x50xf32>
    %c0_237 = arith.constant 0 : index
    %c250 = arith.constant 250 : index
    %243 = vector.load %arg18[%c0_237, %c250] : memref<2x1250xf32, #tpu.memory_space<vmem>>, vector<2x50xf32>
    tpu.vector_store %arg18[%c0_237, %c250], %242 {strides = array<i32>} : memref<2x1250xf32, #tpu.memory_space<vmem>>, vector<2x50xf32>,
    %244 = vector.extract_strided_slice %231 {offsets = [12, 0], sizes = [2, 50], strides = [1, 1]} : vector<50x50xf32> to vector<2x50xf32>
    %c0_238 = arith.constant 0 : index
    %c300 = arith.constant 300 : index
    %245 = vector.load %arg18[%c0_238, %c300] : memref<2x1250xf32, #tpu.memory_space<vmem>>, vector<2x50xf32>
    tpu.vector_store %arg18[%c0_238, %c300], %244 {strides = array<i32>} : memref<2x1250xf32, #tpu.memory_space<vmem>>, vector<2x50xf32>,
    %246 = vector.extract_strided_slice %231 {offsets = [14, 0], sizes = [2, 50], strides = [1, 1]} : vector<50x50xf32> to vector<2x50xf32>
    %c0_239 = arith.constant 0 : index
    %c350 = arith.constant 350 : index
    %247 = vector.load %arg18[%c0_239, %c350] : memref<2x1250xf32, #tpu.memory_space<vmem>>, vector<2x50xf32>
    tpu.vector_store %arg18[%c0_239, %c350], %246 {strides = array<i32>} : memref<2x1250xf32, #tpu.memory_space<vmem>>, vector<2x50xf32>,
    %248 = vector.extract_strided_slice %231 {offsets = [16, 0], sizes = [2, 50], strides = [1, 1]} : vector<50x50xf32> to vector<2x50xf32>
    %c0_240 = arith.constant 0 : index
    %c400 = arith.constant 400 : index
    %249 = vector.load %arg18[%c0_240, %c400] : memref<2x1250xf32, #tpu.memory_space<vmem>>, vector<2x50xf32>
    tpu.vector_store %arg18[%c0_240, %c400], %248 {strides = array<i32>} : memref<2x1250xf32, #tpu.memory_space<vmem>>, vector<2x50xf32>,
    %250 = vector.extract_strided_slice %231 {offsets = [18, 0], sizes = [2, 50], strides = [1, 1]} : vector<50x50xf32> to vector<2x50xf32>
    %c0_241 = arith.constant 0 : index
    %c450 = arith.constant 450 : index
    %251 = vector.load %arg18[%c0_241, %c450] : memref<2x1250xf32, #tpu.memory_space<vmem>>, vector<2x50xf32>
    tpu.vector_store %arg18[%c0_241, %c450], %250 {strides = array<i32>} : memref<2x1250xf32, #tpu.memory_space<vmem>>, vector<2x50xf32>,
    %252 = vector.extract_strided_slice %231 {offsets = [20, 0], sizes = [2, 50], strides = [1, 1]} : vector<50x50xf32> to vector<2x50xf32>
    %c0_242 = arith.constant 0 : index
    %c500 = arith.constant 500 : index
    %253 = vector.load %arg18[%c0_242, %c500] : memref<2x1250xf32, #tpu.memory_space<vmem>>, vector<2x50xf32>
    tpu.vector_store %arg18[%c0_242, %c500], %252 {strides = array<i32>} : memref<2x1250xf32, #tpu.memory_space<vmem>>, vector<2x50xf32>,
    %254 = vector.extract_strided_slice %231 {offsets = [22, 0], sizes = [2, 50], strides = [1, 1]} : vector<50x50xf32> to vector<2x50xf32>
    %c0_243 = arith.constant 0 : index
    %c550 = arith.constant 550 : index
    %255 = vector.load %arg18[%c0_243, %c550] : memref<2x1250xf32, #tpu.memory_space<vmem>>, vector<2x50xf32>
    tpu.vector_store %arg18[%c0_243, %c550], %254 {strides = array<i32>} : memref<2x1250xf32, #tpu.memory_space<vmem>>, vector<2x50xf32>,
    %256 = vector.extract_strided_slice %231 {offsets = [24, 0], sizes = [2, 50], strides = [1, 1]} : vector<50x50xf32> to vector<2x50xf32>
    %c0_244 = arith.constant 0 : index
    %c600 = arith.constant 600 : index
    %257 = vector.load %arg18[%c0_244, %c600] : memref<2x1250xf32, #tpu.memory_space<vmem>>, vector<2x50xf32>
    tpu.vector_store %arg18[%c0_244, %c600], %256 {strides = array<i32>} : memref<2x1250xf32, #tpu.memory_space<vmem>>, vector<2x50xf32>,
    %258 = vector.extract_strided_slice %231 {offsets = [26, 0], sizes = [2, 50], strides = [1, 1]} : vector<50x50xf32> to vector<2x50xf32>
    %c0_245 = arith.constant 0 : index
    %c650 = arith.constant 650 : index
    %259 = vector.load %arg18[%c0_245, %c650] : memref<2x1250xf32, #tpu.memory_space<vmem>>, vector<2x50xf32>
    tpu.vector_store %arg18[%c0_245, %c650], %258 {strides = array<i32>} : memref<2x1250xf32, #tpu.memory_space<vmem>>, vector<2x50xf32>,
    %260 = vector.extract_strided_slice %231 {offsets = [28, 0], sizes = [2, 50], strides = [1, 1]} : vector<50x50xf32> to vector<2x50xf32>
    %c0_246 = arith.constant 0 : index
    %c700 = arith.constant 700 : index
    %261 = vector.load %arg18[%c0_246, %c700] : memref<2x1250xf32, #tpu.memory_space<vmem>>, vector<2x50xf32>
    tpu.vector_store %arg18[%c0_246, %c700], %260 {strides = array<i32>} : memref<2x1250xf32, #tpu.memory_space<vmem>>, vector<2x50xf32>,
    %262 = vector.extract_strided_slice %231 {offsets = [30, 0], sizes = [2, 50], strides = [1, 1]} : vector<50x50xf32> to vector<2x50xf32>
    %c0_247 = arith.constant 0 : index
    %c750 = arith.constant 750 : index
    %263 = vector.load %arg18[%c0_247, %c750] : memref<2x1250xf32, #tpu.memory_space<vmem>>, vector<2x50xf32>
    tpu.vector_store %arg18[%c0_247, %c750], %262 {strides = array<i32>} : memref<2x1250xf32, #tpu.memory_space<vmem>>, vector<2x50xf32>,
    %264 = vector.extract_strided_slice %231 {offsets = [32, 0], sizes = [2, 50], strides = [1, 1]} : vector<50x50xf32> to vector<2x50xf32>
    %c0_248 = arith.constant 0 : index
    %c800 = arith.constant 800 : index
    %265 = vector.load %arg18[%c0_248, %c800] : memref<2x1250xf32, #tpu.memory_space<vmem>>, vector<2x50xf32>
    tpu.vector_store %arg18[%c0_248, %c800], %264 {strides = array<i32>} : memref<2x1250xf32, #tpu.memory_space<vmem>>, vector<2x50xf32>,
    %266 = vector.extract_strided_slice %231 {offsets = [34, 0], sizes = [2, 50], strides = [1, 1]} : vector<50x50xf32> to vector<2x50xf32>
    %c0_249 = arith.constant 0 : index
    %c850 = arith.constant 850 : index
    %267 = vector.load %arg18[%c0_249, %c850] : memref<2x1250xf32, #tpu.memory_space<vmem>>, vector<2x50xf32>
    tpu.vector_store %arg18[%c0_249, %c850], %266 {strides = array<i32>} : memref<2x1250xf32, #tpu.memory_space<vmem>>, vector<2x50xf32>,
    %268 = vector.extract_strided_slice %231 {offsets = [36, 0], sizes = [2, 50], strides = [1, 1]} : vector<50x50xf32> to vector<2x50xf32>
    %c0_250 = arith.constant 0 : index
    %c900 = arith.constant 900 : index
    %269 = vector.load %arg18[%c0_250, %c900] : memref<2x1250xf32, #tpu.memory_space<vmem>>, vector<2x50xf32>
    tpu.vector_store %arg18[%c0_250, %c900], %268 {strides = array<i32>} : memref<2x1250xf32, #tpu.memory_space<vmem>>, vector<2x50xf32>,
    %270 = vector.extract_strided_slice %231 {offsets = [38, 0], sizes = [2, 50], strides = [1, 1]} : vector<50x50xf32> to vector<2x50xf32>
    %c0_251 = arith.constant 0 : index
    %c950 = arith.constant 950 : index
    %271 = vector.load %arg18[%c0_251, %c950] : memref<2x1250xf32, #tpu.memory_space<vmem>>, vector<2x50xf32>
    tpu.vector_store %arg18[%c0_251, %c950], %270 {strides = array<i32>} : memref<2x1250xf32, #tpu.memory_space<vmem>>, vector<2x50xf32>,
    %272 = vector.extract_strided_slice %231 {offsets = [40, 0], sizes = [2, 50], strides = [1, 1]} : vector<50x50xf32> to vector<2x50xf32>
    %c0_252 = arith.constant 0 : index
    %c1000 = arith.constant 1000 : index
    %273 = vector.load %arg18[%c0_252, %c1000] : memref<2x1250xf32, #tpu.memory_space<vmem>>, vector<2x50xf32>
    tpu.vector_store %arg18[%c0_252, %c1000], %272 {strides = array<i32>} : memref<2x1250xf32, #tpu.memory_space<vmem>>, vector<2x50xf32>,
    %274 = vector.extract_strided_slice %231 {offsets = [42, 0], sizes = [2, 50], strides = [1, 1]} : vector<50x50xf32> to vector<2x50xf32>
    %c0_253 = arith.constant 0 : index
    %c1050 = arith.constant 1050 : index
    %275 = vector.load %arg18[%c0_253, %c1050] : memref<2x1250xf32, #tpu.memory_space<vmem>>, vector<2x50xf32>
    tpu.vector_store %arg18[%c0_253, %c1050], %274 {strides = array<i32>} : memref<2x1250xf32, #tpu.memory_space<vmem>>, vector<2x50xf32>,
    %276 = vector.extract_strided_slice %231 {offsets = [44, 0], sizes = [2, 50], strides = [1, 1]} : vector<50x50xf32> to vector<2x50xf32>
    %c0_254 = arith.constant 0 : index
    %c1100 = arith.constant 1100 : index
    %277 = vector.load %arg18[%c0_254, %c1100] : memref<2x1250xf32, #tpu.memory_space<vmem>>, vector<2x50xf32>
    tpu.vector_store %arg18[%c0_254, %c1100], %276 {strides = array<i32>} : memref<2x1250xf32, #tpu.memory_space<vmem>>, vector<2x50xf32>,
    %278 = vector.extract_strided_slice %231 {offsets = [46, 0], sizes = [2, 50], strides = [1, 1]} : vector<50x50xf32> to vector<2x50xf32>
    %c0_255 = arith.constant 0 : index
    %c1150 = arith.constant 1150 : index
    %279 = vector.load %arg18[%c0_255, %c1150] : memref<2x1250xf32, #tpu.memory_space<vmem>>, vector<2x50xf32>
    tpu.vector_store %arg18[%c0_255, %c1150], %278 {strides = array<i32>} : memref<2x1250xf32, #tpu.memory_space<vmem>>, vector<2x50xf32>,
    %280 = vector.extract_strided_slice %231 {offsets = [48, 0], sizes = [2, 50], strides = [1, 1]} : vector<50x50xf32> to vector<2x50xf32>
    %c0_256 = arith.constant 0 : index
    %c1200 = arith.constant 1200 : index
    %281 = vector.load %arg18[%c0_256, %c1200] : memref<2x1250xf32, #tpu.memory_space<vmem>>, vector<2x50xf32>
    tpu.vector_store %arg18[%c0_256, %c1200], %280 {strides = array<i32>} : memref<2x1250xf32, #tpu.memory_space<vmem>>, vector<2x50xf32>,
    %c0_257 = arith.constant 0 : index
    %c0_258 = arith.constant 0 : index
    %282 = vector.load %arg18[%c0_257, %c0_258] : memref<2x1250xf32, #tpu.memory_space<vmem>>, vector<2x1250xf32>
    %283 = arith.truncf %282 : vector<2x1250xf32> to vector<2x1250xbf16>
    %c0_259 = arith.constant 0 : index
    %c0_260 = arith.constant 0 : index
    %284 = vector.load %arg9[%c0_259, %c0_260] : memref<1250x100xbf16, #tpu.memory_space<vmem>>, vector<1250x100xbf16>
    %cst_261 = arith.constant dense<0.000000e+00> : vector<2x100xf32>
    %285 = tpu.matmul %283, %284, %cst_261 {dimension_numbers = #tpu.dot_dimension_numbers<[1], [0], [0], [1], [0, 0, 1, 1], [], []>} : vector<2x1250xbf16>, vector<1250x100xbf16>, vector<2x100xf32> -> vector<2x100xf32>
    %c0_262 = arith.constant 0 : index
    %c0_263 = arith.constant 0 : index
    %286 = vector.load %arg10[%c0_262, %c0_263] : memref<1x100xf32, #tpu.memory_space<vmem>>, vector<1x100xf32>
    %287 = vector.broadcast %286 : vector<1x100xf32> to vector<2x100xf32>
    %288 = arith.addf %285, %287 : vector<2x100xf32>
    %c0_264 = arith.constant 0 : index
    %c0_265 = arith.constant 0 : index
    %289 = vector.load %arg11[%c0_264, %c0_265] : memref<1x100xf32, #tpu.memory_space<vmem>>, vector<1x100xf32>
    %c0_266 = arith.constant 0 : index
    %c0_267 = arith.constant 0 : index
    %290 = vector.load %arg12[%c0_266, %c0_267] : memref<1x100xf32, #tpu.memory_space<vmem>>, vector<1x100xf32>
    %cst_268 = arith.constant dense<0.000000e+00> : vector<100xf32>
    %291 = vector.multi_reduction <add>, %288, %cst_268 [0] : vector<2x100xf32> to vector<100xf32>
    %292 = vector.shape_cast %291 : vector<100xf32> to vector<1x100xf32>
    %cst_269 = arith.constant 2.000000e+00 : f32
    %293 = vector.broadcast %cst_269 : f32 to vector<1x100xf32>
    %294 = arith.divf %292, %293 : vector<1x100xf32>
    %295 = vector.broadcast %294 : vector<1x100xf32> to vector<2x100xf32>
    %296 = arith.subf %288, %295 : vector<2x100xf32>
    %297 = arith.mulf %296, %296 : vector<2x100xf32>
    %cst_270 = arith.constant dense<0.000000e+00> : vector<100xf32>
    %298 = vector.multi_reduction <add>, %297, %cst_270 [0] : vector<2x100xf32> to vector<100xf32>
    %299 = vector.shape_cast %298 : vector<100xf32> to vector<1x100xf32>
    %cst_271 = arith.constant 2.000000e+00 : f32
    %300 = vector.broadcast %cst_271 : f32 to vector<1x100xf32>
    %301 = arith.divf %299, %300 : vector<1x100xf32>
    %cst_272 = arith.constant 9.99999974E-6 : f32
    %302 = vector.broadcast %cst_272 : f32 to vector<1x100xf32>
    %303 = arith.addf %301, %302 : vector<1x100xf32>
    %304 = math.rsqrt %303 : vector<1x100xf32>
    %305 = vector.broadcast %304 : vector<1x100xf32> to vector<2x100xf32>
    %306 = arith.mulf %296, %305 : vector<2x100xf32>
    %307 = vector.broadcast %289 : vector<1x100xf32> to vector<2x100xf32>
    %308 = arith.mulf %306, %307 : vector<2x100xf32>
    %309 = vector.broadcast %290 : vector<1x100xf32> to vector<2x100xf32>
    %310 = arith.addf %308, %309 : vector<2x100xf32>
    %cst_273 = arith.constant 0.000000e+00 : f32
    %cst_274 = arith.constant 6.000000e+00 : f32
    %311 = vector.broadcast %cst_273 : f32 to vector<2x100xf32>
    %312 = arith.maximumf %311, %310 : vector<2x100xf32>
    %313 = vector.broadcast %cst_274 : f32 to vector<2x100xf32>
    %314 = arith.minimumf %313, %312 : vector<2x100xf32>
    %315 = arith.truncf %314 : vector<2x100xf32> to vector<2x100xbf16>
    %c0_275 = arith.constant 0 : index
    %c0_276 = arith.constant 0 : index
    %316 = vector.load %arg13[%c0_275, %c0_276] : memref<100x32xbf16, #tpu.memory_space<vmem>>, vector<100x32xbf16>
    %cst_277 = arith.constant dense<0.000000e+00> : vector<2x32xf32>
    %317 = tpu.matmul %315, %316, %cst_277 {dimension_numbers = #tpu.dot_dimension_numbers<[1], [0], [0], [1], [0, 0, 1, 1], [], []>} : vector<2x100xbf16>, vector<100x32xbf16>, vector<2x32xf32> -> vector<2x32xf32>
    %c0_278 = arith.constant 0 : index
    %c0_279 = arith.constant 0 : index
    %318 = vector.load %arg14[%c0_278, %c0_279] : memref<1x32xf32, #tpu.memory_space<vmem>>, vector<1x32xf32>
    %319 = vector.broadcast %318 : vector<1x32xf32> to vector<2x32xf32>
    %320 = arith.addf %317, %319 : vector<2x32xf32>
    %c0_280 = arith.constant 0 : index
    %c0_281 = arith.constant 0 : index
    %321 = vector.load %arg15[%c0_280, %c0_281] : memref<2x32xf32, #tpu.memory_space<vmem>>, vector<2x32xf32>
    tpu.vector_store %arg15[%c0_280, %c0_281], %320 {strides = array<i32>} : memref<2x32xf32, #tpu.memory_space<vmem>>, vector<2x32xf32>,
    return
  }
}

</mosaic_0001>

<bundles_post_ra>
// kernel: encoder_forward.1
= control target key start
LH: loop header
LB: loop body
LE: loop exit
PB: predicated region body
PF: predicated region fallthrough
CT: control target
= control target key end

     0   :  { %vm326_vm0 = vcmask 1041408   ;;  %s6092_s0 = inlined_call_operand.vmem [shape: bf16[338,100], index: 0, kind: input, shape index: {}]   ;;  %s6093_s1 = inlined_call_operand.vmem [shape: bf16[100,5], index: 1, kind: input, shape index: {}]   ;;  %s6094_s2 = inlined_call_operand.vmem [shape: f32[1,5], index: 2, kind: input, shape index: {}]   ;;  %s6095_s3 = inlined_call_operand.vmem [shape: f32[1,5], index: 3, kind: input, shape index: {}]   ;;  %s6096_s4 = inlined_call_operand.vmem [shape: f32[1,5], index: 4, kind: input, shape index: {}]   ;;  %s6097_s5 = inlined_call_operand.vmem [shape: bf16[5,25,50], index: 5, kind: input, shape index: {}]   ;;  %s6098_s6 = inlined_call_operand.vmem [shape: f32[1,50], index: 6, kind: input, shape index: {}]   ;;  %s6099_s7 = inlined_call_operand.vmem [shape: f32[1,50], index: 7, kind: input, shape index: {}]   ;;  %s6100_s8 = inlined_call_operand.vmem [shape: f32[1,50], index: 8, kind: input, shape index: {}]   ;;  %s6101_s9 = inlined_call_operand.vmem [shape: bf16[1250,100], index: 9, kind: input, shape index: {}]   ;;  %s6102_s10 = inlined_call_operand.vmem [shape: f32[1,100], index: 10, kind: input, shape index: {}]   ;;  %s6103_s11 = inlined_call_operand.vmem [shape: f32[1,100], index: 11, kind: input, shape index: {}]   ;;  %s6104_s12 = inlined_call_operand.vmem [shape: f32[1,100], index: 12, kind: input, shape index: {}]   ;;  %s6105_s13 = inlined_call_operand.vmem [shape: bf16[100,32], index: 13, kind: input, shape index: {}]   ;;  %s6106_s14 = inlined_call_operand.vmem [shape: f32[1,32], index: 14, kind: input, shape index: {}]   ;;  %s6107_s15 = inlined_call_operand.hbm [shape: f32[2,32], index: 15, kind: output, shape index: {}]  }
   0x1   :  { %v107_v0 = vld [vmem:[%s6093_s1 + $0x30] sm:$0x3]  ;;  %v4214_v4 = vld [vmem:[%s6093_s1 + $0x28] sm:$0xff] }
   0x2   :  { %v245_v1 = vunpack.c.l.b16 %v107_v0 }
   0x4   :  { %v252_v2 = vpack.c.b16 %v245_v1, %v245_v1 }
   0x6   :  { %v328_v3 = vsel %vm326_vm0, %v252_v2, 0 }
   0x7   :  { %331 = vmatpush.bf16.msra.mxu0 %v328_v3  ;;  %4309 = vmatpush.bf16.msra.mxu2 %v328_v3 }
   0x8   :  { %20 = vsyncpa [#allocation6], 0  ;;  %v4213_v5 = vld [vmem:[%s6093_s1 + $0x20] sm:$0xff]  ;;  %v4212_v6 = vld [vmem:[%s6093_s1 + $0x18] sm:$0xff]  ;;  %vm259_vm1 = vcmask 818176   ;;  %vm450_vm2 = vcmask 39936  }
   0x9   :  { %v4211_v7 = vld [vmem:[%s6093_s1 + $0x10] sm:$0xff]  ;;  %v4210_v8 = vld [vmem:[%s6093_s1 + $0x8] sm:$0xff]  ;;  %v4209_v9 = vld [vmem:[%s6093_s1] sm:$0xff]  ;;  %vm534_vm3 = vcmask 33792   ;;  %s4412_s17 = smov 15   ;;  %s4413_s18 = smov 20  }
   0xa   :  { %v4188_v10 = vld [vmem:[%s6092_s0] sm:$0xff]  ;;  %v4189_v11 = vld [vmem:[%s6092_s0 + $0x8] sm:$0xff]  ;;  %v4190_v12 = vld [vmem:[%s6092_s0 + $0x10] sm:$0xff]  ;;  %s4414_s19 = smov 25   ;;  %s4415_s20 = smov 30   ;;  %vm1198_vm8 = vcmask 80936  }
   0xb   :  { %332 = vmatpush.bf16.msra.mxu0 %v4214_v4  ;;  %4310 = vmatpush.bf16.msra.mxu2 %v4214_v4  ;;  %v4191_v13 = vld [vmem:[%s6092_s0 + $0x18] sm:$0xff]  ;;  %v4192_v14 = vld [vmem:[%s6092_s0 + $0x20] sm:$0xff]  ;;  %v4193_v15 = vld [vmem:[%s6092_s0 + $0x28] sm:$0xff]  ;;  %s4416_s21 = smov 35   ;;  %vm1240_vm9 = vcmask 121936   ;;  %s4417_s22 = smov 40  }
   0xc   :  { %v4194_v16 = vld [vmem:[%s6092_s0 + $0x30] sm:$0xff]  ;;  %v4195_v17 = vld [vmem:[%s6092_s0 + $0x38] sm:$0xff]  ;;  %v4196_v19 = vld [vmem:[%s6092_s0 + $0x40] sm:$0xff]  ;;  %vm1202_vm10 = vcmask 74792   ;;  %vm1282_vm11 = vcmask 162936   ;;  %vm1244_vm12 = vcmask 115792  }
   0xd   :  { %v4203_v18 = vld [vmem:[%s6092_s0 + $0x78] sm:$0xff]  ;;  %v4204_v21 = vld [vmem:[%s6092_s0 + $0x80] sm:$0xff]  ;;  %v4197_v23 = vld [vmem:[%s6092_s0 + $0x48] sm:$0xff]  ;;  %vm1286_vm13 = vcmask 156792   ;;  %s4418_s1 = smov 45   ;;  %vm1324_vm14 = vcmask 203936  }
   0xe   :  { %v4205_v25 = vld [vmem:[%s6092_s0 + $0x88] sm:$0xff]  ;;  %v4198_v27 = vld [vmem:[%s6092_s0 + $0x50] sm:$0xff]  ;;  %v4199_v31 = vld [vmem:[%s6092_s0 + $0x58] sm:$0xff]  ;;  %s4419_s23 = smov 50   ;;  %vm1366_vm15 = vcmask 244936   ;;  %s4420_s24 = smov 55  }
   0xf   :  { %333 = vmatpush.bf16.msra.mxu0 %v4213_v5  ;;  %4311 = vmatpush.bf16.msra.mxu2 %v4213_v5  ;;  %v4206_v29 = vld [vmem:[%s6092_s0 + $0x90] sm:$0xff]  ;;  %v4207_v33 = vld [vmem:[%s6092_s0 + $0x98] sm:$0xff]  ;;  %v4200_v35 = vld [vmem:[%s6092_s0 + $0x60] sm:$0xff]  ;;  %s4421_s25 = smov 60   ;;  %s4422_s26 = smov 108  }
  0x10   :  { %v4208_v37 = vld [vmem:[%s6092_s0 + $0xa0] sm:$0xff]  ;;  %v4201_v39 = vld [vmem:[%s6092_s0 + $0x68] sm:$0xff]  ;;  %v4202_v45 = vld [vmem:[%s6092_s0 + $0x70] sm:$0xff]  ;;  %s4423_s27 = smov 118   ;;  %s4425_s28 = smov 88  }
  0x11   :  { %v94_v41 = vld [vmem:[%s6092_s0 + $0xa8] sm:$0x1]  ;;  %v4671_v63 = vld [vmem:[%s6094_s2] ss:$0 sm:$0xff]  ;;  %s4424_s0 = smov 98   ;;  %s4430_s30 = smov 22  }
  0x12   :  { %v197_v42 = vunpack.c.l.b16 %v94_v41  ;;  %s4431_s16 = smov 122  }
  0x13   :  { %334 = vmatpush.bf16.msra.mxu0 %v4212_v6  ;;  %4312 = vmatpush.bf16.msra.mxu2 %v4212_v6 }
  0x14   :  { %v219_v43 = vpack.c.b16 %v197_v42, %v197_v42 }
  0x17   :  { %335 = vmatpush.bf16.msra.mxu0 %v4211_v7  ;;  %4313 = vmatpush.bf16.msra.mxu2 %v4211_v7 }
  0x1b   :  { %336 = vmatpush.bf16.msra.mxu0 %v4210_v8  ;;  %4314 = vmatpush.bf16.msra.mxu2 %v4210_v8 }
  0x1f   :  { %337 = vmatpush.bf16.msra.mxu0 %v4209_v9  ;;  %4315 = vmatpush.bf16.msra.mxu2 %v4209_v9 }
  0x22   :  { %3752 = vmatmul.msk.bf16.vlgmr.msra.gmra.mxu0 %vm259_vm1, %v4188_v10  ;;  %3767 = vmatmul.msk.bf16.vlgmr.msra.gmra.mxu2 %vm259_vm1, %v4203_v18 }
  0x32   :  { %3753 = vmatmul.msk.bf16.gmra.mxu0 %vm259_vm1, %v4189_v11  ;;  %3768 = vmatmul.msk.bf16.gmra.mxu2 %vm259_vm1, %v4204_v21 }
  0x42   :  { %3754 = vmatmul.msk.bf16.gmra.mxu0 %vm259_vm1, %v4190_v12  ;;  %3769 = vmatmul.msk.bf16.gmra.mxu2 %vm259_vm1, %v4205_v25 }
  0x52   :  { %3755 = vmatmul.msk.bf16.gmra.mxu0 %vm259_vm1, %v4191_v13  ;;  %3770 = vmatmul.msk.bf16.gmra.mxu2 %vm259_vm1, %v4206_v29 }
  0x62   :  { %3756 = vmatmul.msk.bf16.gmra.mxu0 %vm259_vm1, %v4192_v14  ;;  %3771 = vmatmul.msk.bf16.gmra.mxu2 %vm259_vm1, %v4207_v33 }
  0x72   :  { %3757 = vmatmul.msk.bf16.gmra.mxu0 %vm259_vm1, %v4193_v15  ;;  %3772 = vmatmul.msk.bf16.gmra.mxu2 %vm259_vm1, %v4208_v37 }
  0x82   :  { %3758 = vmatmul.msk.bf16.gmra.mxu0 %vm259_vm1, %v4194_v16  ;;  %3773 = vmatmul.msk.bf16.gmra.mxu2 %vm259_vm1, %v219_v43 }
  0x92   :  { %3759 = vmatmul.msk.bf16.gmra.mxu0 %vm259_vm1, %v4195_v17 }
  0x9f   :  { %v339_v20 = vpop.f32.mrf.mxu0 }
  0xa0   :  { %v4677_v1 = vadd.f32 %v4671_v63, %v339_v20 }
  0xa2   :  { %3760 = vmatmul.msk.bf16.gmra.mxu0 %vm259_vm1, %v4196_v19  ;;  %v451_v7 = vsel %vm450_vm2, %v4677_v1, 0.0 }
  0xa5   :  { %v4642_v50 = vpop.f32.mrf.mxu2 }
  0xa7   :  { %v341_v22 = vpop.f32.mrf.mxu0 }
  0xa8   :  { %v4674_v0 = vadd.f32 %v4671_v63, %v341_v22 }
  0xaa   :  { %v452_v4 = vsel %vm450_vm2, %v4674_v0, 0.0 }
  0xab   :  { %v453_v10 = vadd.f32 %v452_v4, %v451_v7 }
  0xad   :  { %v4646_v52 = vpop.f32.mrf.mxu2 }
  0xaf   :  { %v344_v24 = vpop.f32.mrf.mxu0 }
  0xb0   :  { %v4680_v2 = vadd.f32 %v4671_v63, %v344_v24 }
  0xb2   :  { %3761 = vmatmul.msk.bf16.gmra.mxu0 %vm259_vm1, %v4197_v23  ;;  %v454_v8 = vsel %vm450_vm2, %v4680_v2, 0.0 }
  0xb3   :  { %v455_v13 = vadd.f32 %v454_v8, %v453_v10 }
  0xb5   :  { %v4650_v54 = vpop.f32.mrf.mxu2 }
  0xb7   :  { %v346_v26 = vpop.f32.mrf.mxu0 }
  0xb8   :  { %v4687_v5 = vadd.f32 %v4671_v63, %v346_v26 }
  0xba   :  { %v456_v11 = vsel %vm450_vm2, %v4687_v5, 0.0 }
  0xbb   :  { %v457_v16 = vadd.f32 %v456_v11, %v455_v13 }
  0xbd   :  { %v4654_v56 = vpop.f32.mrf.mxu2 }
  0xbf   :  { %v349_v28 = vpop.f32.mrf.mxu0 }
  0xc0   :  { %v4696_v9 = vadd.f32 %v4671_v63, %v349_v28 }
  0xc2   :  { %3762 = vmatmul.msk.bf16.gmra.mxu0 %vm259_vm1, %v4198_v27  ;;  %v458_v14 = vsel %vm450_vm2, %v4696_v9, 0.0 }
  0xc3   :  { %v459_v20 = vadd.f32 %v458_v14, %v457_v16 }
  0xc5   :  { %v4658_v58 = vpop.f32.mrf.mxu2 }
  0xc7   :  { %v351_v30 = vpop.f32.mrf.mxu0 }
  0xc8   :  { %v4701_v12 = vadd.f32 %v4671_v63, %v351_v30 }
  0xca   :  { %v460_v18 = vsel %vm450_vm2, %v4701_v12, 0.0 }
  0xcb   :  { %v461_v24 = vadd.f32 %v460_v18, %v459_v20 }
  0xcd   :  { %v4662_v60 = vpop.f32.mrf.mxu2 }
  0xcf   :  { %v354_v32 = vpop.f32.mrf.mxu0 }
  0xd0   :  { %v4706_v15 = vadd.f32 %v4671_v63, %v354_v32 }
  0xd2   :  { %3763 = vmatmul.msk.bf16.gmra.mxu0 %vm259_vm1, %v4199_v31  ;;  %v462_v22 = vsel %vm450_vm2, %v4706_v15, 0.0 }
  0xd3   :  { %v463_v27 = vadd.f32 %v462_v22, %v461_v24 }
  0xd5   :  { %v4666_v62 = vpop.f32.mrf.mxu2 }
  0xd7   :  { %v356_v34 = vpop.f32.mrf.mxu0 }
  0xd8   :  { %v4711_v19 = vadd.f32 %v4671_v63, %v356_v34 }
  0xda   :  { %v464_v25 = vsel %vm450_vm2, %v4711_v19, 0.0 }
  0xdb   :  { %v465_v30 = vadd.f32 %v464_v25, %v463_v27 }
  0xdd   :  { %v4689_v6 = vpop.f32.mrf.mxu2 }
  0xdf   :  { %v359_v36 = vpop.f32.mrf.mxu0 }
  0xe0   :  { %v4718_v23 = vadd.f32 %v4671_v63, %v359_v36 }
  0xe2   :  { %3764 = vmatmul.msk.bf16.gmra.mxu0 %vm259_vm1, %v4200_v35  ;;  %v466_v28 = vsel %vm450_vm2, %v4718_v23, 0.0 }
  0xe3   :  { %v467_v34 = vadd.f32 %v466_v28, %v465_v30 }
  0xe5   :  { %v4713_v21 = vpop.f32.mrf.mxu2 }
  0xe7   :  { %v361_v38 = vpop.f32.mrf.mxu0 }
  0xe8   :  { %v4723_v26 = vadd.f32 %v4671_v63, %v361_v38 }
  0xea   :  { %v468_v32 = vsel %vm450_vm2, %v4723_v26, 0.0 }
  0xeb   :  { %v469_v38 = vadd.f32 %v468_v32, %v467_v34 }
  0xed   :  { %v4735_v35 = vpop.f32.mrf.mxu2 }
  0xef   :  { %v364_v40 = vpop.f32.mrf.mxu0 }
  0xf0   :  { %v4728_v29 = vadd.f32 %v4671_v63, %v364_v40 }
  0xf2   :  { %3765 = vmatmul.msk.bf16.gmra.mxu0 %vm259_vm1, %v4201_v39  ;;  %v470_v36 = vsel %vm450_vm2, %v4728_v29, 0.0 }
  0xf3   :  { %v471_v41 = vadd.f32 %v470_v36, %v469_v38 }
  0xf5   :  { %v4758_v8 = vpop.f32.mrf.mxu2 }
  0xf7   :  { %v366_v44 = vpop.f32.mrf.mxu0 }
  0xf8   :  { %v4733_v33 = vadd.f32 %v4671_v63, %v366_v44 }
  0xfa   :  { %v472_v39 = vsel %vm450_vm2, %v4733_v33, 0.0 }
  0xfb   :  { %v473_v44 = vadd.f32 %v472_v39, %v471_v41 }
  0xff   :  { %v369_v46 = vpop.f32.mrf.mxu0 }
 0x100   :  { %v4740_v37 = vadd.f32 %v4671_v63, %v369_v46 }
 0x102   :  { %3766 = vmatmul.msk.bf16.gmra.mxu0 %vm259_vm1, %v4202_v45  ;;  %v474_v42 = vsel %vm450_vm2, %v4740_v37, 0.0 }
 0x103   :  { %v475_v7 = vadd.f32 %v474_v42, %v473_v44 }
 0x107   :  { %v371_v47 = vpop.f32.mrf.mxu0 }
 0x108   :  { %v4745_v40 = vadd.f32 %v4671_v63, %v371_v47 }
 0x10a   :  { %v476_v46 = vsel %vm450_vm2, %v4745_v40, 0.0 }
 0x10f   :  { %v374_v48 = vpop.f32.mrf.mxu0 }
 0x110   :  { %v4750_v43 = vadd.f32 %v4671_v63, %v374_v48  ;;  %v477_v48 = vadd.f32 %v476_v46, %v475_v7 }
 0x112   :  { %v478_v47 = vsel %vm450_vm2, %v4750_v43, 0.0 }
 0x117   :  { %v4640_v49 = vpop.f32.mrf.mxu0 }
 0x118   :  { %v4756_v4 = vadd.f32 %v4671_v63, %v4640_v49  ;;  %v479_v49 = vadd.f32 %v478_v47, %v477_v48 }
 0x11a   :  { %v480_v11 = vsel %vm450_vm2, %v4756_v4, 0.0 }
 0x11b   :  { %v481_v18 = vadd.f32 %v480_v11, %v479_v49 }
 0x11f   :  { %v4644_v51 = vpop.f32.mrf.mxu0 }
 0x120   :  { %v4764_v10 = vadd.f32 %v4671_v63, %v4644_v51 }
 0x122   :  { %v482_v14 = vsel %vm450_vm2, %v4764_v10, 0.0 }
 0x123   :  { %v483_v24 = vadd.f32 %v482_v14, %v481_v18 }
 0x127   :  { %v4648_v53 = vpop.f32.mrf.mxu0 }
 0x128   :  { %v4770_v13 = vadd.f32 %v4671_v63, %v4648_v53  ;;  %v4784_v53 = vpop.f32.mrf.mxu2 }
 0x12a   :  { %v484_v51 = vsel %vm450_vm2, %v4770_v13, 0.0 }
 0x12f   :  { %v4652_v55 = vpop.f32.mrf.mxu0 }
 0x130   :  { %v4776_v16 = vadd.f32 %v4671_v63, %v4652_v55  ;;  %v485_v55 = vadd.f32 %v484_v51, %v483_v24  ;;  %v444_v42 = vpop.f32.mrf.mxu2 }
 0x132   :  { %v486_v25 = vsel %vm450_vm2, %v4776_v16, 0.0 }
 0x137   :  { %v4656_v57 = vpop.f32.mrf.mxu0 }
 0x138   :  { %v4782_v22 = vadd.f32 %v4671_v63, %v4656_v57  ;;  %v487_v57 = vadd.f32 %v486_v25, %v485_v55  ;;  %v446_v51 = vpop.f32.mrf.mxu2 }
 0x139   :  { %v4870_v51 = vadd.f32 %v4671_v63, %v4662_v60 }
 0x13a   :  { %v488_v28 = vsel %vm450_vm2, %v4782_v22, 0.0 }
 0x13b   :  { %v489_v36 = vadd.f32 %v488_v28, %v487_v57 }
 0x13f   :  { %v4660_v59 = vpop.f32.mrf.mxu0 }
 0x140   :  { %v4790_v27 = vadd.f32 %v4671_v63, %v4660_v59 }
 0x142   :  { %v490_v32 = vsel %vm450_vm2, %v4790_v27, 0.0 }
 0x143   :  { %v491_v41 = vadd.f32 %v490_v32, %v489_v36  ;;  %v4840_v36 = vadd.f32 %v4671_v63, %v4642_v50 }
 0x147   :  { %v4664_v61 = vpop.f32.mrf.mxu0 }
 0x148   :  { %v4796_v30 = vadd.f32 %v4671_v63, %v4664_v61 }
 0x14a   :  { %v492_v59 = vsel %vm450_vm2, %v4796_v30, 0.0 }
 0x14b   :  { %v493_v46 = vadd.f32 %v492_v59, %v491_v41  ;;  %v4845_v41 = vadd.f32 %v4671_v63, %v4646_v52 }
 0x14d   :  { %v512_v50 = vsel %vm450_vm2, %v4845_v41, 0.0 }
 0x14f   :  { %v4682_v3 = vpop.f32.mrf.mxu0 }
 0x150   :  { %v4802_v34 = vadd.f32 %v4671_v63, %v4682_v3 }
 0x152   :  { %v494_v61 = vsel %vm450_vm2, %v4802_v34, 0.0 }
 0x153   :  { %v495_v47 = vadd.f32 %v494_v61, %v493_v46 }
 0x157   :  { %v396_v17 = vpop.f32.mrf.mxu0 }
 0x158   :  { %v4807_v39 = vadd.f32 %v4671_v63, %v396_v17 }
 0x15a   :  { %v496_v3 = vsel %vm450_vm2, %v4807_v39, 0.0 }
 0x15b   :  { %v497_v11 = vadd.f32 %v496_v3, %v495_v47  ;;  %v510_v3 = vsel %vm450_vm2, %v4840_v36, 0.0  ;;  %v4852_v47 = vadd.f32 %v4671_v63, %v4650_v54 }
 0x15f   :  { %v399_v31 = vpop.f32.mrf.mxu0 }
 0x160   :  { %v4812_v44 = vadd.f32 %v4671_v63, %v399_v31 }
 0x162   :  { %v498_v17 = vsel %vm450_vm2, %v4812_v44, 0.0 }
 0x163   :  { %v499_v18 = vadd.f32 %v498_v17, %v497_v11  ;;  %v4858_v11 = vadd.f32 %v4671_v63, %v4654_v56 }
 0x165   :  { %v516_v54 = vsel %vm450_vm2, %v4858_v11, 0.0 }
 0x167   :  { %v401_v45 = vpop.f32.mrf.mxu0 }
 0x168   :  { %v4817_v7 = vadd.f32 %v4671_v63, %v401_v45 }
 0x16a   :  { %v500_v31 = vsel %vm450_vm2, %v4817_v7, 0.0 }
 0x16b   :  { %v501_v25 = vadd.f32 %v500_v31, %v499_v18  ;;  %v4864_v31 = vadd.f32 %v4671_v63, %v4658_v58  ;;  %v520_v58 = vsel %vm450_vm2, %v4870_v51, 0.0 }
 0x16d   :  { %v518_v56 = vsel %vm450_vm2, %v4864_v31, 0.0 }
 0x16f   :  { %v404_v20 = vpop.f32.mrf.mxu0 }
 0x170   :  { %v4822_v48 = vadd.f32 %v4671_v63, %v404_v20 }
 0x172   :  { %v502_v45 = vsel %vm450_vm2, %v4822_v48, 0.0 }
 0x173   :  { %v503_v55 = vadd.f32 %v502_v45, %v501_v25  ;;  %v4876_v25 = vadd.f32 %v4671_v63, %v4666_v62 }
 0x175   :  { %v522_v60 = vsel %vm450_vm2, %v4876_v25, 0.0 }
 0x177   :  { %v406_v38 = vpop.f32.mrf.mxu0 }
 0x178   :  { %v4827_v14 = vadd.f32 %v4671_v63, %v406_v38 }
 0x17a   :  { %v504_v20 = vsel %vm450_vm2, %v4827_v14, 0.0 }
 0x17b   :  { %v505_v57 = vadd.f32 %v504_v20, %v503_v55  ;;  %v4882_v55 = vadd.f32 %v4671_v63, %v4689_v6 }
 0x17d   :  { %v524_v62 = vsel %vm450_vm2, %v4882_v55, 0.0 }
 0x17f   :  { %v409_v49 = vpop.f32.mrf.mxu0 }
 0x180   :  { %v4832_v24 = vadd.f32 %v4671_v63, %v409_v49  ;;  %v514_v49 = vsel %vm450_vm2, %v4852_v47, 0.0 }
 0x182   :  { %v506_v28 = vsel %vm450_vm2, %v4832_v24, 0.0 }
 0x183   :  { %v507_v59 = vadd.f32 %v506_v28, %v505_v57  ;;  %v4888_v57 = vadd.f32 %v4671_v63, %v4713_v21 }
 0x185   :  { %v526_v6 = vsel %vm450_vm2, %v4888_v57, 0.0 }
 0x187   :  { %v411_v32 = vpop.f32.mrf.mxu0 }
 0x188   :  { %v412_v38 = vadd.f32 %v4671_v63, %v411_v32 }
 0x18a   :  { %v508_v61 = vsel %vm450_vm2, %v412_v38, 0.0 }
 0x18b   :  { %v509_v46 = vadd.f32 %v508_v61, %v507_v59  ;;  %v4894_v59 = vadd.f32 %v4671_v63, %v4735_v35  ;;  %v445_v35 = vadd.f32 %v4671_v63, %v444_v42 }
 0x18d   :  { %v511_v17 = vadd.f32 %v510_v3, %v509_v46  ;;  %v4900_v46 = vadd.f32 %v4671_v63, %v4758_v8  ;;  %v4409_v3 = vmov 338.0  }
 0x18e   :  { %4371 = vrcp.f32 %v4409_v3 }
 0x18f   :  { %v513_v52 = vadd.f32 %v512_v50, %v511_v17  ;;  %v528_v17 = vsel %vm450_vm2, %v4894_v59, 0.0  ;;  %v4906_v50 = vadd.f32 %v4671_v63, %v4784_v53 }
 0x191   :  { %v515_v18 = vadd.f32 %v514_v49, %v513_v52  ;;  %v530_v49 = vsel %vm450_vm2, %v4900_v46, 0.0 }
 0x193   :  { %v517_v45 = vadd.f32 %v516_v54, %v515_v18  ;;  %v532_v54 = vsel %vm450_vm2, %v4906_v50, 0.0 }
 0x194   :  { %v4372_v8 = vpop.eup %4371 }
 0x195   :  { %v519_v20 = vadd.f32 %v518_v56, %v517_v45  ;;  %v535_v45 = vsel %vm534_vm3, %v445_v35, 0.0  ;;  %vm548_vm4 = vweird.f32 %v4372_v8 }
 0x197   :  { %v521_v28 = vadd.f32 %v520_v58, %v519_v20  ;;  %v544_v58 = vmul.f32 338.0, %v4372_v8 }
 0x199   :  { %v523_v32 = vadd.f32 %v522_v60, %v521_v28  ;;  %v545_v60 = vsub.f32 1.0, %v544_v58 }
 0x19b   :  { %v525_v61 = vadd.f32 %v524_v62, %v523_v32  ;;  %v546_v42 = vmul.f32 %v4372_v8, %v545_v60 }
 0x19d   :  { %v527_v21 = vadd.f32 %v526_v6, %v525_v61  ;;  %v547_v61 = vadd.f32 %v4372_v8, %v546_v42 }
 0x19f   :  { %v529_v52 = vadd.f32 %v528_v17, %v527_v21  ;;  %v4914_v3 = vsel %vm548_vm4, %v4372_v8, %v547_v61  ;;  %vm1370_vm4 = vcmask 238792  }
 0x1a1   :  { %v531_v18 = vadd.f32 %v530_v49, %v529_v52 }
 0x1a3   :  { %v533_v56 = vadd.f32 %v532_v54, %v531_v18 }
 0x1a5   :  { %v536_v20 = vadd.f32 %v535_v45, %v533_v56 }
 0x1a7   :  { %v537_v28 = vrot.slane %v536_v20, 4 }
 0x1a9   :  { %v538_v53 = vadd.f32 %v537_v28, %v536_v20 }
 0x1ab   :  { %v539_v32 = vrot.slane %v538_v53, 2 }
 0x1ad   :  { %v540_v63 = vadd.f32 %v539_v32, %v538_v53 }
 0x1af   :  { %v541_v62 = vrot.slane %v540_v63, 1 }
 0x1b1   :  { %v542_v6 = vadd.f32 %v541_v62, %v540_v63 }
 0x1b3   :  { %v4917_v21 = vmul.f32 %v4914_v3, %v542_v6 }
 0x1b5   :  { %v4921_v17 = vsub.f32 %v4832_v24, %v4917_v21  ;;  %v4924_v52 = vsub.f32 %v412_v38, %v4917_v21  ;;  %v4927_v49 = vsub.f32 %v445_v35, %v4917_v21  ;;  %v4931_v18 = vsub.f32 %v4677_v1, %v4917_v21 }
 0x1b6   :  { %v4935_v8 = vsub.f32 %v4674_v0, %v4917_v21  ;;  %v4939_v54 = vsub.f32 %v4680_v2, %v4917_v21  ;;  %v4943_v24 = vsub.f32 %v4687_v5, %v4917_v21  ;;  %v4951_v1 = vsub.f32 %v4696_v9, %v4917_v21 }
 0x1b7   :  { %v594_v38 = vmul.f32 %v4931_v18, %v4931_v18  ;;  %v4957_v2 = vsub.f32 %v4701_v12, %v4917_v21  ;;  %v4965_v58 = vsub.f32 %v4706_v15, %v4917_v21  ;;  %v4972_v12 = vsub.f32 %v4711_v19, %v4917_v21 }
 0x1b8   :  { %v595_v35 = vmul.f32 %v4935_v8, %v4935_v8  ;;  %v596_v0 = vmul.f32 %v4939_v54, %v4939_v54  ;;  %v597_v5 = vmul.f32 %v4943_v24, %v4943_v24  ;;  %v598_v9 = vmul.f32 %v4951_v1, %v4951_v1 }
 0x1b9   :  { %v637_v45 = vsel %vm450_vm2, %v594_v38, 0.0  ;;  %v599_v60 = vmul.f32 %v4957_v2, %v4957_v2  ;;  %v4979_v15 = vsub.f32 %v4718_v23, %v4917_v21  ;;  %v600_v42 = vmul.f32 %v4965_v58, %v4965_v58 }
 0x1ba   :  { %v638_v56 = vsel %vm450_vm2, %v595_v35, 0.0  ;;  %v640_v28 = vsel %vm450_vm2, %v596_v0, 0.0  ;;  %v642_v32 = vsel %vm450_vm2, %v597_v5, 0.0  ;;  %v644_v62 = vsel %vm450_vm2, %v598_v9, 0.0 }
 0x1bb   :  { %v639_v20 = vadd.f32 %v638_v56, %v637_v45  ;;  %v4986_v19 = vsub.f32 %v4723_v26, %v4917_v21  ;;  %v601_v6 = vmul.f32 %v4972_v12, %v4972_v12  ;;  %v646_v38 = vsel %vm450_vm2, %v599_v60, 0.0 }
 0x1bc   :  { %v4993_v23 = vsub.f32 %v4728_v29, %v4917_v21  ;;  %v602_v0 = vmul.f32 %v4979_v15, %v4979_v15  ;;  %v648_v5 = vsel %vm450_vm2, %v600_v42, 0.0  ;;  %v5000_v26 = vsub.f32 %v4733_v33, %v4917_v21 }
 0x1bd   :  { %v641_v53 = vadd.f32 %v640_v28, %v639_v20  ;;  %v603_v56 = vmul.f32 %v4986_v19, %v4986_v19  ;;  %v650_v20 = vsel %vm450_vm2, %v601_v6, 0.0  ;;  %v5007_v29 = vsub.f32 %v4740_v37, %v4917_v21 }
 0x1be   :  { %v604_v28 = vmul.f32 %v4993_v23, %v4993_v23  ;;  %v5014_v33 = vsub.f32 %v4745_v40, %v4917_v21  ;;  %v5021_v37 = vsub.f32 %v4750_v43, %v4917_v21  ;;  %v5028_v40 = vsub.f32 %v4756_v4, %v4917_v21 }
 0x1bf   :  { %v643_v63 = vadd.f32 %v642_v32, %v641_v53  ;;  %v652_v53 = vsel %vm450_vm2, %v602_v0, 0.0  ;;  %v605_v32 = vmul.f32 %v5000_v26, %v5000_v26  ;;  %v5035_v43 = vsub.f32 %v4764_v10, %v4917_v21 }
 0x1c0   :  { %v5042_v4 = vsub.f32 %v4770_v13, %v4917_v21  ;;  %v5049_v10 = vsub.f32 %v4776_v16, %v4917_v21  ;;  %v5056_v13 = vsub.f32 %v4782_v22, %v4917_v21  ;;  %v5063_v16 = vsub.f32 %v4790_v27, %v4917_v21 }
 0x1c1   :  { %v645_v61 = vadd.f32 %v644_v62, %v643_v63  ;;  %v654_v63 = vsel %vm450_vm2, %v603_v56, 0.0  ;;  %v606_v62 = vmul.f32 %v5007_v29, %v5007_v29  ;;  %v5070_v22 = vsub.f32 %v4796_v30, %v4917_v21 }
 0x1c2   :  { %v5077_v27 = vsub.f32 %v4802_v34, %v4917_v21  ;;  %v5084_v30 = vsub.f32 %v4807_v39, %v4917_v21  ;;  %v5091_v34 = vsub.f32 %v4812_v44, %v4917_v21  ;;  %v5098_v39 = vsub.f32 %v4817_v7, %v4917_v21 }
 0x1c3   :  { %v647_v35 = vadd.f32 %v646_v38, %v645_v61  ;;  %v656_v61 = vsel %vm450_vm2, %v604_v28, 0.0  ;;  %v607_v38 = vmul.f32 %v5014_v33, %v5014_v33  ;;  %v5105_v44 = vsub.f32 %v4822_v48, %v4917_v21 }
 0x1c4   :  { %v5112_v7 = vsub.f32 %v4827_v14, %v4917_v21  ;;  %v5125_v14 = vsub.f32 %v4840_v36, %v4917_v21  ;;  %v5139_v36 = vsub.f32 %v4852_v47, %v4917_v21  ;;  %v5153_v47 = vsub.f32 %v4864_v31, %v4917_v21 }
 0x1c5   :  { %v649_v45 = vadd.f32 %v648_v5, %v647_v35  ;;  %v658_v35 = vsel %vm450_vm2, %v605_v32, 0.0  ;;  %v608_v5 = vmul.f32 %v5021_v37, %v5021_v37  ;;  %v620_v48 = vmul.f32 %v5105_v44, %v5105_v44 }
 0x1c6   :  { %v5167_v31 = vsub.f32 %v4876_v25, %v4917_v21  ;;  %v5181_v25 = vsub.f32 %v4888_v57, %v4917_v21  ;;  %v5195_v57 = vsub.f32 %v4900_v46, %v4917_v21 }
 0x1c7   :  { %v651_v9 = vadd.f32 %v650_v20, %v649_v45  ;;  %v660_v45 = vsel %vm450_vm2, %v606_v62, 0.0  ;;  %v609_v20 = vmul.f32 %v5028_v40, %v5028_v40 }
 0x1c8   :  { %v634_v46 = vmul.f32 %v5195_v57, %v5195_v57 }
 0x1c9   :  { %v653_v60 = vadd.f32 %v652_v53, %v651_v9  ;;  %v662_v9 = vsel %vm450_vm2, %v607_v38, 0.0  ;;  %v610_v53 = vmul.f32 %v5035_v43, %v5035_v43 }
 0x1cb   :  { %v655_v42 = vadd.f32 %v654_v63, %v653_v60  ;;  %v664_v60 = vsel %vm450_vm2, %v608_v5, 0.0  ;;  %v611_v63 = vmul.f32 %v5042_v4, %v5042_v4 }
 0x1cd   :  { %v657_v6 = vadd.f32 %v656_v61, %v655_v42  ;;  %v666_v42 = vsel %vm450_vm2, %v609_v20, 0.0  ;;  %v612_v61 = vmul.f32 %v5049_v10, %v5049_v10 }
 0x1cf   :  { %v659_v0 = vadd.f32 %v658_v35, %v657_v6  ;;  %v668_v6 = vsel %vm450_vm2, %v610_v53, 0.0  ;;  %v613_v35 = vmul.f32 %v5056_v13, %v5056_v13 }
 0x1d1   :  { %v661_v56 = vadd.f32 %v660_v45, %v659_v0  ;;  %v670_v0 = vsel %vm450_vm2, %v611_v63, 0.0  ;;  %v614_v45 = vmul.f32 %v5063_v16, %v5063_v16 }
 0x1d3   :  { %v663_v28 = vadd.f32 %v662_v9, %v661_v56  ;;  %v672_v56 = vsel %vm450_vm2, %v612_v61, 0.0  ;;  %v615_v9 = vmul.f32 %v5070_v22, %v5070_v22 }
 0x1d5   :  { %v665_v32 = vadd.f32 %v664_v60, %v663_v28  ;;  %v674_v28 = vsel %vm450_vm2, %v613_v35, 0.0  ;;  %v616_v60 = vmul.f32 %v5077_v27, %v5077_v27 }
 0x1d7   :  { %v667_v62 = vadd.f32 %v666_v42, %v665_v32  ;;  %v676_v32 = vsel %vm450_vm2, %v614_v45, 0.0  ;;  %v617_v42 = vmul.f32 %v5084_v30, %v5084_v30 }
 0x1d9   :  { %v669_v38 = vadd.f32 %v668_v6, %v667_v62  ;;  %v678_v62 = vsel %vm450_vm2, %v615_v9, 0.0  ;;  %v618_v6 = vmul.f32 %v5091_v34, %v5091_v34  ;;  %v621_v9 = vmul.f32 %v5112_v7, %v5112_v7 }
 0x1db   :  { %v671_v5 = vadd.f32 %v670_v0, %v669_v38  ;;  %v680_v38 = vsel %vm450_vm2, %v616_v60, 0.0  ;;  %v619_v0 = vmul.f32 %v5098_v39, %v5098_v39  ;;  %v622_v60 = vmul.f32 %v4921_v17, %v4921_v17 }
 0x1dd   :  { %v673_v20 = vadd.f32 %v672_v56, %v671_v5  ;;  %v682_v5 = vsel %vm450_vm2, %v617_v42, 0.0  ;;  %v684_v56 = vsel %vm450_vm2, %v618_v6, 0.0  ;;  %v5132_v42 = vsub.f32 %v4845_v41, %v4917_v21 }
 0x1de   :  { %v5146_v41 = vsub.f32 %v4858_v11, %v4917_v21  ;;  %v5160_v11 = vsub.f32 %v4870_v51, %v4917_v21  ;;  %v5174_v51 = vsub.f32 %v4882_v55, %v4917_v21  ;;  %v5188_v55 = vsub.f32 %v4894_v59, %v4917_v21 }
 0x1df   :  { %v675_v53 = vadd.f32 %v674_v28, %v673_v20  ;;  %v686_v28 = vsel %vm450_vm2, %v619_v0, 0.0  ;;  %v5202_v59 = vsub.f32 %v4906_v50, %v4917_v21  ;;  %v636_v50 = vmul.f32 %v4927_v49, %v4927_v49 }
 0x1e0   :  { %v716_v21 = vsel %vm450_vm2, %v634_v46, 0.0 }
 0x1e1   :  { %v677_v63 = vadd.f32 %v676_v32, %v675_v53  ;;  %v688_v32 = vsel %vm450_vm2, %v620_v48, 0.0 }
 0x1e3   :  { %v679_v61 = vadd.f32 %v678_v62, %v677_v63  ;;  %v623_v62 = vmul.f32 %v4924_v52, %v4924_v52 }
 0x1e5   :  { %v681_v35 = vadd.f32 %v680_v38, %v679_v61  ;;  %v690_v61 = vsel %vm450_vm2, %v621_v9, 0.0  ;;  %v624_v38 = vmul.f32 %v5125_v14, %v5125_v14 }
 0x1e7   :  { %v683_v45 = vadd.f32 %v682_v5, %v681_v35  ;;  %v692_v35 = vsel %vm450_vm2, %v622_v60, 0.0  ;;  %v625_v5 = vmul.f32 %v5132_v42, %v5132_v42 }
 0x1e9   :  { %v685_v20 = vadd.f32 %v684_v56, %v683_v45  ;;  %v694_v45 = vsel %vm450_vm2, %v623_v62, 0.0  ;;  %v626_v56 = vmul.f32 %v5139_v36, %v5139_v36 }
 0x1eb   :  { %v687_v53 = vadd.f32 %v686_v28, %v685_v20  ;;  %v696_v20 = vsel %vm450_vm2, %v624_v38, 0.0  ;;  %v627_v28 = vmul.f32 %v5146_v41, %v5146_v41 }
 0x1ed   :  { %v689_v63 = vadd.f32 %v688_v32, %v687_v53  ;;  %v698_v53 = vsel %vm450_vm2, %v625_v5, 0.0  ;;  %v628_v32 = vmul.f32 %v5153_v47, %v5153_v47 }
 0x1ef   :  { %v691_v6 = vadd.f32 %v690_v61, %v689_v63  ;;  %v700_v63 = vsel %vm450_vm2, %v626_v56, 0.0  ;;  %v629_v61 = vmul.f32 %v5160_v11, %v5160_v11 }
 0x1f1   :  { %v693_v0 = vadd.f32 %v692_v35, %v691_v6  ;;  %v702_v6 = vsel %vm450_vm2, %v627_v28, 0.0  ;;  %v630_v35 = vmul.f32 %v5167_v31, %v5167_v31 }
 0x1f3   :  { %v695_v48 = vadd.f32 %v694_v45, %v693_v0  ;;  %v704_v0 = vsel %vm450_vm2, %v628_v32, 0.0  ;;  %v631_v45 = vmul.f32 %v5174_v51, %v5174_v51 }
 0x1f5   :  { %v697_v9 = vadd.f32 %v696_v20, %v695_v48  ;;  %v706_v48 = vsel %vm450_vm2, %v629_v61, 0.0  ;;  %v632_v20 = vmul.f32 %v5181_v25, %v5181_v25  ;;  %v635_v61 = vmul.f32 %v5202_v59, %v5202_v59 }
 0x1f7   :  { %v699_v60 = vadd.f32 %v698_v53, %v697_v9  ;;  %v708_v9 = vsel %vm450_vm2, %v630_v35, 0.0  ;;  %v633_v53 = vmul.f32 %v5188_v55, %v5188_v55 }
 0x1f9   :  { %v701_v62 = vadd.f32 %v700_v63, %v699_v60  ;;  %v710_v60 = vsel %vm450_vm2, %v631_v45, 0.0  ;;  %v712_v63 = vsel %vm450_vm2, %v632_v20, 0.0  ;;  %v720_v45 = vsel %vm534_vm3, %v636_v50, 0.0  ;;  %v5222_v50 = vld [vmem:[%s6095_s3] ss:$0 sm:$0xff]  ;;  %s4410_s3 = smov 5  }
 0x1fb   :  { %v703_v38 = vadd.f32 %v702_v6, %v701_v62  ;;  %v714_v6 = vsel %vm450_vm2, %v633_v53, 0.0 }
 0x1fd   :  { %v705_v5 = vadd.f32 %v704_v0, %v703_v38  ;;  %v718_v0 = vsel %vm450_vm2, %v635_v61, 0.0 }
 0x1ff   :  { %v707_v56 = vadd.f32 %v706_v48, %v705_v5 }
 0x201   :  { %v709_v28 = vadd.f32 %v708_v9, %v707_v56 }
 0x203   :  { %v711_v32 = vadd.f32 %v710_v60, %v709_v28 }
 0x205   :  { %v713_v62 = vadd.f32 %v712_v63, %v711_v32 }
 0x207   :  { %v715_v38 = vadd.f32 %v714_v6, %v713_v62 }
 0x209   :  { %v717_v35 = vadd.f32 %v716_v21, %v715_v38 }
 0x20b   :  { %v719_v5 = vadd.f32 %v718_v0, %v717_v35 }
 0x20d   :  { %v721_v48 = vadd.f32 %v720_v45, %v719_v5 }
 0x20f   :  { %v722_v56 = vrot.slane %v721_v48, 4 }
 0x211   :  { %v723_v20 = vadd.f32 %v722_v56, %v721_v48 }
 0x213   :  { %v724_v9 = vrot.slane %v723_v20, 2 }
 0x215   :  { %v725_v28 = vadd.f32 %v724_v9, %v723_v20 }
 0x217   :  { %v726_v60 = vrot.slane %v725_v28, 1 }
 0x219   :  { %v727_v32 = vadd.f32 %v726_v60, %v725_v28 }
 0x21b   :  { %v728_v53 = vmul.f32 %v727_v32, %v4914_v3  ;;  %v5229_v3 = vld [vmem:[%s6096_s4] ss:$0 sm:$0xff]  ;;  %s4411_s4 = smov 10  }
 0x21d   :  { %v729_v63 = vadd.f32 1e-05, %v728_v53 }
 0x21f   :  { %4373 = vrsqrt.f32 %v729_v63  ;;  %vm736_vm6 = vweird.f32 %v729_v63 }
 0x225   :  { %v4374_v62 = vpop.eup %4373 }
 0x226   :  { %v731_v6 = vmul.f32 %v4374_v62, %v729_v63  ;;  %vm737_vm5 = vweird.f32 %v4374_v62 }
 0x227   :  { %vm738_vm7 = vmor %vm736_vm6, %vm737_vm5  ;;  %vm1412_vm5 = vcmask 279792   ;;  %vm1450_vm6 = vcmask 326936  }
 0x228   :  { %v732_v46 = vmul.f32 %v4374_v62, %v731_v6 }
 0x22a   :  { %v733_v38 = vmul.f32 0.5, %v732_v46 }
 0x22c   :  { %v734_v21 = vsub.f32 1.5, %v733_v38 }
 0x22e   :  { %v735_v61 = vmul.f32 %v4374_v62, %v734_v21 }
 0x230   :  { %v5224_v35 = vsel %vm738_vm7, %v4374_v62, %v735_v61  ;;  %vm1454_vm7 = vcmask 320792  }
 0x231   :  { %v782_v0 = vmul.f32 %v5224_v35, %v4927_v49  ;;  %v740_v48 = vmul.f32 %v5224_v35, %v4931_v18  ;;  %v5241_v56 = vmul.f32 %v5224_v35, %v4935_v8  ;;  %v742_v20 = vmul.f32 %v5224_v35, %v4939_v54 }
 0x232   :  { %v750_v9 = vmul.f32 %v5224_v35, %v4993_v23  ;;  %v751_v49 = vmul.f32 %v5224_v35, %v5000_v26  ;;  %v752_v28 = vmul.f32 %v5224_v35, %v5007_v29  ;;  %v753_v60 = vmul.f32 %v5224_v35, %v5014_v33 }
 0x233   :  { %v828_v5 = vmul.f32 %v5222_v50, %v782_v0  ;;  %v754_v18 = vmul.f32 %v5224_v35, %v5021_v37  ;;  %v755_v8 = vmul.f32 %v5224_v35, %v5028_v40  ;;  %v756_v54 = vmul.f32 %v5224_v35, %v5035_v43 }
 0x234   :  { %v757_v23 = vmul.f32 %v5224_v35, %v5042_v4  ;;  %v758_v26 = vmul.f32 %v5224_v35, %v5049_v10  ;;  %v759_v29 = vmul.f32 %v5224_v35, %v5056_v13  ;;  %v760_v33 = vmul.f32 %v5224_v35, %v5063_v16 }
 0x235   :  { %v5235_v45 = vadd.f32 %v5229_v3, %v828_v5  ;;  %v761_v37 = vmul.f32 %v5224_v35, %v5070_v22  ;;  %v762_v40 = vmul.f32 %v5224_v35, %v5077_v27  ;;  %v763_v43 = vmul.f32 %v5224_v35, %v5084_v30 }
 0x236   :  { %v764_v4 = vmul.f32 %v5224_v35, %v5091_v34  ;;  %v765_v10 = vmul.f32 %v5224_v35, %v5098_v39  ;;  %v766_v13 = vmul.f32 %v5224_v35, %v5105_v44  ;;  %v767_v16 = vmul.f32 %v5224_v35, %v5112_v7 }
 0x237   :  { %v768_v22 = vmul.f32 %v5224_v35, %v4921_v17  ;;  %v769_v27 = vmul.f32 %v5224_v35, %v4924_v52  ;;  %v770_v30 = vmul.f32 %v5224_v35, %v5125_v14  ;;  %v771_v34 = vmul.f32 %v5224_v35, %v5132_v42 }
 0x238   :  { %v772_v39 = vmul.f32 %v5224_v35, %v5139_v36  ;;  %v773_v44 = vmul.f32 %v5224_v35, %v5146_v41  ;;  %v774_v7 = vmul.f32 %v5224_v35, %v5153_v47  ;;  %v775_v17 = vmul.f32 %v5224_v35, %v5160_v11 }
 0x239   :  { %v776_v52 = vmul.f32 %v5224_v35, %v5167_v31  ;;  %v777_v14 = vmul.f32 %v5224_v35, %v5174_v51  ;;  %v778_v42 = vmul.f32 %v5224_v35, %v5181_v25  ;;  %v779_v36 = vmul.f32 %v5224_v35, %v5188_v55 }
 0x23a   :  { %v780_v41 = vmul.f32 %v5224_v35, %v5195_v57  ;;  %v781_v47 = vmul.f32 %v5224_v35, %v5202_v59  ;;  %v786_v11 = vmul.f32 %v5222_v50, %v740_v48  ;;  %v788_v32 = vmul.f32 %v5222_v50, %v742_v20 }
 0x23b   :  { %v796_v31 = vmul.f32 %v5222_v50, %v750_v9  ;;  %v797_v51 = vmul.f32 %v5222_v50, %v751_v49  ;;  %v798_v53 = vmul.f32 %v5222_v50, %v752_v28  ;;  %v799_v25 = vmul.f32 %v5222_v50, %v753_v60 }
 0x23c   :  { %v800_v55 = vmul.f32 %v5222_v50, %v754_v18  ;;  %v801_v63 = vmul.f32 %v5222_v50, %v755_v8  ;;  %v802_v57 = vmul.f32 %v5222_v50, %v756_v54  ;;  %v803_v59 = vmul.f32 %v5222_v50, %v757_v23 }
 0x23d   :  { %v804_v62 = vmul.f32 %v5222_v50, %v758_v26  ;;  %v805_v6 = vmul.f32 %v5222_v50, %v759_v29  ;;  %v806_v46 = vmul.f32 %v5222_v50, %v760_v33  ;;  %v807_v38 = vmul.f32 %v5222_v50, %v761_v37 }
 0x23e   :  { %v808_v21 = vmul.f32 %v5222_v50, %v762_v40  ;;  %v809_v61 = vmul.f32 %v5222_v50, %v763_v43  ;;  %v810_v0 = vmul.f32 %v5222_v50, %v764_v4  ;;  %v811_v5 = vmul.f32 %v5222_v50, %v765_v10 }
 0x23f   :  { %v812_v48 = vmul.f32 %v5222_v50, %v766_v13  ;;  %v813_v20 = vmul.f32 %v5222_v50, %v767_v16  ;;  %v814_v9 = vmul.f32 %v5222_v50, %v768_v22  ;;  %v815_v49 = vmul.f32 %v5222_v50, %v769_v27 }
 0x240   :  { %v816_v28 = vmul.f32 %v5222_v50, %v770_v30  ;;  %v817_v60 = vmul.f32 %v5222_v50, %v771_v34  ;;  %v818_v18 = vmul.f32 %v5222_v50, %v772_v39  ;;  %v819_v8 = vmul.f32 %v5222_v50, %v773_v44 }
 0x241   :  { %v820_v54 = vmul.f32 %v5222_v50, %v774_v7  ;;  %v821_v23 = vmul.f32 %v5222_v50, %v775_v17  ;;  %v822_v26 = vmul.f32 %v5222_v50, %v776_v52  ;;  %v823_v29 = vmul.f32 %v5222_v50, %v777_v14 }
 0x242   :  { %v824_v33 = vmul.f32 %v5222_v50, %v778_v42  ;;  %v825_v37 = vmul.f32 %v5222_v50, %v779_v36  ;;  %v826_v40 = vmul.f32 %v5222_v50, %v780_v41  ;;  %v827_v43 = vmul.f32 %v5222_v50, %v781_v47 }
 0x243   :  { %v832_v4 = vadd.f32 %v5229_v3, %v786_v11  ;;  %v834_v10 = vadd.f32 %v5229_v3, %v788_v32  ;;  %v743_v16 = vmul.f32 %v5224_v35, %v4943_v24  ;;  %v787_v22 = vmul.f32 %v5222_v50, %v5241_v56 }
 0x244   :  { %v5350_v27 = vadd.f32 %v5229_v3, %v796_v31  ;;  %v5353_v39 = vadd.f32 %v5229_v3, %v797_v51  ;;  %v5356_v44 = vadd.f32 %v5229_v3, %v798_v53  ;;  %v5359_v7 = vadd.f32 %v5229_v3, %v799_v25 }
 0x245   :  { %v875_v13 = vmax.f32 %v832_v4, 0.0  ;;  %v877_v30 = vmax.f32 %v834_v10, 0.0  ;;  %v5362_v17 = vadd.f32 %v5229_v3, %v800_v55  ;;  %v744_v14 = vmul.f32 %v5224_v35, %v4951_v1 }
 0x246   :  { %v789_v42 = vmul.f32 %v5222_v50, %v743_v16  ;;  %v833_v36 = vadd.f32 %v5229_v3, %v787_v22  ;;  %v5369_v47 = vadd.f32 %v5229_v3, %v801_v63  ;;  %v5372_v11 = vadd.f32 %v5229_v3, %v802_v57 }
 0x247   :  { %v918_v34 = vmin.f32 %v875_v13, 6.0  ;;  %v920_v41 = vmin.f32 %v877_v30, 6.0  ;;  %v5375_v32 = vadd.f32 %v5229_v3, %v803_v59  ;;  %v5378_v31 = vadd.f32 %v5229_v3, %v804_v62 }
 0x248   :  { %v5381_v1 = vadd.f32 %v5229_v3, %v805_v6  ;;  %v5384_v51 = vadd.f32 %v5229_v3, %v806_v46  ;;  %v5387_v53 = vadd.f32 %v5229_v3, %v807_v38  ;;  %v5390_v25 = vadd.f32 %v5229_v3, %v808_v21 }
 0x249   :  { %v1004_v24 = vrot.slane %v918_v34, 2  ;;  %v1005_v52 = vrot.slane %v918_v34, 4  ;;  %v1006_v56 = vrot.slane %v918_v34, 6  ;;  %1130 = vst [vmem:[#allocation1] ss:$4 sm:$0xff] %v918_v34  ;;  %v5393_v55 = vadd.f32 %v5229_v3, %v809_v61 }
 0x24a   :  { %v5396_v63 = vadd.f32 %v5229_v3, %v810_v0  ;;  %v5399_v57 = vadd.f32 %v5229_v3, %v811_v5  ;;  %v5402_v59 = vadd.f32 %v5229_v3, %v812_v48  ;;  %v5405_v62 = vadd.f32 %v5229_v3, %v813_v20 }
 0x24b   :  { %1132 = vst [vmem:[#allocation1 + $0x1] ss:$4 sm:$0xff] %v1004_v24  ;;  %v5408_v6 = vadd.f32 %v5229_v3, %v814_v9  ;;  %v5411_v46 = vadd.f32 %v5229_v3, %v815_v49  ;;  %v5414_v38 = vadd.f32 %v5229_v3, %v816_v28  ;;  %v5417_v21 = vadd.f32 %v5229_v3, %v817_v60 }
 0x24c   :  { %1134 = vst [vmem:[#allocation1 + $0x2] ss:$4 sm:$0xff] %v1005_v52  ;;  %v5420_v61 = vadd.f32 %v5229_v3, %v818_v18  ;;  %v5423_v0 = vadd.f32 %v5229_v3, %v819_v8  ;;  %v5426_v5 = vadd.f32 %v5229_v3, %v820_v54  ;;  %v5429_v48 = vadd.f32 %v5229_v3, %v821_v23 }
 0x24d   :  { %1136 = vst [vmem:[#allocation1 + $0x3] ss:$4 sm:$0xff] %v1006_v56  ;;  %v5432_v20 = vadd.f32 %v5229_v3, %v822_v26  ;;  %v5435_v9 = vadd.f32 %v5229_v3, %v823_v29  ;;  %v5438_v49 = vadd.f32 %v5229_v3, %v824_v33  ;;  %v5441_v28 = vadd.f32 %v5229_v3, %v825_v37 }
 0x24e   :  { %v5444_v60 = vadd.f32 %v5229_v3, %v826_v40  ;;  %v5447_v18 = vadd.f32 %v5229_v3, %v827_v43  ;;  %v835_v8 = vadd.f32 %v5229_v3, %v789_v42  ;;  %v876_v54 = vmax.f32 %v833_v36, 0.0 }
 0x24f   :  { %v1010_v23 = vrot.slane %v920_v41, 2  ;;  %v745_v29 = vmul.f32 %v5224_v35, %v4957_v2  ;;  %v790_v33 = vmul.f32 %v5222_v50, %v744_v14  ;;  %v1011_v10 = vrot.slane %v920_v41, 4 }
 0x250   :  { %v919_v4 = vmin.f32 %v876_v54, 6.0  ;;  %v878_v37 = vmax.f32 %v835_v8, 0.0  ;;  %v1012_v13 = vrot.slane %v920_v41, 6  ;;  %v746_v36 = vmul.f32 %v5224_v35, %v4965_v58 }
 0x251   :  { %v791_v16 = vmul.f32 %v5222_v50, %v745_v29  ;;  %v836_v22 = vadd.f32 %v5229_v3, %v790_v33 }
 0x252   :  { %v1007_v40 = vrot.slane %v919_v4, 2  ;;  %v1008_v43 = vrot.slane %v919_v4, 4  ;;  %v1009_v30 = vrot.slane %v919_v4, 6  ;;  %v921_v34 = vmin.f32 %v878_v37, 6.0  ;;  %1138 = vst [vmem:[#allocation1 + $0x20] ss:$4 sm:$0xff] %v919_v4 }
 0x253   :  { %v879_v2 = vmax.f32 %v836_v22, 0.0  ;;  %v837_v24 = vadd.f32 %v5229_v3, %v791_v16  ;;  %v747_v4 = vmul.f32 %v5224_v35, %v4972_v12  ;;  %v748_v16 = vmul.f32 %v5224_v35, %v4979_v15 }
 0x254   :  { %v1145_v26 = vld.sshfl [vmem:[#allocation1] sm:$0xff pattern:$0x73625140]  ;;  %1140 = vst [vmem:[#allocation1 + $0x21] ss:$4 sm:$0xff] %v1007_v40  ;;  %v1013_v52 = vrot.slane %v921_v34, 2 }
 0x255   :  { %1147 = vst [vmem:[#allocation1] ss:$4 sm:$0xff] %v920_v41  ;;  %v1014_v56 = vrot.slane %v921_v34, 4  ;;  %v1015_v42 = vrot.slane %v921_v34, 6  ;;  %v922_v41 = vmin.f32 %v879_v2, 6.0  ;;  %v880_v8 = vmax.f32 %v837_v24, 0.0 }
 0x256   :  { %1148 = vst [vmem:[#allocation1 + $0x1] ss:$4 sm:$0xff] %v1010_v23  ;;  %v792_v23 = vmul.f32 %v5222_v50, %v746_v36  ;;  %v794_v2 = vmul.f32 %v5222_v50, %v748_v16  ;;  %v885_v16 = vmax.f32 %v5350_v27, 0.0  ;;  %v887_v27 = vmax.f32 %v5356_v44, 0.0 }
 0x257   :  { %1149 = vst [vmem:[#allocation1 + $0x2] ss:$4 sm:$0xff] %v1011_v10  ;;  %v1016_v37 = vrot.slane %v922_v41, 2  ;;  %v1017_v40 = vrot.slane %v922_v41, 4  ;;  %v1018_v22 = vrot.slane %v922_v41, 6 }
 0x258   :  { %1150 = vst [vmem:[#allocation1 + $0x3] ss:$4 sm:$0xff] %v1012_v13  ;;  %v838_v29 = vadd.f32 %v5229_v3, %v792_v23  ;;  %v793_v13 = vmul.f32 %v5222_v50, %v747_v4 }
 0x259   :  { %1158 = vst.msk [vmem:[#allocation2] sm:$0xff] %vm450_vm2, %v1145_v26  ;;  %v923_v26 = vmin.f32 %v880_v8, 6.0 }
 0x25a   :  { %1142 = vst [vmem:[#allocation1 + $0x22] ss:$4 sm:$0xff] %v1008_v43  ;;  %v881_v12 = vmax.f32 %v838_v29, 0.0 }
 0x25b   :  { %1144 = vst [vmem:[#allocation1 + $0x23] ss:$4 sm:$0xff] %v1009_v30  ;;  %v1019_v58 = vrot.slane %v923_v26, 2  ;;  %v1020_v10 = vrot.slane %v923_v26, 4  ;;  %v839_v30 = vadd.f32 %v5229_v3, %v793_v13 }
 0x25c   :  { %v924_v24 = vmin.f32 %v881_v12, 6.0 }
 0x25d   :  { %v882_v15 = vmax.f32 %v839_v30, 0.0  ;;  %v886_v30 = vmax.f32 %v5353_v39, 0.0 }
 0x25f   :  { %v1152_v14 = vld.sshfl [vmem:[#allocation1] sm:$0xff pattern:$0x73625140] }
 0x260   :  { %1162 = vst [vmem:[#allocation1] ss:$4 sm:$0xff] %v1013_v52  ;;  %v749_v52 = vmul.f32 %v5224_v35, %v4986_v19 }
 0x261   :  { %1164 = vst [vmem:[#allocation1 + $0x1] ss:$4 sm:$0xff] %v1014_v56  ;;  %v840_v56 = vadd.f32 %v5229_v3, %v794_v2  ;;  %v929_v2 = vmin.f32 %v886_v30, 6.0 }
 0x262   :  { %1166 = vst [vmem:[#allocation1 + $0x2] ss:$4 sm:$0xff] %v1015_v42  ;;  %v1146_v54 = vld.sshfl [vmem:[#allocation1 + $0x20] sm:$0xff pattern:$0x73625140]  ;;  %v795_v42 = vmul.f32 %v5222_v50, %v749_v52 }
 0x263   :  { %1168 = vst [vmem:[#allocation1 + $0x3] ss:$4 sm:$0xff] %v922_v41  ;;  %v925_v41 = vmin.f32 %v882_v15, 6.0  ;;  %v883_v8 = vmax.f32 %v840_v56, 0.0  ;;  %v1038_v39 = vrot.slane %v929_v2, 4 }
 0x264   :  { %1160 = vst.msk [vmem:[#allocation2 + $0x10] sm:$0xff] %vm450_vm2, %v1152_v14  ;;  %v1022_v14 = vrot.slane %v924_v24, 2  ;;  %v841_v4 = vadd.f32 %v5229_v3, %v795_v42 }
 0x265   :  { %1151 = vst [vmem:[#allocation1 + $0x20] ss:$4 sm:$0xff] %v921_v34  ;;  %v1021_v34 = vrot.slane %v923_v26, 6  ;;  %v1025_v19 = vrot.slane %v925_v41, 2  ;;  %v926_v35 = vmin.f32 %v883_v8, 6.0  ;;  %v1026_v29 = vrot.slane %v925_v41, 4 }
 0x266   :  { %1159 = vst.msk [vmem:[#allocation2 + $0x8] sm:$0xff] %vm450_vm2, %v1146_v54  ;;  %v1023_v54 = vrot.slane %v924_v24, 4  ;;  %v884_v50 = vmax.f32 %v841_v4, 0.0  ;;  %vm1328_vm2 = vcmask 197792  }
 0x267   :  { %v1029_v3 = vrot.slane %v926_v35, 4  ;;  %v1030_v13 = vrot.slane %v926_v35, 6 }
 0x26a   :  { %v1177_v33 = vld.sshfl [vmem:[#allocation1] sm:$0xff pattern:$0x73625140] }
 0x26b   :  { %1186 = vrot.lane.b32.xlu0 %v1177_v33, %s4410_s3  ;;  %1179 = vst [vmem:[#allocation1] ss:$4 sm:$0xff] %v1019_v58  ;;  %v1027_v58 = vrot.slane %v925_v41, 6 }
 0x26c   :  { %v1153_v43 = vld.sshfl [vmem:[#allocation1 + $0x20] sm:$0xff pattern:$0x73625140]  ;;  %1180 = vst [vmem:[#allocation1 + $0x1] ss:$4 sm:$0xff] %v1020_v10  ;;  %v1028_v10 = vrot.slane %v926_v35, 2 }
 0x26d   :  { %1170 = vst [vmem:[#allocation1 + $0x20] ss:$4 sm:$0xff] %v1016_v37  ;;  %v927_v37 = vmin.f32 %v884_v50, 6.0 }
 0x26e   :  { %1172 = vst [vmem:[#allocation1 + $0x21] ss:$4 sm:$0xff] %v1017_v40 }
 0x26f   :  { %1174 = vst [vmem:[#allocation1 + $0x22] ss:$4 sm:$0xff] %v1018_v22  ;;  %v1032_v22 = vrot.slane %v927_v37, 4 }
 0x270   :  { %1176 = vst [vmem:[#allocation1 + $0x23] ss:$4 sm:$0xff] %v923_v26  ;;  %v1024_v26 = vrot.slane %v924_v24, 6 }
 0x271   :  { %1161 = vst.msk [vmem:[#allocation2 + $0x18] sm:$0x3] %vm534_vm3, %v1153_v43  ;;  %v1031_v43 = vrot.slane %v927_v37, 2  ;;  %vm1408_vm3 = vcmask 285936  }
 0x272   :  { %1181 = vst [vmem:[#allocation1 + $0x2] ss:$4 sm:$0xff] %v1021_v34  ;;  %v928_v34 = vmin.f32 %v885_v16, 6.0 }
 0x273   :  { %1182 = vst [vmem:[#allocation1 + $0x3] ss:$4 sm:$0xff] %v924_v24  ;;  %v1033_v24 = vrot.slane %v927_v37, 6 }
 0x274   :  { %v1036_v15 = vrot.slane %v928_v34, 6  ;;  %v1034_v42 = vrot.slane %v928_v34, 2 }
 0x277   :  { %v1178_v36 = vld.sshfl [vmem:[#allocation1 + $0x20] sm:$0xff pattern:$0x73625140] }
 0x278   :  { %1188 = vrot.lane.b32.xlu0 %v1178_v36, %s4410_s3  ;;  %1183 = vst [vmem:[#allocation1 + $0x20] ss:$4 sm:$0xff] %v1022_v14  ;;  %v1037_v14 = vrot.slane %v929_v2, 2  ;;  %v1035_v36 = vrot.slane %v928_v34, 4 }
 0x27a   :  { %v1184_v23 = vld.sshfl [vmem:[#allocation1] sm:$0xff pattern:$0x73625140] }
 0x27b   :  { %1190 = vrot.lane.b32.xlu1 %v1184_v23, %s4410_s3  ;;  %1204 = vst [vmem:[#allocation1] ss:$4 sm:$0xff] %v1023_v54  ;;  %v889_v54 = vmax.f32 %v5362_v17, 0.0 }
 0x27c   :  { %1206 = vst [vmem:[#allocation1 + $0x1] ss:$4 sm:$0xff] %v1024_v26  ;;  %v1039_v26 = vrot.slane %v929_v2, 6 }
 0x27d   :  { %1208 = vst [vmem:[#allocation1 + $0x2] ss:$4 sm:$0xff] %v925_v41  ;;  %v930_v41 = vmin.f32 %v887_v27, 6.0  ;;  %v894_v27 = vmax.f32 %v5381_v1, 0.0  ;;  %v895_v1 = vmax.f32 %v5384_v51, 0.0  ;;  %v897_v51 = vmax.f32 %v5390_v25, 0.0 }
 0x27e   :  { %1210 = vst [vmem:[#allocation1 + $0x3] ss:$4 sm:$0xff] %v1025_v19  ;;  %v932_v19 = vmin.f32 %v889_v54, 6.0  ;;  %v898_v25 = vmax.f32 %v5393_v55, 0.0  ;;  %v900_v55 = vmax.f32 %v5399_v57, 0.0  ;;  %v902_v57 = vmax.f32 %v5405_v62, 0.0 }
 0x27f   :  { %v1185_v33 = vld.sshfl [vmem:[#allocation1 + $0x20] sm:$0xff pattern:$0x73625140]  ;;  %v1042_v8 = vrot.slane %v930_v41, 6  ;;  %v1040_v44 = vrot.slane %v930_v41, 2 }
 0x280   :  { %1212 = vst [vmem:[#allocation1 + $0x20] ss:$4 sm:$0xff] %v1026_v29  ;;  %1192 = vrot.lane.b32.xlu0 %v1185_v33, %s4410_s3  ;;  %v888_v29 = vmax.f32 %v5359_v7, 0.0  ;;  %v1046_v50 = vrot.slane %v932_v19, 2  ;;  %v1047_v33 = vrot.slane %v932_v19, 4  ;;  %s4432_s3 = smov 44  }
 0x281   :  { %1214 = vst [vmem:[#allocation1 + $0x21] ss:$4 sm:$0xff] %v1027_v58 }
 0x282   :  { %1216 = vst [vmem:[#allocation1 + $0x22] ss:$4 sm:$0xff] %v926_v35  ;;  %v1041_v35 = vrot.slane %v930_v41, 4  ;;  %v931_v58 = vmin.f32 %v888_v29, 6.0 }
 0x283   :  { %1218 = vst [vmem:[#allocation1 + $0x23] ss:$4 sm:$0xff] %v1028_v10  ;;  %v1048_v10 = vrot.slane %v932_v19, 6 }
 0x284   :  { %v1045_v7 = vrot.slane %v931_v58, 6 }
 0x285   :  { %v1219_v40 = vld.sshfl [vmem:[#allocation1] sm:$0xff pattern:$0x73625140] }
 0x286   :  { %1228 = vrot.lane.b32.xlu1 %v1219_v40, %s4411_s4  ;;  %1221 = vst [vmem:[#allocation1] ss:$4 sm:$0xff] %v1029_v3  ;;  %v1044_v40 = vrot.slane %v931_v58, 4 }
 0x287   :  { %1222 = vst [vmem:[#allocation1 + $0x1] ss:$4 sm:$0xff] %v1030_v13  ;;  %v891_v13 = vmax.f32 %v5372_v11, 0.0 }
 0x288   :  { %1223 = vst [vmem:[#allocation1 + $0x2] ss:$4 sm:$0xff] %v927_v37  ;;  %v1043_v37 = vrot.slane %v931_v58, 2 }
 0x289   :  { %1224 = vst [vmem:[#allocation1 + $0x3] ss:$4 sm:$0xff] %v1031_v43  ;;  %v890_v43 = vmax.f32 %v5369_v47, 0.0  ;;  %v934_v16 = vmin.f32 %v891_v13, 6.0  ;;  %v893_v47 = vmax.f32 %v5378_v31, 0.0 }
 0x28a   :  { %v1220_v12 = vld.sshfl [vmem:[#allocation1 + $0x20] sm:$0xff pattern:$0x73625140] }
 0x28b   :  { %1230 = vrot.lane.b32.xlu2 %v1220_v12, %s4411_s4  ;;  %1225 = vst [vmem:[#allocation1 + $0x20] ss:$4 sm:$0xff] %v1032_v22  ;;  %v892_v22 = vmax.f32 %v5375_v32, 0.0  ;;  %v933_v30 = vmin.f32 %v890_v43, 6.0  ;;  %v1053_v31 = vrot.slane %v934_v16, 4 }
 0x28d   :  { %v935_v11 = vmin.f32 %v892_v22, 6.0  ;;  %v941_v22 = vmin.f32 %v898_v25, 6.0 }
 0x28f   :  { %v1055_v32 = vrot.slane %v935_v11, 2 }
 0x290   :  { %v1226_v52 = vld.sshfl [vmem:[#allocation1] sm:$0xff pattern:$0x73625140] }
 0x291   :  { %1246 = vst [vmem:[#allocation1] ss:$4 sm:$0xff] %v1033_v24  ;;  %v1050_v24 = vrot.slane %v933_v30, 4 }
 0x292   :  { %v1227_v56 = vld.sshfl [vmem:[#allocation1 + $0x20] sm:$0xff pattern:$0x73625140]  ;;  %1248 = vst [vmem:[#allocation1 + $0x1] ss:$4 sm:$0xff] %v928_v34  ;;  %v1049_v34 = vrot.slane %v933_v30, 2 }
 0x293   :  { %1234 = vrot.lane.b32.xlu1 %v1227_v56, %s4411_s4  ;;  %1254 = vst [vmem:[#allocation1 + $0x20] ss:$4 sm:$0xff] %v1036_v15  ;;  %1232 = vrot.lane.b32.xlu2 %v1226_v52, %s4411_s4  ;;  %v1051_v52 = vrot.slane %v933_v30, 6  ;;  %v1056_v56 = vrot.slane %v935_v11, 4 }
 0x294   :  { %1256 = vst [vmem:[#allocation1 + $0x21] ss:$4 sm:$0xff] %v929_v2 }
 0x295   :  { %1258 = vst [vmem:[#allocation1 + $0x22] ss:$4 sm:$0xff] %v1037_v14  ;;  %v1057_v14 = vrot.slane %v935_v11, 6 }
 0x296   :  { %1260 = vst [vmem:[#allocation1 + $0x23] ss:$4 sm:$0xff] %v1038_v39  ;;  %v936_v39 = vmin.f32 %v893_v47, 6.0  ;;  %v1075_v47 = vrot.slane %v941_v22, 6 }
 0x297   :  { %1250 = vst [vmem:[#allocation1 + $0x2] ss:$4 sm:$0xff] %v1034_v42  ;;  %v937_v42 = vmin.f32 %v894_v27, 6.0  ;;  %v1074_v27 = vrot.slane %v941_v22, 4 }
 0x298   :  { %1252 = vst [vmem:[#allocation1 + $0x3] ss:$4 sm:$0xff] %v1035_v36  ;;  %v1052_v36 = vrot.slane %v934_v16, 2  ;;  %v1060_v29 = vrot.slane %v936_v39, 6 }
 0x299   :  { %v1061_v54 = vrot.slane %v937_v42, 2 }
 0x29d   :  { %v1262_v23 = vld.sshfl [vmem:[#allocation1 + $0x20] sm:$0xff pattern:$0x73625140] }
 0x29e   :  { %1272 = vrot.lane.b32.xlu1 %v1262_v23, %s4412_s17  ;;  %1267 = vst [vmem:[#allocation1 + $0x20] ss:$4 sm:$0xff] %v1042_v8  ;;  %v1054_v8 = vrot.slane %v934_v16, 6 }
 0x29f   :  { %v1261_v4 = vld.sshfl [vmem:[#allocation1] sm:$0xff pattern:$0x73625140] }
 0x2a0   :  { %1270 = vrot.lane.b32.xlu0 %v1261_v4, %s4412_s17  ;;  %1263 = vst [vmem:[#allocation1] ss:$4 sm:$0xff] %v1039_v26  ;;  %v896_v26 = vmax.f32 %v5387_v53, 0.0  ;;  %v938_v4 = vmin.f32 %v895_v1, 6.0  ;;  %v940_v53 = vmin.f32 %v897_v51, 6.0 }
 0x2a1   :  { %1264 = vst [vmem:[#allocation1 + $0x1] ss:$4 sm:$0xff] %v930_v41 }
 0x2a2   :  { %1265 = vst [vmem:[#allocation1 + $0x2] ss:$4 sm:$0xff] %v1040_v44  ;;  %v1058_v44 = vrot.slane %v936_v39, 2 }
 0x2a3   :  { %1266 = vst [vmem:[#allocation1 + $0x3] ss:$4 sm:$0xff] %v1041_v35 }
 0x2a5   :  { %v1269_v17 = vld.sshfl [vmem:[#allocation1 + $0x20] sm:$0xff pattern:$0x73625140] }
 0x2a6   :  { %1296 = vst [vmem:[#allocation1 + $0x20] ss:$4 sm:$0xff] %v932_v19  ;;  %v1059_v19 = vrot.slane %v936_v39, 4 }
 0x2a7   :  { %1298 = vst [vmem:[#allocation1 + $0x21] ss:$4 sm:$0xff] %v1046_v50 }
 0x2a8   :  { %1300 = vst [vmem:[#allocation1 + $0x22] ss:$4 sm:$0xff] %v1047_v33  ;;  %v1066_v33 = vrot.slane %v938_v4, 6 }
 0x2a9   :  { %1302 = vst [vmem:[#allocation1 + $0x23] ss:$4 sm:$0xff] %v1048_v10 }
 0x2aa   :  { %v1268_v3 = vld.sshfl [vmem:[#allocation1] sm:$0xff pattern:$0x73625140] }
 0x2ab   :  { %1274 = vrot.lane.b32.xlu2 %v1268_v3, %s4412_s17  ;;  %1288 = vst [vmem:[#allocation1] ss:$4 sm:$0xff] %v931_v58  ;;  %v1065_v58 = vrot.slane %v938_v4, 4  ;;  %v1063_v3 = vrot.slane %v937_v42, 6 }
 0x2ac   :  { %1290 = vst [vmem:[#allocation1 + $0x1] ss:$4 sm:$0xff] %v1043_v37  ;;  %v1062_v37 = vrot.slane %v937_v42, 4 }
 0x2ad   :  { %1292 = vst [vmem:[#allocation1 + $0x2] ss:$4 sm:$0xff] %v1044_v40  ;;  %v1064_v40 = vrot.slane %v938_v4, 2 }
 0x2ae   :  { %1294 = vst [vmem:[#allocation1 + $0x3] ss:$4 sm:$0xff] %v1045_v7  ;;  %v1071_v7 = vrot.slane %v940_v53, 4 }
 0x2b0   :  { %v1304_v12 = vld.sshfl [vmem:[#allocation1 + $0x20] sm:$0xff pattern:$0x73625140] }
 0x2b1   :  { %1314 = vrot.lane.b32.xlu1 %v1304_v12, %s4413_s18  ;;  %1309 = vst [vmem:[#allocation1 + $0x20] ss:$4 sm:$0xff] %v934_v16  ;;  %v899_v16 = vmax.f32 %v5396_v63, 0.0  ;;  %v943_v63 = vmin.f32 %v900_v55, 6.0 }
 0x2b3   :  { %1276 = vrot.lane.b32.xlu2 %v1269_v17, %s4412_s17  ;;  %v939_v17 = vmin.f32 %v896_v26, 6.0  ;;  %v901_v26 = vmax.f32 %v5402_v59, 0.0  ;;  %s4434_s17 = smov 16  }
 0x2b5   :  { %v1303_v2 = vld.sshfl [vmem:[#allocation1] sm:$0xff pattern:$0x73625140]  ;;  %v1067_v10 = vrot.slane %v939_v17, 2  ;;  %v1068_v12 = vrot.slane %v939_v17, 4 }
 0x2b6   :  { %1305 = vst [vmem:[#allocation1] ss:$4 sm:$0xff] %v933_v30  ;;  %1312 = vrot.lane.b32.xlu0 %v1303_v2, %s4413_s18  ;;  %v1069_v30 = vrot.slane %v939_v17, 6  ;;  %v1070_v2 = vrot.slane %v940_v53, 2 }
 0x2b7   :  { %1306 = vst [vmem:[#allocation1 + $0x1] ss:$4 sm:$0xff] %v1049_v34  ;;  %v942_v34 = vmin.f32 %v899_v16, 6.0 }
 0x2b8   :  { %1307 = vst [vmem:[#allocation1 + $0x2] ss:$4 sm:$0xff] %v1050_v24  ;;  %v1311_v15 = vld.sshfl [vmem:[#allocation1 + $0x20] sm:$0xff pattern:$0x73625140] }
 0x2b9   :  { %1308 = vst [vmem:[#allocation1 + $0x3] ss:$4 sm:$0xff] %v1051_v52  ;;  %v1076_v52 = vrot.slane %v942_v34, 2 }
 0x2ba   :  { %1338 = vst [vmem:[#allocation1 + $0x20] ss:$4 sm:$0xff] %v1055_v32  ;;  %v1077_v32 = vrot.slane %v942_v34, 4 }
 0x2bb   :  { %1340 = vst [vmem:[#allocation1 + $0x21] ss:$4 sm:$0xff] %v1056_v56 }
 0x2bc   :  { %1342 = vst [vmem:[#allocation1 + $0x22] ss:$4 sm:$0xff] %v1057_v14  ;;  %v1073_v14 = vrot.slane %v941_v22, 2 }
 0x2bd   :  { %1344 = vst [vmem:[#allocation1 + $0x23] ss:$4 sm:$0xff] %v936_v39  ;;  %v1081_v39 = vrot.slane %v943_v63, 6 }
 0x2be   :  { %1318 = vrot.lane.b32.xlu0 %v1311_v15, %s4413_s18  ;;  %v1072_v15 = vrot.slane %v940_v53, 6 }
 0x2c0   :  { %v1310_v41 = vld.sshfl [vmem:[#allocation1] sm:$0xff pattern:$0x73625140] }
 0x2c1   :  { %1330 = vst [vmem:[#allocation1] ss:$4 sm:$0xff] %v1052_v36  ;;  %1316 = vrot.lane.b32.xlu2 %v1310_v41, %s4413_s18  ;;  %v1078_v36 = vrot.slane %v942_v34, 6  ;;  %v945_v41 = vmin.f32 %v902_v57, 6.0  ;;  %s4435_s18 = smov 66  }
 0x2c2   :  { %1332 = vst [vmem:[#allocation1 + $0x1] ss:$4 sm:$0xff] %v1053_v31 }
 0x2c3   :  { %1334 = vst [vmem:[#allocation1 + $0x2] ss:$4 sm:$0xff] %v1054_v8 }
 0x2c4   :  { %1336 = vst [vmem:[#allocation1 + $0x3] ss:$4 sm:$0xff] %v935_v11  ;;  %v1346_v23 = vld.sshfl [vmem:[#allocation1 + $0x20] sm:$0xff pattern:$0x73625140] }
 0x2c5   :  { %1351 = vst [vmem:[#allocation1 + $0x20] ss:$4 sm:$0xff] %v1061_v54  ;;  %1356 = vrot.lane.b32.xlu1 %v1346_v23, %s4414_s19  ;;  %v1079_v54 = vrot.slane %v943_v63, 2  ;;  %v1080_v23 = vrot.slane %v943_v63, 4 }
 0x2cb   :  { %v1345_v35 = vld.sshfl [vmem:[#allocation1] sm:$0xff pattern:$0x73625140] }
 0x2cc   :  { %1347 = vst [vmem:[#allocation1] ss:$4 sm:$0xff] %v1058_v44  ;;  %v1353_v50 = vld.sshfl [vmem:[#allocation1 + $0x20] sm:$0xff pattern:$0x73625140]  ;;  %1354 = vrot.lane.b32.xlu0 %v1345_v35, %s4414_s19  ;;  %v1086_v44 = vrot.slane %v945_v41, 4 }
 0x2cd   :  { %1348 = vst [vmem:[#allocation1 + $0x1] ss:$4 sm:$0xff] %v1059_v19  ;;  %1360 = vrot.lane.b32.xlu1 %v1353_v50, %s4414_s19  ;;  %v1087_v19 = vrot.slane %v945_v41, 6  ;;  %v944_v35 = vmin.f32 %v901_v26, 6.0 }
 0x2ce   :  { %1349 = vst [vmem:[#allocation1 + $0x2] ss:$4 sm:$0xff] %v1060_v29 }
 0x2cf   :  { %1350 = vst [vmem:[#allocation1 + $0x3] ss:$4 sm:$0xff] %v937_v42  ;;  %v1082_v59 = vrot.slane %v944_v35, 2  ;;  %v1084_v51 = vrot.slane %v944_v35, 6 }
 0x2d0   :  { %1380 = vst [vmem:[#allocation1 + $0x20] ss:$4 sm:$0xff] %v1065_v58 }
 0x2d1   :  { %1382 = vst [vmem:[#allocation1 + $0x21] ss:$4 sm:$0xff] %v1066_v33  ;;  %v1083_v33 = vrot.slane %v944_v35, 4 }
 0x2d2   :  { %1384 = vst [vmem:[#allocation1 + $0x22] ss:$4 sm:$0xff] %v939_v17  ;;  %v904_v17 = vmax.f32 %v5411_v46, 0.0  ;;  %v905_v46 = vmax.f32 %v5414_v38, 0.0 }
 0x2d3   :  { %1386 = vst [vmem:[#allocation1 + $0x23] ss:$4 sm:$0xff] %v1067_v10 }
 0x2d6   :  { %v1352_v13 = vld.sshfl [vmem:[#allocation1] sm:$0xff pattern:$0x73625140] }
 0x2d7   :  { %1372 = vst [vmem:[#allocation1] ss:$4 sm:$0xff] %v1062_v37  ;;  %1358 = vrot.lane.b32.xlu2 %v1352_v13, %s4414_s19  ;;  %v947_v37 = vmin.f32 %v904_v17, 6.0  ;;  %s4436_s19 = smov 116  }
 0x2d8   :  { %1374 = vst [vmem:[#allocation1 + $0x1] ss:$4 sm:$0xff] %v1063_v3 }
 0x2d9   :  { %1376 = vst [vmem:[#allocation1 + $0x2] ss:$4 sm:$0xff] %v938_v4  ;;  %v1085_v4 = vrot.slane %v945_v41, 2 }
 0x2da   :  { %1378 = vst [vmem:[#allocation1 + $0x3] ss:$4 sm:$0xff] %v1064_v40  ;;  %v1388_v43 = vld.sshfl [vmem:[#allocation1 + $0x20] sm:$0xff pattern:$0x73625140] }
 0x2db   :  { %1393 = vst [vmem:[#allocation1 + $0x20] ss:$4 sm:$0xff] %v1071_v7  ;;  %1398 = vrot.lane.b32.xlu1 %v1388_v43, %s4415_s20 }
 0x2dd   :  { %v1187_v31 = vpop.permute.xlu0 %1186 }
 0x2de   :  { %1199 = vst.msk [vmem:[#allocation2] sm:$0xff] %vm1198_vm8, %v1187_v31 }
 0x2e1   :  { %v1387_v11 = vld.sshfl [vmem:[#allocation1] sm:$0xff pattern:$0x73625140] }
 0x2e2   :  { %1389 = vst [vmem:[#allocation1] ss:$4 sm:$0xff] %v1068_v12  ;;  %1396 = vrot.lane.b32.xlu0 %v1387_v11, %s4415_s20  ;;  %v1395_v24 = vld.sshfl [vmem:[#allocation1 + $0x20] sm:$0xff pattern:$0x73625140]  ;;  %v906_v12 = vmax.f32 %v5417_v21, 0.0 }
 0x2e3   :  { %1390 = vst [vmem:[#allocation1 + $0x1] ss:$4 sm:$0xff] %v1069_v30 }
 0x2e4   :  { %1391 = vst [vmem:[#allocation1 + $0x2] ss:$4 sm:$0xff] %v940_v53  ;;  %v903_v53 = vmax.f32 %v5408_v6, 0.0  ;;  %v948_v6 = vmin.f32 %v905_v46, 6.0 }
 0x2e5   :  { %1392 = vst [vmem:[#allocation1 + $0x3] ss:$4 sm:$0xff] %v1070_v2  ;;  %v1231_v62 = vpop.permute.xlu2 %1230 }
 0x2e6   :  { %1422 = vst [vmem:[#allocation1 + $0x20] ss:$4 sm:$0xff] %v1075_v47  ;;  %v946_v13 = vmin.f32 %v903_v53, 6.0  ;;  %v1094_v11 = vrot.slane %v948_v6, 2  ;;  %v1096_v2 = vrot.slane %v948_v6, 6  ;;  %v949_v47 = vmin.f32 %v906_v12, 6.0 }
 0x2e7   :  { %1424 = vst [vmem:[#allocation1 + $0x21] ss:$4 sm:$0xff] %v942_v34  ;;  %v1095_v34 = vrot.slane %v948_v6, 4 }
 0x2e8   :  { %1426 = vst [vmem:[#allocation1 + $0x22] ss:$4 sm:$0xff] %v1076_v52  ;;  %v1088_v25 = vrot.slane %v946_v13, 2  ;;  %v1090_v30 = vrot.slane %v946_v13, 6  ;;  %v1098_v26 = vrot.slane %v949_v47, 4 }
 0x2e9   :  { %1428 = vst [vmem:[#allocation1 + $0x23] ss:$4 sm:$0xff] %v1077_v32  ;;  %v1091_v32 = vrot.slane %v947_v37, 2 }
 0x2ea   :  { %v1189_v29 = vpop.permute.xlu0 %1188 }
 0x2eb   :  { %1200 = vst.msk [vmem:[#allocation2 + $0x8] sm:$0xff] %vm1198_vm8, %v1189_v29  ;;  %v912_v29 = vmax.f32 %v5435_v9, 0.0 }
 0x2ec   :  { %v1394_v56 = vld.sshfl [vmem:[#allocation1] sm:$0xff pattern:$0x73625140]  ;;  %1242 = vst.msk [vmem:[#allocation2 + $0x8] sm:$0xff] %vm1240_vm9, %v1231_v62  ;;  %v1099_v62 = vrot.slane %v949_v47, 6 }
 0x2ed   :  { %1400 = vrot.lane.b32.xlu2 %v1394_v56, %s4415_s20  ;;  %1414 = vst [vmem:[#allocation1] ss:$4 sm:$0xff] %v1072_v15  ;;  %v1191_v50 = vpop.permute.xlu1 %1190  ;;  %v1233_v10 = vpop.permute.xlu2 %1232  ;;  %v1093_v56 = vrot.slane %v947_v37, 6 }
 0x2ee   :  { %1416 = vst [vmem:[#allocation1 + $0x1] ss:$4 sm:$0xff] %v941_v22  ;;  %v1089_v22 = vrot.slane %v946_v13, 4 }
 0x2ef   :  { %1418 = vst [vmem:[#allocation1 + $0x2] ss:$4 sm:$0xff] %v1073_v14 }
 0x2f0   :  { %1420 = vst [vmem:[#allocation1 + $0x3] ss:$4 sm:$0xff] %v1074_v27  ;;  %v1430_v42 = vld.sshfl [vmem:[#allocation1 + $0x20] sm:$0xff pattern:$0x73625140] }
 0x2f1   :  { %1440 = vrot.lane.b32.xlu1 %v1430_v42, %s4416_s21  ;;  %1435 = vst [vmem:[#allocation1 + $0x20] ss:$4 sm:$0xff] %v1081_v39  ;;  %v909_v39 = vmax.f32 %v5426_v5, 0.0  ;;  %v910_v5 = vmax.f32 %v5429_v48, 0.0 }
 0x2f2   :  { %1201 = vst.msk [vmem:[#allocation2 + $0x10] sm:$0xff] %vm1198_vm8, %v1191_v50  ;;  %v1193_v40 = vpop.permute.xlu0 %1192  ;;  %vm1492_vm8 = vcmask 367936  }
 0x2f3   :  { %1243 = vst.msk [vmem:[#allocation2 + $0x10] sm:$0xff] %vm1240_vm9, %v1233_v10  ;;  %v5537_v31 = vmin.f32 %v909_v39, 6.0 }
 0x2f4   :  { %1203 = vst.msk [vmem:[#allocation2 + $0x18] sm:$0x3] %vm1202_vm10, %v1193_v40  ;;  %vm1534_vm10 = vcmask 408936  }
 0x2f5   :  { %1402 = vrot.lane.b32.xlu2 %v1395_v24, %s4415_s20  ;;  %v907_v24 = vmax.f32 %v5420_v61, 0.0  ;;  %v908_v61 = vmax.f32 %v5423_v0, 0.0  ;;  %s4437_s20 = smov 38  }
 0x2f7   :  { %v1429_v8 = vld.sshfl [vmem:[#allocation1] sm:$0xff pattern:$0x73625140]  ;;  %v950_v55 = vmin.f32 %v907_v24, 6.0  ;;  %v951_v42 = vmin.f32 %v908_v61, 6.0 }
 0x2f8   :  { %1431 = vst [vmem:[#allocation1] ss:$4 sm:$0xff] %v1078_v36  ;;  %1438 = vrot.lane.b32.xlu0 %v1429_v8, %s4416_s21  ;;  %v1437_v1 = vld.sshfl [vmem:[#allocation1 + $0x20] sm:$0xff pattern:$0x73625140]  ;;  %v1229_v7 = vpop.permute.xlu1 %1228 }
 0x2f9   :  { %1432 = vst [vmem:[#allocation1 + $0x1] ss:$4 sm:$0xff] %v943_v63  ;;  %v1092_v63 = vrot.slane %v947_v37, 4  ;;  %v1100_v14 = vrot.slane %v950_v55, 2  ;;  %v1104_v8 = vrot.slane %v951_v42, 4  ;;  %v1101_v50 = vrot.slane %v950_v55, 4 }
 0x2fa   :  { %1433 = vst [vmem:[#allocation1 + $0x2] ss:$4 sm:$0xff] %v1079_v54  ;;  %v1105_v54 = vrot.slane %v951_v42, 6 }
 0x2fb   :  { %1434 = vst [vmem:[#allocation1 + $0x3] ss:$4 sm:$0xff] %v1080_v23 }
 0x2fc   :  { %1464 = vst [vmem:[#allocation1 + $0x20] ss:$4 sm:$0xff] %v945_v41  ;;  %v1097_v41 = vrot.slane %v949_v47, 2 }
 0x2fd   :  { %1466 = vst [vmem:[#allocation1 + $0x21] ss:$4 sm:$0xff] %v1085_v4 }
 0x2fe   :  { %1468 = vst [vmem:[#allocation1 + $0x22] ss:$4 sm:$0xff] %v1086_v44  ;;  %v5545_v44 = vmin.f32 %v910_v5, 6.0 }
 0x2ff   :  { %1470 = vst [vmem:[#allocation1 + $0x23] ss:$4 sm:$0xff] %v1087_v19  ;;  %v911_v19 = vmax.f32 %v5432_v20, 0.0 }
 0x300   :  { %1444 = vrot.lane.b32.xlu0 %v1437_v1, %s4416_s21  ;;  %1241 = vst.msk [vmem:[#allocation2] sm:$0xff] %vm1240_vm9, %v1229_v7  ;;  %v1106_v1 = vrot.slane %v5537_v31, 2  ;;  %v1110_v48 = vrot.slane %v5545_v44, 4  ;;  %v1108_v7 = vrot.slane %v5537_v31, 6  ;;  %v1111_v12 = vrot.slane %v5545_v44, 6 }
 0x301   :  { %v954_v17 = vmin.f32 %v911_v19, 6.0  ;;  %vm1496_vm9 = vcmask 361792  }
 0x302   :  { %v1436_v58 = vld.sshfl [vmem:[#allocation1] sm:$0xff pattern:$0x73625140] }
 0x303   :  { %1456 = vst [vmem:[#allocation1] ss:$4 sm:$0xff] %v944_v35  ;;  %1442 = vrot.lane.b32.xlu2 %v1436_v58, %s4416_s21  ;;  %v1114_v20 = vrot.slane %v954_v17, 6  ;;  %s4438_s21 = smov 32  }
 0x304   :  { %1458 = vst [vmem:[#allocation1 + $0x1] ss:$4 sm:$0xff] %v1082_v59  ;;  %v1102_v59 = vrot.slane %v950_v55, 6 }
 0x305   :  { %1460 = vst [vmem:[#allocation1 + $0x2] ss:$4 sm:$0xff] %v1083_v33  ;;  %v1275_v43 = vpop.permute.xlu2 %1274  ;;  %v1235_v21 = vpop.permute.xlu1 %1234  ;;  %v5553_v33 = vmin.f32 %v912_v29, 6.0 }
 0x306   :  { %1462 = vst [vmem:[#allocation1 + $0x3] ss:$4 sm:$0xff] %v1084_v51  ;;  %v1472_v3 = vld.sshfl [vmem:[#allocation1 + $0x20] sm:$0xff pattern:$0x73625140]  ;;  %v1103_v51 = vrot.slane %v951_v42, 2 }
 0x307   :  { %1482 = vrot.lane.b32.xlu1 %v1472_v3, %s4417_s22  ;;  %1477 = vst [vmem:[#allocation1 + $0x20] ss:$4 sm:$0xff] %v947_v37  ;;  %v1115_v9 = vrot.slane %v5553_v33, 2  ;;  %v913_v37 = vmax.f32 %v5438_v49, 0.0  ;;  %v1116_v3 = vrot.slane %v5553_v33, 4  ;;  %v1109_v49 = vrot.slane %v5545_v44, 2 }
 0x308   :  { %1285 = vst.msk [vmem:[#allocation2 + $0x10] sm:$0xff] %vm1282_vm11, %v1275_v43 }
 0x309   :  { %1245 = vst.msk [vmem:[#allocation2 + $0x18] sm:$0x3] %vm1244_vm12, %v1235_v21  ;;  %v956_v40 = vmin.f32 %v913_v37, 6.0  ;;  %vm1576_vm12 = vcmask 449936  }
 0x30b   :  { %v1118_v61 = vrot.slane %v956_v40, 2 }
 0x30d   :  { %v1471_v16 = vld.sshfl [vmem:[#allocation1] sm:$0xff pattern:$0x73625140]  ;;  %v1277_v52 = vpop.permute.xlu2 %1276 }
 0x30e   :  { %1473 = vst [vmem:[#allocation1] ss:$4 sm:$0xff] %v946_v13  ;;  %1480 = vrot.lane.b32.xlu0 %v1471_v16, %s4417_s22  ;;  %v1479_v38 = vld.sshfl [vmem:[#allocation1 + $0x20] sm:$0xff pattern:$0x73625140]  ;;  %v1107_v13 = vrot.slane %v5537_v31, 4 }
 0x30f   :  { %1474 = vst [vmem:[#allocation1 + $0x1] ss:$4 sm:$0xff] %v1088_v25  ;;  %1486 = vrot.lane.b32.xlu1 %v1479_v38, %s4417_s22  ;;  %v1120_v25 = vrot.slane %v956_v40, 6  ;;  %v915_v38 = vmax.f32 %v5444_v60, 0.0 }
 0x310   :  { %1475 = vst [vmem:[#allocation1 + $0x2] ss:$4 sm:$0xff] %v1089_v22  ;;  %v1273_v57 = vpop.permute.xlu1 %1272 }
 0x311   :  { %1476 = vst [vmem:[#allocation1 + $0x3] ss:$4 sm:$0xff] %v1090_v30  ;;  %v958_v30 = vmin.f32 %v915_v38, 6.0 }
 0x312   :  { %1506 = vst [vmem:[#allocation1 + $0x20] ss:$4 sm:$0xff] %v1094_v11  ;;  %v1271_v36 = vpop.permute.xlu0 %1270 }
 0x313   :  { %1508 = vst [vmem:[#allocation1 + $0x21] ss:$4 sm:$0xff] %v1095_v34  ;;  %v1112_v34 = vrot.slane %v954_v17, 2  ;;  %v1125_v60 = vrot.slane %v958_v30, 4 }
 0x314   :  { %1510 = vst [vmem:[#allocation1 + $0x22] ss:$4 sm:$0xff] %v1096_v2  ;;  %v1113_v2 = vrot.slane %v954_v17, 4 }
 0x315   :  { %1512 = vst [vmem:[#allocation1 + $0x23] ss:$4 sm:$0xff] %v949_v47  ;;  %v1124_v47 = vrot.slane %v958_v30, 2 }
 0x316   :  { %1287 = vst.msk [vmem:[#allocation2 + $0x18] sm:$0x3] %vm1286_vm13, %v1277_v52  ;;  %v1126_v52 = vrot.slane %v958_v30, 6  ;;  %vm1618_vm13 = vcmask 490936  }
 0x317   :  { %1284 = vst.msk [vmem:[#allocation2 + $0x8] sm:$0xff] %vm1282_vm11, %v1273_v57 }
 0x318   :  { %v1478_v15 = vld.sshfl [vmem:[#allocation1] sm:$0xff pattern:$0x73625140]  ;;  %1283 = vst.msk [vmem:[#allocation2] sm:$0xff] %vm1282_vm11, %v1271_v36  ;;  %vm1538_vm11 = vcmask 402792  }
 0x319   :  { %1498 = vst [vmem:[#allocation1] ss:$4 sm:$0xff] %v1091_v32  ;;  %1484 = vrot.lane.b32.xlu2 %v1478_v15, %s4417_s22  ;;  %v1117_v15 = vrot.slane %v5553_v33, 6  ;;  %s4440_s22 = smov 110  }
 0x31a   :  { %1500 = vst [vmem:[#allocation1 + $0x1] ss:$4 sm:$0xff] %v1092_v63  ;;  %v917_v63 = vmax.f32 %v5235_v45, 0.0 }
 0x31b   :  { %1502 = vst [vmem:[#allocation1 + $0x2] ss:$4 sm:$0xff] %v1093_v56  ;;  %v1317_v4 = vpop.permute.xlu2 %1316 }
 0x31c   :  { %1504 = vst [vmem:[#allocation1 + $0x3] ss:$4 sm:$0xff] %v948_v6  ;;  %v1514_v27 = vld.sshfl [vmem:[#allocation1 + $0x20] sm:$0xff pattern:$0x73625140]  ;;  %v960_v39 = vmin.f32 %v917_v63, 6.0 }
 0x31d   :  { %1519 = vst [vmem:[#allocation1 + $0x20] ss:$4 sm:$0xff] %v1100_v14  ;;  %1524 = vrot.lane.b32.xlu1 %v1514_v27, %s4418_s1  ;;  %v1119_v14 = vrot.slane %v956_v40, 4 }
 0x31e   :  { %1327 = vst.msk [vmem:[#allocation2 + $0x10] sm:$0xff] %vm1324_vm14, %v1317_v4 }
 0x323   :  { %v1513_v0 = vld.sshfl [vmem:[#allocation1] sm:$0xff pattern:$0x73625140]  ;;  %v1315_v46 = vpop.permute.xlu1 %1314 }
 0x324   :  { %v1521_v23 = vld.sshfl [vmem:[#allocation1 + $0x20] sm:$0xff pattern:$0x73625140]  ;;  %1522 = vrot.lane.b32.xlu0 %v1513_v0, %s4418_s1  ;;  %1515 = vst [vmem:[#allocation1] ss:$4 sm:$0xff] %v1097_v41 }
 0x325   :  { %1548 = vst [vmem:[#allocation1 + $0x20] ss:$4 sm:$0xff] %v1104_v8 }
 0x326   :  { %1550 = vst [vmem:[#allocation1 + $0x21] ss:$4 sm:$0xff] %v1105_v54 }
 0x327   :  { %1552 = vst [vmem:[#allocation1 + $0x22] ss:$4 sm:$0xff] %v5537_v31 }
 0x328   :  { %1554 = vst [vmem:[#allocation1 + $0x23] ss:$4 sm:$0xff] %v1106_v1  ;;  %v1313_v53 = vpop.permute.xlu0 %1312 }
 0x329   :  { %1516 = vst [vmem:[#allocation1 + $0x1] ss:$4 sm:$0xff] %v1098_v26 }
 0x32a   :  { %1517 = vst [vmem:[#allocation1 + $0x2] ss:$4 sm:$0xff] %v1099_v62 }
 0x32b   :  { %1518 = vst [vmem:[#allocation1 + $0x3] ss:$4 sm:$0xff] %v950_v55 }
 0x32c   :  { %1326 = vst.msk [vmem:[#allocation2 + $0x8] sm:$0xff] %vm1324_vm14, %v1315_v46 }
 0x32d   :  { %1325 = vst.msk [vmem:[#allocation2] sm:$0xff] %vm1324_vm14, %v1313_v53  ;;  %vm1580_vm14 = vcmask 443792  }
 0x32f   :  { %v1556_v35 = vld.sshfl [vmem:[#allocation1 + $0x20] sm:$0xff pattern:$0x73625140] }
 0x330   :  { %1566 = vrot.lane.b32.xlu1 %v1556_v35, %s4419_s23  ;;  %1561 = vst [vmem:[#allocation1 + $0x20] ss:$4 sm:$0xff] %v1110_v48  ;;  %v1319_v22 = vpop.permute.xlu0 %1318 }
 0x331   :  { %v1359_v43 = vpop.permute.xlu2 %1358  ;;  %1329 = vst.msk [vmem:[#allocation2 + $0x18] sm:$0x3] %vm1328_vm2, %v1319_v22  ;;  %vm1660_vm2 = vcmask 531936  }
 0x332   :  { %v1520_v58 = vld.sshfl [vmem:[#allocation1] sm:$0xff pattern:$0x73625140]  ;;  %1369 = vst.msk [vmem:[#allocation2 + $0x10] sm:$0xff] %vm1366_vm15, %v1359_v43 }
 0x333   :  { %1526 = vrot.lane.b32.xlu2 %v1520_v58, %s4418_s1  ;;  %1540 = vst [vmem:[#allocation1] ss:$4 sm:$0xff] %v1101_v50 }
 0x334   :  { %1542 = vst [vmem:[#allocation1 + $0x1] ss:$4 sm:$0xff] %v1102_v59 }
 0x335   :  { %1544 = vst [vmem:[#allocation1 + $0x2] ss:$4 sm:$0xff] %v951_v42  ;;  %v914_v42 = vmax.f32 %v5441_v28, 0.0 }
 0x336   :  { %1546 = vst [vmem:[#allocation1 + $0x3] ss:$4 sm:$0xff] %v1103_v51 }
 0x337   :  { %v1563_v10 = vld.sshfl [vmem:[#allocation1 + $0x20] sm:$0xff pattern:$0x73625140]  ;;  %v1357_v21 = vpop.permute.xlu1 %1356  ;;  %v957_v36 = vmin.f32 %v914_v42, 6.0 }
 0x338   :  { %1590 = vst [vmem:[#allocation1 + $0x20] ss:$4 sm:$0xff] %v1114_v20 }
 0x339   :  { %1592 = vst [vmem:[#allocation1 + $0x21] ss:$4 sm:$0xff] %v5553_v33  ;;  %v1121_v41 = vrot.slane %v957_v36, 2  ;;  %v1122_v0 = vrot.slane %v957_v36, 4  ;;  %v1123_v28 = vrot.slane %v957_v36, 6 }
 0x33a   :  { %1594 = vst [vmem:[#allocation1 + $0x22] ss:$4 sm:$0xff] %v1115_v9 }
 0x33b   :  { %1528 = vrot.lane.b32.xlu2 %v1521_v23, %s4418_s1  ;;  %1596 = vst [vmem:[#allocation1 + $0x23] ss:$4 sm:$0xff] %v1116_v3  ;;  %v916_v23 = vmax.f32 %v5447_v18, 0.0  ;;  %s4441_s1 = smov 82  }
 0x33c   :  { %1368 = vst.msk [vmem:[#allocation2 + $0x8] sm:$0xff] %vm1366_vm15, %v1357_v21 }
 0x33d   :  { %v1555_v6 = vld.sshfl [vmem:[#allocation1] sm:$0xff pattern:$0x73625140]  ;;  %v959_v1 = vmin.f32 %v916_v23, 6.0 }
 0x33e   :  { %1564 = vrot.lane.b32.xlu0 %v1555_v6, %s4419_s23  ;;  %1557 = vst [vmem:[#allocation1] ss:$4 sm:$0xff] %v1107_v13  ;;  %v1355_v32 = vpop.permute.xlu0 %1354 }
 0x33f   :  { %1558 = vst [vmem:[#allocation1 + $0x1] ss:$4 sm:$0xff] %v1108_v7  ;;  %v1361_v27 = vpop.permute.xlu1 %1360  ;;  %v1127_v62 = vrot.slane %v959_v1, 2  ;;  %v1129_v18 = vrot.slane %v959_v1, 6 }
 0x340   :  { %1559 = vst [vmem:[#allocation1 + $0x2] ss:$4 sm:$0xff] %v5545_v44  ;;  %v1128_v44 = vrot.slane %v959_v1, 4 }
 0x341   :  { %1560 = vst [vmem:[#allocation1 + $0x3] ss:$4 sm:$0xff] %v1109_v49 }
 0x342   :  { %v1598_v16 = vld.sshfl [vmem:[#allocation1 + $0x20] sm:$0xff pattern:$0x73625140]  ;;  %1367 = vst.msk [vmem:[#allocation2] sm:$0xff] %vm1366_vm15, %v1355_v32  ;;  %vm1622_vm15 = vcmask 484792  }
 0x343   :  { %1608 = vrot.lane.b32.xlu1 %v1598_v16, %s4420_s24  ;;  %1603 = vst [vmem:[#allocation1 + $0x20] ss:$4 sm:$0xff] %v1120_v25 }
 0x344   :  { %1371 = vst.msk [vmem:[#allocation2 + $0x18] sm:$0x3] %vm1370_vm4, %v1361_v27  ;;  %vm1664_vm4 = vcmask 525792  }
 0x346   :  { %1570 = vrot.lane.b32.xlu0 %v1563_v10, %s4419_s23 }
 0x347   :  { %v1401_v55 = vpop.permute.xlu2 %1400 }
 0x348   :  { %v1562_v11 = vld.sshfl [vmem:[#allocation1] sm:$0xff pattern:$0x73625140]  ;;  %1411 = vst.msk [vmem:[#allocation2 + $0x10] sm:$0xff] %vm1408_vm3, %v1401_v55 }
 0x349   :  { %1568 = vrot.lane.b32.xlu2 %v1562_v11, %s4419_s23  ;;  %1582 = vst [vmem:[#allocation1] ss:$4 sm:$0xff] %v1111_v12 }
 0x34a   :  { %1584 = vst [vmem:[#allocation1 + $0x1] ss:$4 sm:$0xff] %v954_v17  ;;  %v1605_v24 = vld.sshfl [vmem:[#allocation1 + $0x20] sm:$0xff pattern:$0x73625140] }
 0x34b   :  { %1586 = vst [vmem:[#allocation1 + $0x2] ss:$4 sm:$0xff] %v1112_v34  ;;  %1612 = vrot.lane.b32.xlu1 %v1605_v24, %s4420_s24 }
 0x34c   :  { %1588 = vst [vmem:[#allocation1 + $0x3] ss:$4 sm:$0xff] %v1113_v2 }
 0x34d   :  { %1632 = vst [vmem:[#allocation1 + $0x20] ss:$4 sm:$0xff] %v958_v30  ;;  %v1399_v31 = vpop.permute.xlu1 %1398 }
 0x34e   :  { %1634 = vst [vmem:[#allocation1 + $0x21] ss:$4 sm:$0xff] %v1124_v47 }
 0x34f   :  { %1636 = vst [vmem:[#allocation1 + $0x22] ss:$4 sm:$0xff] %v1125_v60  ;;  %v1403_v57 = vpop.permute.xlu2 %1402 }
 0x350   :  { %1638 = vst [vmem:[#allocation1 + $0x23] ss:$4 sm:$0xff] %v1126_v52 }
 0x351   :  { %1413 = vst.msk [vmem:[#allocation2 + $0x18] sm:$0x3] %vm1412_vm5, %v1403_v57  ;;  %vm1995_vm5 = vcmask 1043456  }
 0x352   :  { %1410 = vst.msk [vmem:[#allocation2 + $0x8] sm:$0xff] %vm1408_vm3, %v1399_v31 }
 0x353   :  { %v1597_v56 = vld.sshfl [vmem:[#allocation1] sm:$0xff pattern:$0x73625140] }
 0x354   :  { %1606 = vrot.lane.b32.xlu0 %v1597_v56, %s4420_s24  ;;  %1599 = vst [vmem:[#allocation1] ss:$4 sm:$0xff] %v1117_v15  ;;  %v1397_v54 = vpop.permute.xlu0 %1396 }
 0x355   :  { %1600 = vst [vmem:[#allocation1 + $0x1] ss:$4 sm:$0xff] %v956_v40 }
 0x356   :  { %1601 = vst [vmem:[#allocation1 + $0x2] ss:$4 sm:$0xff] %v1118_v61 }
 0x357   :  { %1602 = vst [vmem:[#allocation1 + $0x3] ss:$4 sm:$0xff] %v1119_v14  ;;  %v1640_v45 = vld.sshfl [vmem:[#allocation1 + $0x20] sm:$0xff pattern:$0x73625140] }
 0x358   :  { %1650 = vrot.lane.b32.xlu1 %v1640_v45, %s4421_s25  ;;  %1645 = vst [vmem:[#allocation1 + $0x20] ss:$4 sm:$0xff] %v960_v39 }
 0x359   :  { %1409 = vst.msk [vmem:[#allocation2] sm:$0xff] %vm1408_vm3, %v1397_v54  ;;  %vm1667_vm3 = vcmask 200704  }
 0x35d   :  { %v1443_v5 = vpop.permute.xlu2 %1442 }
 0x35e   :  { %v1604_v8 = vld.sshfl [vmem:[#allocation1] sm:$0xff pattern:$0x73625140]  ;;  %1453 = vst.msk [vmem:[#allocation2 + $0x10] sm:$0xff] %vm1450_vm6, %v1443_v5 }
 0x35f   :  { %1610 = vrot.lane.b32.xlu2 %v1604_v8, %s4420_s24  ;;  %1624 = vst [vmem:[#allocation1] ss:$4 sm:$0xff] %v957_v36  ;;  %v1647_v17 = vld.sshfl [vmem:[#allocation1 + $0x20] sm:$0xff pattern:$0x73625140] }
 0x360   :  { %1626 = vst [vmem:[#allocation1 + $0x1] ss:$4 sm:$0xff] %v1121_v41 }
 0x361   :  { %1628 = vst [vmem:[#allocation1 + $0x2] ss:$4 sm:$0xff] %v1122_v0 }
 0x362   :  { %1630 = vst [vmem:[#allocation1 + $0x3] ss:$4 sm:$0xff] %v1123_v28 }
 0x363   :  { %v1441_v26 = vpop.permute.xlu1 %1440 }
 0x364   :  { %1452 = vst.msk [vmem:[#allocation2 + $0x8] sm:$0xff] %vm1450_vm6, %v1441_v26 }
 0x369   :  { %v1639_v4 = vld.sshfl [vmem:[#allocation1] sm:$0xff pattern:$0x73625140] }
 0x36a   :  { %1648 = vrot.lane.b32.xlu0 %v1639_v4, %s4421_s25  ;;  %1641 = vst [vmem:[#allocation1] ss:$4 sm:$0xff] %v959_v1  ;;  %v1439_v19 = vpop.permute.xlu0 %1438 }
 0x36b   :  { %1642 = vst [vmem:[#allocation1 + $0x1] ss:$4 sm:$0xff] %v1127_v62 }
 0x36c   :  { %1643 = vst [vmem:[#allocation1 + $0x2] ss:$4 sm:$0xff] %v1128_v44 }
 0x36d   :  { %1644 = vst [vmem:[#allocation1 + $0x3] ss:$4 sm:$0xff] %v1129_v18 }
 0x36e   :  { %1451 = vst.msk [vmem:[#allocation2] sm:$0xff] %vm1450_vm6, %v1439_v19  ;;  %vm1996_vm6 = vcmask 1044480  }
 0x372   :  { %v1445_v48 = vpop.permute.xlu0 %1444 }
 0x373   :  { %v1485_v35 = vpop.permute.xlu2 %1484  ;;  %1455 = vst.msk [vmem:[#allocation2 + $0x18] sm:$0x3] %vm1454_vm7, %v1445_v48  ;;  %vm1982_vm7 = vcmask 203776  }
 0x374   :  { %v1646_v29 = vld.sshfl [vmem:[#allocation1] sm:$0xff pattern:$0x73625140]  ;;  %1495 = vst.msk [vmem:[#allocation2 + $0x10] sm:$0xff] %vm1492_vm8, %v1485_v35 }
 0x375   :  { %1652 = vrot.lane.b32.xlu2 %v1646_v29, %s4421_s25 }
 0x379   :  { %v1483_v50 = vpop.permute.xlu1 %1482 }
 0x37a   :  { %1494 = vst.msk [vmem:[#allocation2 + $0x8] sm:$0xff] %vm1492_vm8, %v1483_v50 }
 0x37d   :  { %1654 = vrot.lane.b32.xlu2 %v1647_v17, %s4421_s25 }
 0x380   :  { %v1481_v59 = vpop.permute.xlu0 %1480 }
 0x381   :  { %1493 = vst.msk [vmem:[#allocation2] sm:$0xff] %vm1492_vm8, %v1481_v59  ;;  %v1487_v58 = vpop.permute.xlu1 %1486  ;;  %vm2349_vm8 = vcmask 408576  }
 0x382   :  { %1497 = vst.msk [vmem:[#allocation2 + $0x18] sm:$0x3] %vm1496_vm9, %v1487_v58  ;;  %vm2361_vm9 = vcmask 402432  }
 0x38d   :  { %v1527_v33 = vpop.permute.xlu2 %1526 }
 0x38e   :  { %1537 = vst.msk [vmem:[#allocation2 + $0x10] sm:$0xff] %vm1534_vm10, %v1527_v33 }
 0x38f   :  { %v1525_v51 = vpop.permute.xlu1 %1524 }
 0x390   :  { %1536 = vst.msk [vmem:[#allocation2 + $0x8] sm:$0xff] %vm1534_vm10, %v1525_v51 }
 0x395   :  { %v1529_v20 = vpop.permute.xlu2 %1528 }
 0x396   :  { %1539 = vst.msk [vmem:[#allocation2 + $0x18] sm:$0x3] %vm1538_vm11, %v1529_v20  ;;  %v1523_v10 = vpop.permute.xlu0 %1522 }
 0x397   :  { %1535 = vst.msk [vmem:[#allocation2] sm:$0xff] %vm1534_vm10, %v1523_v10 }
 0x3a2   :  { %v1567_v9 = vpop.permute.xlu1 %1566 }
 0x3a3   :  { %v1569_v53 = vpop.permute.xlu2 %1568  ;;  %1578 = vst.msk [vmem:[#allocation2 + $0x8] sm:$0xff] %vm1576_vm12, %v1567_v9 }
 0x3a4   :  { %1579 = vst.msk [vmem:[#allocation2 + $0x10] sm:$0xff] %vm1576_vm12, %v1569_v53 }
 0x3b0   :  { %v1565_v37 = vpop.permute.xlu0 %1564 }
 0x3b1   :  { %1577 = vst.msk [vmem:[#allocation2] sm:$0xff] %vm1576_vm12, %v1565_v37 }
 0x3b5   :  { %v1609_v3 = vpop.permute.xlu1 %1608 }
 0x3b6   :  { %1620 = vst.msk [vmem:[#allocation2 + $0x8] sm:$0xff] %vm1618_vm13, %v1609_v3 }
 0x3b8   :  { %v1571_v46 = vpop.permute.xlu0 %1570 }
 0x3b9   :  { %v1611_v13 = vpop.permute.xlu2 %1610  ;;  %1581 = vst.msk [vmem:[#allocation2 + $0x18] sm:$0x3] %vm1580_vm14, %v1571_v46  ;;  %vm2472_vm14 = vcmask 812432  }
 0x3ba   :  { %1621 = vst.msk [vmem:[#allocation2 + $0x10] sm:$0xff] %vm1618_vm13, %v1611_v13 }
 0x3bd   :  { %v1613_v40 = vpop.permute.xlu1 %1612 }
 0x3be   :  { %1623 = vst.msk [vmem:[#allocation2 + $0x18] sm:$0x3] %vm1622_vm15, %v1613_v40  ;;  %vm2482_vm15 = vcmask 1042208  }
 0x3c6   :  { %v1607_v7 = vpop.permute.xlu0 %1606 }
 0x3c7   :  { %1619 = vst.msk [vmem:[#allocation2] sm:$0xff] %vm1618_vm13, %v1607_v7 }
 0x3ca   :  { %v1651_v6 = vpop.permute.xlu1 %1650 }
 0x3cb   :  { %1662 = vst.msk [vmem:[#allocation2 + $0x8] sm:$0xff] %vm1660_vm2, %v1651_v6 }
 0x3cf   :  { %v1653_v49 = vpop.permute.xlu2 %1652 }
 0x3d0   :  { %1663 = vst.msk [vmem:[#allocation2 + $0x10] sm:$0xff] %vm1660_vm2, %v1653_v49 }
 0x3d2   :  { %v1771_v43 = vld [vmem:[#allocation2 + $0x8] sm:$0x1f] }
 0x3d3   :  { %1772 = vst.msk [vmem:[#allocation3 + $0xc8] sm:$0x1f] %vm1667_vm3, %v1771_v43  ;;  %v1773_v36 = vld [vmem:[#allocation2 + $0x8] sm:$0x1f] }
 0x3d4   :  { %v1779_v41 = vld [vmem:[#allocation2 + $0x8] sm:$0x1f] }
 0x3d5   :  { %v1785_v0 = vld [vmem:[#allocation2 + $0x8] sm:$0x1f] }
 0x3d6   :  { %v1791_v33 = vld [vmem:[#allocation2 + $0x8] sm:$0x1f] }
 0x3d7   :  { %v1849_v25 = vld [vmem:[#allocation2 + $0x11] sm:$0x1f]  ;;  %v1655_v22 = vpop.permute.xlu2 %1654 }
 0x3d8   :  { %v1875_v16 = vld [vmem:[#allocation2 + $0x13] sm:$0x1f]  ;;  %1850 = vst.msk [vmem:[#allocation3 + $0x69] sm:$0x1f] %vm1667_vm3, %v1849_v25  ;;  %v1797_v38 = vld [vmem:[#allocation2 + $0xd] sm:$0x1f] }
 0x3d9   :  { %1876 = vst.msk [vmem:[#allocation3 + $0x9b] sm:$0x1f] %vm1667_vm3, %v1875_v16  ;;  %v1823_v12 = vld [vmem:[#allocation2 + $0xf] sm:$0x1f] }
 0x3da   :  { %1665 = vst.msk [vmem:[#allocation2 + $0x18] sm:$0x3] %vm1664_vm4, %v1655_v22  ;;  %v1805_v8 = vld [vmem:[#allocation2 + $0xd] sm:$0x1f]  ;;  %v1877_v18 = vld [vmem:[#allocation2 + $0x13] sm:$0x1f] }
 0x3db   :  { %1798 = vst.msk [vmem:[#allocation3 + $0x5] sm:$0x1f] %vm1667_vm3, %v1797_v38  ;;  %v1811_v28 = vld [vmem:[#allocation2 + $0xd] sm:$0x1f]  ;;  %v1883_v48 = vld [vmem:[#allocation2 + $0x13] sm:$0x1f] }
 0x3dc   :  { %1824 = vst.msk [vmem:[#allocation3 + $0x37] sm:$0x1f] %vm1667_vm3, %v1823_v12  ;;  %v1649_v30 = vpop.permute.xlu0 %1648  ;;  %v1825_v54 = vld [vmem:[#allocation2 + $0xf] sm:$0x1f]  ;;  %vm2492_vm4 = vcmask 582832  }
 0x3dd   :  { %1661 = vst.msk [vmem:[#allocation2] sm:$0xff] %vm1660_vm2, %v1649_v30  ;;  %v1831_v23 = vld [vmem:[#allocation2 + $0xf] sm:$0x1f]  ;;  %vm2483_vm2 = vcmask 175106  }
 0x3de   :  { %v1799_v5 = vld [vmem:[#allocation2 + $0xd] sm:$0x1f]  ;;  %v1895_v29 = vld [vmem:[#allocation2 + $0x13] sm:$0x1f] }
 0x3df   :  { %v1843_v1 = vld [vmem:[#allocation2 + $0xf] sm:$0x1f] }
 0x3e0   :  { %v1851_v26 = vld [vmem:[#allocation2 + $0x11] sm:$0x1f] }
 0x3e1   :  { %v1901_v11 = vld [vmem:[#allocation2 + $0x15] sm:$0x1f]  ;;  %v1817_v62 = vld [vmem:[#allocation2 + $0xd] sm:$0x1f] }
 0x3e2   :  { %1902 = vst.msk [vmem:[#allocation3 + $0xcd] sm:$0x1f] %vm1667_vm3, %v1901_v11  ;;  %v1863_v4 = vld [vmem:[#allocation2 + $0x11] sm:$0x1f] }
 0x3e3   :  { %v1869_v44 = vld [vmem:[#allocation2 + $0x11] sm:$0x1f] }
 0x3e4   :  { %v1666_v34 = vld [vmem:[#allocation2] sm:$0x1f]  ;;  %v1745_v47 = vld [vmem:[#allocation2 + $0x6] sm:$0x1f]  ;;  %v1837_v19 = vld [vmem:[#allocation2 + $0xf] sm:$0x1f] }
 0x3e5   :  { %v1693_v2 = vld [vmem:[#allocation2 + $0x2] sm:$0x1f]  ;;  %1668 = vst.msk [vmem:[#allocation3] sm:$0x1f] %vm1667_vm3, %v1666_v34  ;;  %v1857_v35 = vld [vmem:[#allocation2 + $0x11] sm:$0x1f] }
 0x3e6   :  { %v1719_v24 = vld [vmem:[#allocation2 + $0x4] sm:$0x1f]  ;;  %1694 = vst.msk [vmem:[#allocation3 + $0x32] sm:$0x1f] %vm1667_vm3, %v1693_v2  ;;  %v1903_v50 = vld [vmem:[#allocation2 + $0x15] sm:$0x1f] }
 0x3e7   :  { %v1675_v60 = vld [vmem:[#allocation2] sm:$0x1f]  ;;  %1720 = vst.msk [vmem:[#allocation3 + $0x64] sm:$0x1f] %vm1667_vm3, %v1719_v24  ;;  %v1753_v42 = vld [vmem:[#allocation2 + $0x6] sm:$0x1f] }
 0x3e8   :  { %1677 = vrot.lane.b32.xlu1 %v1675_v60, %s4422_s26  ;;  %v1669_v21 = vld [vmem:[#allocation2] sm:$0x1f]  ;;  %1746 = vst.msk [vmem:[#allocation3 + $0x96] sm:$0x1f] %vm1667_vm3, %v1745_v47  ;;  %v1747_v45 = vld [vmem:[#allocation2 + $0x6] sm:$0x1f] }
 0x3e9   :  { %v1681_v52 = vld [vmem:[#allocation2] sm:$0x1f]  ;;  %1671 = vrot.lane.b32.xlu0 %v1669_v21, %s4423_s27  ;;  %v1759_v57 = vld [vmem:[#allocation2 + $0x6] sm:$0x1f]  ;;  %v1889_v17 = vld [vmem:[#allocation2 + $0x13] sm:$0x1f] }
 0x3ea   :  { %1683 = vrot.lane.b32.xlu2 %v1681_v52, %s4424_s0  ;;  %v1695_v55 = vld [vmem:[#allocation2 + $0x2] sm:$0x1f]  ;;  %v1915_v58 = vld [vmem:[#allocation2 + $0x15] sm:$0x1f]  ;;  %v3784_v30 = vld [vmem:[%s6097_s5 + $0x18] sm:$0xf] }
 0x3eb   :  { %v1687_v32 = vld [vmem:[#allocation2] sm:$0x1f]  ;;  %v1765_v31 = vld [vmem:[#allocation2 + $0x6] sm:$0x1f]  ;;  %v1909_v51 = vld [vmem:[#allocation2 + $0x15] sm:$0x1f] }
 0x3ec   :  { %v1701_v63 = vld [vmem:[#allocation2 + $0x2] sm:$0x1f]  ;;  %v1921_v10 = vld [vmem:[#allocation2 + $0x15] sm:$0x1f]  ;;  %v4218_v11 = vld [vmem:[%s6097_s5 + $0x18] sm:$0x10] }
 0x3ed   :  { %v1713_v15 = vld [vmem:[#allocation2 + $0x2] sm:$0x1f]  ;;  %v3785_v34 = vor.u32 %v4218_v11, %v3784_v30  ;;  %v4426_v2 = vmov 65535   ;;  %v4222_v30 = vld [vmem:[%s6097_s5 + $0x38] sm:$0x10] }
 0x3ee   :  { %v1707_v56 = vld [vmem:[#allocation2 + $0x2] sm:$0x1f]  ;;  %v1997_v24 = vsel %vm1995_vm5, 4294967295, %v4426_v2  ;;  %v4221_v2 = vld [vmem:[%s6097_s5 + $0x30] sm:$0xff]  ;;  %vm2498_vm5 = vcmask 992832  }
 0x3ef   :  { %v1721_v61 = vld [vmem:[#allocation2 + $0x4] sm:$0x1f]  ;;  %v5669_v47 = vsel %vm1996_vm6, %v1997_v24, 0  ;;  %vm2509_vm6 = vcmask 1042384  }
 0x3f0   :  { %1697 = vrot.lane.b32.xlu1 %v1695_v55, %s4423_s27  ;;  %v1733_v14 = vld [vmem:[#allocation2 + $0x4] sm:$0x1f]  ;;  %v2000_v60 = vand.u32 %v3785_v34, %v5669_v47 }
 0x3f1   :  { %1689 = vrot.lane.b32.xlu0 %v1687_v32, %s4425_s28  ;;  %v1727_v27 = vld [vmem:[#allocation2 + $0x4] sm:$0x1f] }
 0x3f2   :  { %1703 = vrot.lane.b32.xlu2 %v1701_v63, %s4422_s26  ;;  %v1739_v39 = vld [vmem:[#allocation2 + $0x4] sm:$0x1f]  ;;  %2008 = vmatpush.bf16.msra.mxu1 %v2000_v60  ;;  %v3796_v63 = vld [vmem:[%s6097_s5 + $0x8] sm:$0xf] }
 0x3f3   :  { %v4217_v32 = vld [vmem:[%s6097_s5 + $0x10] sm:$0xff] }
 0x3f6   :  { %2009 = vmatpush.bf16.msra.mxu1 %v4217_v32 }
 0x3f8   :  { %1715 = vrot.lane.b32.xlu1 %v1713_v15, %s4425_s28  ;;  %v4216_v15 = vld [vmem:[%s6097_s5 + $0x8] sm:$0x10] }
 0x3f9   :  { %1709 = vrot.lane.b32.xlu0 %v1707_v56, %s4424_s0  ;;  %v3797_v56 = vor.u32 %v4216_v15, %v3796_v63 }
 0x3fa   :  { %1723 = vrot.lane.b32.xlu2 %v1721_v61, %s4423_s27 }
 0x400   :  { %1735 = vrot.lane.b32.xlu1 %v1733_v14, %s4424_s0  ;;  %v2054_v14 = vand.u32 %v3797_v56, %v5669_v47 }
 0x401   :  { %1729 = vrot.lane.b32.xlu0 %v1727_v27, %s4422_s26 }
 0x402   :  { %1741 = vrot.lane.b32.xlu2 %v1739_v39, %s4425_s28  ;;  %2062 = vmatpush.bf16.msrb.mxu1 %v2054_v14 }
 0x403   :  { %4316 = vmatpush.bf16.msra.mxu3 %v2054_v14 }
 0x408   :  { %1755 = vrot.lane.b32.xlu1 %v1753_v42, %s4422_s26  ;;  %v4215_v42 = vld [vmem:[%s6097_s5] sm:$0xff] }
 0x409   :  { %1749 = vrot.lane.b32.xlu0 %v1747_v45, %s4423_s27  ;;  %4317 = vmatpush.bf16.msra.mxu3 %v4215_v42 }
 0x40a   :  { %1761 = vrot.lane.b32.xlu2 %v1759_v57, %s4424_s0  ;;  %2063 = vmatpush.bf16.msrb.mxu1 %v4215_v42 }
 0x410   :  { %1775 = vrot.lane.b32.xlu1 %v1773_v36, %s4423_s27 }
 0x411   :  { %1767 = vrot.lane.b32.xlu0 %v1765_v31, %s4425_s28 }
 0x412   :  { %1781 = vrot.lane.b32.xlu2 %v1779_v41, %s4422_s26 }
 0x418   :  { %1807 = vrot.lane.b32.xlu1 %v1805_v8, %s4422_s26 }
 0x419   :  { %1787 = vrot.lane.b32.xlu0 %v1785_v0, %s4424_s0  ;;  %v3844_v0 = vld [vmem:[%s6097_s5 + $0x48] sm:$0xf] }
 0x41a   :  { %1813 = vrot.lane.b32.xlu2 %v1811_v28, %s4424_s0  ;;  %v4224_v28 = vld [vmem:[%s6097_s5 + $0x48] sm:$0x10] }
 0x420   :  { %1827 = vrot.lane.b32.xlu1 %v1825_v54, %s4423_s27  ;;  %v3845_v54 = vor.u32 %v4224_v28, %v3844_v0 }
 0x421   :  { %1801 = vrot.lane.b32.xlu0 %v1799_v5, %s4423_s27 }
 0x422   :  { %1833 = vrot.lane.b32.xlu2 %v1831_v23, %s4422_s26  ;;  %v5704_v23 = vand.u32 %v3845_v54, %v5669_v47 }
 0x424   :  { %4318 = vmatpush.bf16.msrb.mxu2 %v5704_v23 }
 0x428   :  { %1845 = vrot.lane.b32.xlu1 %v1843_v1, %s4425_s28  ;;  %v5710_v1 = vld [vmem:[%s6097_s5 + $0x40] sm:$0xff] }
 0x429   :  { %1819 = vrot.lane.b32.xlu0 %v1817_v62, %s4425_s28  ;;  %4319 = vmatpush.bf16.msrb.mxu2 %v5710_v1 }
 0x42a   :  { %1853 = vrot.lane.b32.xlu2 %v1851_v26, %s4423_s27 }
 0x430   :  { %1865 = vrot.lane.b32.xlu1 %v1863_v4, %s4424_s0 }
 0x431   :  { %1839 = vrot.lane.b32.xlu0 %v1837_v19, %s4424_s0 }
 0x432   :  { %1871 = vrot.lane.b32.xlu2 %v1869_v44, %s4425_s28 }
 0x438   :  { %1879 = vrot.lane.b32.xlu1 %v1877_v18, %s4423_s27 }
 0x439   :  { %1859 = vrot.lane.b32.xlu0 %v1857_v35, %s4422_s26 }
 0x43a   :  { %1885 = vrot.lane.b32.xlu2 %v1883_v48, %s4422_s26 }
 0x440   :  { %1897 = vrot.lane.b32.xlu1 %v1895_v29, %s4425_s28 }
 0x441   :  { %1891 = vrot.lane.b32.xlu0 %v1889_v17, %s4424_s0 }
 0x442   :  { %1905 = vrot.lane.b32.xlu2 %v1903_v50, %s4423_s27  ;;  %s4443_s27 = smov 54  }
 0x444   :  { %v1684_v59 = vpop.permute.xlu2 %1683 }
 0x445   :  { %1686 = vst.msk [vmem:[#allocation3 + $0x1e] sm:$0x1f] %vm1667_vm3, %v1684_v59 }
 0x448   :  { %1917 = vrot.lane.b32.xlu1 %v1915_v58, %s4424_s0  ;;  %s4447_s0 = smov 48  }
 0x449   :  { %1911 = vrot.lane.b32.xlu0 %v1909_v51, %s4422_s26  ;;  %s4445_s26 = smov 76  }
 0x44a   :  { %1793 = vrot.lane.b32.xlu2 %v1791_v33, %s4425_s28 }
 0x44c   :  { %v1704_v20 = vpop.permute.xlu2 %1703 }
 0x44d   :  { %1706 = vst.msk [vmem:[#allocation3 + $0x46] sm:$0x1f] %vm1667_vm3, %v1704_v20  ;;  %v3812_v20 = vld [vmem:[%s6097_s5 + $0x28] sm:$0xf] }
 0x451   :  { %1923 = vrot.lane.b32.xlu0 %v1921_v10, %s4425_s28  ;;  %v4220_v10 = vld [vmem:[%s6097_s5 + $0x28] sm:$0x10] }
 0x454   :  { %v1724_v9 = vpop.permute.xlu2 %1723 }
 0x455   :  { %1726 = vst.msk [vmem:[#allocation3 + $0x6e] sm:$0x1f] %vm1667_vm3, %v1724_v9  ;;  %v3813_v9 = vor.u32 %v4220_v10, %v3812_v20 }
 0x45a   :  { %v1678_v53 = vpop.permute.xlu1 %1677 }
 0x45b   :  { %1680 = vst.msk [vmem:[#allocation3 + $0x14] sm:$0x1f] %vm1667_vm3, %v1678_v53  ;;  %v1672_v37 = vpop.permute.xlu0 %1671 }
 0x45c   :  { %v1742_v3 = vpop.permute.xlu2 %1741  ;;  %1674 = vst.msk [vmem:[#allocation3 + $0xa] sm:$0x1f] %vm1667_vm3, %v1672_v37  ;;  %v2131_v37 = vand.u32 %v3813_v9, %v5669_v47 }
 0x45d   :  { %1744 = vst.msk [vmem:[#allocation3 + $0x8c] sm:$0x1f] %vm1667_vm3, %v1742_v3 }
 0x45e   :  { %2139 = vmatpush.bf16.msrb.mxu3 %v2131_v37 }
 0x462   :  { %v1698_v46 = vpop.permute.xlu1 %1697 }
 0x463   :  { %1700 = vst.msk [vmem:[#allocation3 + $0x3c] sm:$0x1f] %vm1667_vm3, %v1698_v46  ;;  %v1690_v13 = vpop.permute.xlu0 %1689  ;;  %v4219_v46 = vld [vmem:[%s6097_s5 + $0x20] sm:$0xff] }
 0x464   :  { %v1762_v40 = vpop.permute.xlu2 %1761  ;;  %1692 = vst.msk [vmem:[#allocation3 + $0x28] sm:$0x1f] %vm1667_vm3, %v1690_v13  ;;  %2140 = vmatpush.bf16.msrb.mxu3 %v4219_v46 }
 0x465   :  { %1764 = vst.msk [vmem:[#allocation3 + $0xb4] sm:$0x1f] %vm1667_vm3, %v1762_v40 }
 0x46a   :  { %v1716_v7 = vpop.permute.xlu1 %1715 }
 0x46b   :  { %1718 = vst.msk [vmem:[#allocation3 + $0x5a] sm:$0x1f] %vm1667_vm3, %v1716_v7  ;;  %v1710_v6 = vpop.permute.xlu0 %1709 }
 0x46c   :  { %v1782_v49 = vpop.permute.xlu2 %1781  ;;  %1712 = vst.msk [vmem:[#allocation3 + $0x50] sm:$0x1f] %vm1667_vm3, %v1710_v6 }
 0x46d   :  { %1784 = vst.msk [vmem:[#allocation3 + $0xdc] sm:$0x1f] %vm1667_vm3, %v1782_v49 }
 0x472   :  { %v1736_v43 = vpop.permute.xlu1 %1735 }
 0x473   :  { %1738 = vst.msk [vmem:[#allocation3 + $0x82] sm:$0x1f] %vm1667_vm3, %v1736_v43  ;;  %v1730_v25 = vpop.permute.xlu0 %1729 }
 0x474   :  { %v1814_v16 = vpop.permute.xlu2 %1813  ;;  %1732 = vst.msk [vmem:[#allocation3 + $0x78] sm:$0x1f] %vm1667_vm3, %v1730_v25 }
 0x475   :  { %1816 = vst.msk [vmem:[#allocation3 + $0x23] sm:$0x1f] %vm1667_vm3, %v1814_v16 }
 0x47a   :  { %v1756_v22 = vpop.permute.xlu1 %1755 }
 0x47b   :  { %1758 = vst.msk [vmem:[#allocation3 + $0xaa] sm:$0x1f] %vm1667_vm3, %v1756_v22  ;;  %v1750_v38 = vpop.permute.xlu0 %1749 }
 0x47c   :  { %v1834_v12 = vpop.permute.xlu2 %1833  ;;  %1752 = vst.msk [vmem:[#allocation3 + $0xa0] sm:$0x1f] %vm1667_vm3, %v1750_v38 }
 0x47d   :  { %1836 = vst.msk [vmem:[#allocation3 + $0x4b] sm:$0x1f] %vm1667_vm3, %v1834_v12  ;;  %v3828_v12 = vld [vmem:[%s6097_s5 + $0x38] sm:$0xf] }
 0x47e   :  { %v3829_v11 = vor.u32 %v4222_v30, %v3828_v12 }
 0x480   :  { %v2215_v34 = vand.u32 %v3829_v11, %v5669_v47 }
 0x482   :  { %v1776_v21 = vpop.permute.xlu1 %1775 }
 0x483   :  { %1778 = vst.msk [vmem:[#allocation3 + $0xd2] sm:$0x1f] %vm1667_vm3, %v1776_v21  ;;  %v1768_v52 = vpop.permute.xlu0 %1767 }
 0x484   :  { %v1854_v55 = vpop.permute.xlu2 %1853  ;;  %1770 = vst.msk [vmem:[#allocation3 + $0xbe] sm:$0x1f] %vm1667_vm3, %v1768_v52 }
 0x485   :  { %1856 = vst.msk [vmem:[#allocation3 + $0x73] sm:$0x1f] %vm1667_vm3, %v1854_v55 }
 0x48a   :  { %v1808_v61 = vpop.permute.xlu1 %1807 }
 0x48b   :  { %v1788_v27 = vpop.permute.xlu0 %1787  ;;  %1810 = vst.msk [vmem:[#allocation3 + $0x19] sm:$0x1f] %vm1667_vm3, %v1808_v61 }
 0x48c   :  { %v1872_v39 = vpop.permute.xlu2 %1871  ;;  %1790 = vst.msk [vmem:[#allocation3 + $0xe6] sm:$0x1f] %vm1667_vm3, %v1788_v27 }
 0x48d   :  { %1874 = vst.msk [vmem:[#allocation3 + $0x91] sm:$0x1f] %vm1667_vm3, %v1872_v39 }
 0x492   :  { %v1828_v45 = vpop.permute.xlu1 %1827 }
 0x493   :  { %1830 = vst.msk [vmem:[#allocation3 + $0x41] sm:$0x1f] %vm1667_vm3, %v1828_v45  ;;  %v1802_v36 = vpop.permute.xlu0 %1801 }
 0x494   :  { %v1886_v57 = vpop.permute.xlu2 %1885  ;;  %1804 = vst.msk [vmem:[#allocation3 + $0xf] sm:$0x1f] %vm1667_vm3, %v1802_v36 }
 0x495   :  { %1888 = vst.msk [vmem:[#allocation3 + $0xaf] sm:$0x1f] %vm1667_vm3, %v1886_v57 }
 0x49a   :  { %v1846_v31 = vpop.permute.xlu1 %1845 }
 0x49b   :  { %1848 = vst.msk [vmem:[#allocation3 + $0x5f] sm:$0x1f] %vm1667_vm3, %v1846_v31  ;;  %v1820_v8 = vpop.permute.xlu0 %1819  ;;  %v1949_v4 = vld [vmem:[#allocation3 + $0x1] ss:$5 sm:$0xff]  ;;  %v2085_v15 = vld [vmem:[#allocation3 + $0x2] ss:$5 sm:$0xff] }
 0x49c   :  { %v1906_v41 = vpop.permute.xlu2 %1905  ;;  %1822 = vst.msk [vmem:[#allocation3 + $0x2d] sm:$0x1f] %vm1667_vm3, %v1820_v8  ;;  %v1927_v56 = vld [vmem:[#allocation3] ss:$5 sm:$0xff] }
 0x49d   :  { %1908 = vst.msk [vmem:[#allocation3 + $0xd7] sm:$0x1f] %vm1667_vm3, %v1906_v41  ;;  %v2169_v57 = vld [vmem:[#allocation3 + $0x3] ss:$5 sm:$0xff] }
 0x4a2   :  { %v1866_v5 = vpop.permute.xlu1 %1865 }
 0x4a3   :  { %1868 = vst.msk [vmem:[#allocation3 + $0x87] sm:$0x1f] %vm1667_vm3, %v1866_v5  ;;  %v1840_v62 = vpop.permute.xlu0 %1839  ;;  %v1951_v44 = vld [vmem:[#allocation3 + $0x29] ss:$5 sm:$0xff]  ;;  %v2087_v63 = vld [vmem:[#allocation3 + $0x2a] ss:$5 sm:$0xff] }
 0x4a4   :  { %v1794_v26 = vpop.permute.xlu2 %1793  ;;  %1842 = vst.msk [vmem:[#allocation3 + $0x55] sm:$0x1f] %vm1667_vm3, %v1840_v62  ;;  %v1962_v19 = vpack.c.bf16 %v1951_v44, %v1949_v4  ;;  %v1929_v47 = vld [vmem:[#allocation3 + $0x28] ss:$5 sm:$0xff]  ;;  %v2098_v61 = vpack.c.bf16 %v2087_v63, %v2085_v15 }
 0x4a5   :  { %1796 = vst.msk [vmem:[#allocation3 + $0xf0] sm:$0x1f] %vm1667_vm3, %v1794_v26  ;;  %v1940_v14 = vpack.c.bf16 %v1929_v47, %v1927_v56  ;;  %v2171_v39 = vld [vmem:[#allocation3 + $0x2b] ss:$5 sm:$0xff] }
 0x4a6   :  { %3786 = vmatmul.msk.bf16.vlgmr.msra.gmra.mxu1 %vm1982_vm7, %v1962_v19  ;;  %v2182_v36 = vpack.c.bf16 %v2171_v39, %v2169_v57 }
 0x4a7   :  { %2223 = vmatpush.bf16.msra.mxu1 %v2215_v34 }
 0x4aa   :  { %v1880_v18 = vpop.permute.xlu1 %1879 }
 0x4ab   :  { %1882 = vst.msk [vmem:[#allocation3 + $0xa5] sm:$0x1f] %vm1667_vm3, %v1880_v18  ;;  %v1860_v48 = vpop.permute.xlu0 %1859  ;;  %v1953_v29 = vld [vmem:[#allocation3 + $0x51] ss:$5 sm:$0xff]  ;;  %v1931_v50 = vld [vmem:[#allocation3 + $0x50] ss:$5 sm:$0xff]  ;;  %2224 = vmatpush.bf16.msra.mxu1 %v4221_v2 }
 0x4ac   :  { %1862 = vst.msk [vmem:[#allocation3 + $0x7d] sm:$0x1f] %vm1667_vm3, %v1860_v48  ;;  %v2089_v42 = vld [vmem:[#allocation3 + $0x52] ss:$5 sm:$0xff]  ;;  %v2173_v28 = vld [vmem:[#allocation3 + $0x53] ss:$5 sm:$0xff] }
 0x4ad   :  { %v2255_v48 = vld [vmem:[#allocation3 + $0x2c] ss:$5 sm:$0xff]  ;;  %v2257_v10 = vld [vmem:[#allocation3 + $0x54] ss:$5 sm:$0xff] }
 0x4b2   :  { %v1898_v35 = vpop.permute.xlu1 %1897 }
 0x4b3   :  { %1900 = vst.msk [vmem:[#allocation3 + $0xc3] sm:$0x1f] %vm1667_vm3, %v1898_v35  ;;  %v1892_v17 = vpop.permute.xlu0 %1891  ;;  %v1955_v59 = vld [vmem:[#allocation3 + $0x79] ss:$5 sm:$0xff]  ;;  %v1933_v58 = vld [vmem:[#allocation3 + $0x78] ss:$5 sm:$0xff] }
 0x4b4   :  { %1894 = vst.msk [vmem:[#allocation3 + $0xb9] sm:$0x1f] %vm1667_vm3, %v1892_v17  ;;  %v1963_v33 = vpack.c.bf16 %v1955_v59, %v1953_v29  ;;  %v1941_v51 = vpack.c.bf16 %v1933_v58, %v1931_v50  ;;  %v2091_v27 = vld [vmem:[#allocation3 + $0x7a] ss:$5 sm:$0xff]  ;;  %v2175_v41 = vld [vmem:[#allocation3 + $0x7b] ss:$5 sm:$0xff] }
 0x4b5   :  { %v2099_v45 = vpack.c.bf16 %v2091_v27, %v2089_v42  ;;  %v2183_v54 = vpack.c.bf16 %v2175_v41, %v2173_v28  ;;  %v2253_v29 = vld [vmem:[#allocation3 + $0x4] ss:$5 sm:$0xff] }
 0x4b6   :  { %3799 = vmatmul.msk.bf16.vlgmr.msra.gmra.mxu3 %vm1982_vm7, %v1941_v51  ;;  %3787 = vmatmul.msk.bf16.gmra.mxu1 %vm1982_vm7, %v1963_v33  ;;  %v2266_v50 = vpack.c.bf16 %v2255_v48, %v2253_v29  ;;  %v2259_v51 = vld [vmem:[#allocation3 + $0x7c] ss:$5 sm:$0xff] }
 0x4b7   :  { %v2267_v9 = vpack.c.bf16 %v2259_v51, %v2257_v10  ;;  %v4427_v10 = vmov 50.0  }
 0x4b8   :  { %4375 = vrcp.f32 %v4427_v10 }
 0x4ba   :  { %v1918_v53 = vpop.permute.xlu1 %1917 }
 0x4bb   :  { %1920 = vst.msk [vmem:[#allocation3 + $0xeb] sm:$0x1f] %vm1667_vm3, %v1918_v53  ;;  %v1912_v3 = vpop.permute.xlu0 %1911  ;;  %v1957_v13 = vld [vmem:[#allocation3 + $0xa1] ss:$5 sm:$0xff]  ;;  %v1935_v40 = vld [vmem:[#allocation3 + $0xa0] ss:$5 sm:$0xff] }
 0x4bc   :  { %1914 = vst.msk [vmem:[#allocation3 + $0xe1] sm:$0x1f] %vm1667_vm3, %v1912_v3  ;;  %v2261_v7 = vld [vmem:[#allocation3 + $0xa4] ss:$5 sm:$0xff]  ;;  %v2177_v26 = vld [vmem:[#allocation3 + $0xa3] ss:$5 sm:$0xff] }
 0x4bd   :  { %v2093_v8 = vld [vmem:[#allocation3 + $0xa2] ss:$5 sm:$0xff] }
 0x4c3   :  { %v1924_v6 = vpop.permute.xlu0 %1923  ;;  %v1959_v49 = vld [vmem:[#allocation3 + $0xc9] ss:$5 sm:$0xff]  ;;  %v1937_v43 = vld [vmem:[#allocation3 + $0xc8] ss:$5 sm:$0xff] }
 0x4c4   :  { %v2263_v25 = vld [vmem:[#allocation3 + $0xcc] ss:$5 sm:$0xff]  ;;  %1926 = vst.msk [vmem:[#allocation3 + $0xf5] sm:$0x1f] %vm1667_vm3, %v1924_v6  ;;  %v1964_v16 = vpack.c.bf16 %v1959_v49, %v1957_v13  ;;  %v1942_v22 = vpack.c.bf16 %v1937_v43, %v1935_v40  ;;  %v2179_v5 = vld [vmem:[#allocation3 + $0xcb] ss:$5 sm:$0xff]  ;;  %vm2484_vm3 = vmor %vm2483_vm2, %vm2482_vm15 }
 0x4c5   :  { %v2268_v38 = vpack.c.bf16 %v2263_v25, %v2261_v7  ;;  %v2095_v31 = vld [vmem:[#allocation3 + $0xca] ss:$5 sm:$0xff]  ;;  %v2184_v62 = vpack.c.bf16 %v2179_v5, %v2177_v26  ;;  %vm2557_vm15 = vcmask 1042336   ;;  %vm2558_vm2 = vcmask 306178  }
 0x4c6   :  { %3800 = vmatmul.msk.bf16.gmra.mxu3 %vm1982_vm7, %v1942_v22  ;;  %3788 = vmatmul.msk.bf16.gmra.mxu1 %vm1982_vm7, %v1964_v16  ;;  %v2100_v0 = vpack.c.bf16 %v2095_v31, %v2093_v8 }
 0x4c7   :  { %3848 = vmatmul.msk.bf16.vlgmr.msrb.gmra.mxu2 %vm1982_vm7, %v2268_v38 }
 0x4cb   :  { %v1939_v24 = vld [vmem:[#allocation3 + $0xf0] ss:$5 sm:$0x3]  ;;  %v2265_v60 = vld [vmem:[#allocation3 + $0xf4] ss:$5 sm:$0x3] }
 0x4cc   :  { %v1961_v21 = vld [vmem:[#allocation3 + $0xf1] ss:$5 sm:$0x3]  ;;  %v1943_v52 = vpack.c.bf16 %v1939_v24, %v1939_v24  ;;  %v2269_v55 = vpack.c.bf16 %v2265_v60, %v2265_v60  ;;  %v2181_v4 = vld [vmem:[#allocation3 + $0xf3] ss:$5 sm:$0x3] }
 0x4cd   :  { %v1965_v32 = vpack.c.bf16 %v1961_v21, %v1961_v21  ;;  %v2185_v19 = vpack.c.bf16 %v2181_v4, %v2181_v4 }
 0x4d6   :  { %3801 = vmatmul.msk.bf16.gmra.mxu3 %vm1982_vm7, %v1943_v52  ;;  %3789 = vmatmul.msk.bf16.gmra.mxu1 %vm1982_vm7, %v1965_v32 }
 0x4d7   :  { %3849 = vmatmul.msk.bf16.gmra.mxu2 %vm1982_vm7, %v2269_v55 }
 0x4e6   :  { %3814 = vmatmul.msk.bf16.vlgmr.msrb.gmra.mxu3 %vm1982_vm7, %v2098_v61  ;;  %3798 = vmatmul.msk.bf16.vlgmr.msrb.gmra.mxu1 %vm1982_vm7, %v1940_v14 }
 0x4e7   :  { %2307 = vmatpush.bf16.msrb.mxu1 %v5704_v23  ;;  %v2097_v23 = vld [vmem:[#allocation3 + $0xf2] ss:$5 sm:$0x3] }
 0x4eb   :  { %2308 = vmatpush.bf16.msrb.mxu1 %v5710_v1  ;;  %v2101_v1 = vpack.c.bf16 %v2097_v23, %v2097_v23 }
 0x4f6   :  { %3815 = vmatmul.msk.bf16.gmra.mxu3 %vm1982_vm7, %v2099_v45  ;;  %3830 = vmatmul.msk.bf16.vlgmr.msra.gmra.mxu1 %vm1982_vm7, %v2182_v36 }
 0x506   :  { %3816 = vmatmul.msk.bf16.gmra.mxu3 %vm1982_vm7, %v2100_v0  ;;  %3831 = vmatmul.msk.bf16.gmra.mxu1 %vm1982_vm7, %v2183_v54 }
 0x516   :  { %3817 = vmatmul.msk.bf16.gmra.mxu3 %vm1982_vm7, %v2101_v1  ;;  %3832 = vmatmul.msk.bf16.gmra.mxu1 %vm1982_vm7, %v2184_v62  ;;  %v4364_v1 = vld [vmem:[%s6098_s6] ss:$0 sm:$0xff] }
 0x523   :  { %v2011_v44 = vpop.f32.mrf.mxu1 }
 0x526   :  { %3833 = vmatmul.msk.bf16.gmra.mxu1 %vm1982_vm7, %v2185_v19 }
 0x52b   :  { %v2013_v18 = vpop.f32.mrf.mxu1 }
 0x533   :  { %v2016_v35 = vpop.f32.mrf.mxu1 }
 0x536   :  { %3846 = vmatmul.msk.bf16.vlgmr.msrb.gmra.mxu1 %vm1982_vm7, %v2266_v50 }
 0x539   :  { %v2070_v17 = vpop.f32.mrf.mxu3 }
 0x53a   :  { %v2071_v59 = vadd.f32 %v2070_v17, %v2016_v35 }
 0x53b   :  { %v2018_v58 = vpop.f32.mrf.mxu1 }
 0x541   :  { %v2072_v33 = vpop.f32.mrf.mxu3 }
 0x542   :  { %v2073_v56 = vadd.f32 %v2072_v33, %v2018_v58 }
 0x543   :  { %v2021_v20 = vpop.f32.mrf.mxu1 }
 0x546   :  { %3847 = vmatmul.msk.bf16.gmra.mxu1 %vm1982_vm7, %v2267_v9  ;;  %vm2510_vm7 = vcmask 355330  }
 0x549   :  { %v2075_v53 = vpop.f32.mrf.mxu3 }
 0x54a   :  { %v5765_v37 = vpop.f32.mrf.mxu2  ;;  %v2076_v3 = vadd.f32 %v2075_v53, %v2021_v20 }
 0x54b   :  { %v2023_v46 = vpop.f32.mrf.mxu1 }
 0x551   :  { %v2077_v13 = vpop.f32.mrf.mxu3 }
 0x552   :  { %v5767_v40 = vpop.f32.mrf.mxu2  ;;  %v2078_v7 = vadd.f32 %v2077_v13, %v2023_v46 }
 0x553   :  { %v2026_v6 = vpop.f32.mrf.mxu1 }
 0x559   :  { %v2080_v49 = vpop.f32.mrf.mxu3 }
 0x55a   :  { %v5769_v43 = vpop.f32.mrf.mxu2  ;;  %v2081_v25 = vadd.f32 %v2080_v49, %v2026_v6 }
 0x55b   :  { %v2028_v16 = vpop.f32.mrf.mxu1 }
 0x561   :  { %v2082_v22 = vpop.f32.mrf.mxu3 }
 0x562   :  { %v2327_v38 = vpop.f32.mrf.mxu2  ;;  %v4376_v22 = vpop.eup %4375 }
 0x563   :  { %v2065_v12 = vpop.f32.mrf.mxu1  ;;  %vm2375_vm10 = vweird.f32 %v4376_v22 }
 0x564   :  { %v2066_v30 = vadd.f32 %v2065_v12, %v2011_v44 }
 0x569   :  { %v2142_v11 = vpop.f32.mrf.mxu3 }
 0x56a   :  { %v2161_v34 = vadd.f32 %v2142_v11, %v2066_v30 }
 0x56b   :  { %v2067_v2 = vpop.f32.mrf.mxu1 }
 0x56c   :  { %v2068_v24 = vadd.f32 %v2067_v2, %v2013_v18 }
 0x571   :  { %v2144_v60 = vpop.f32.mrf.mxu3 }
 0x572   :  { %v2162_v21 = vadd.f32 %v2144_v60, %v2068_v24 }
 0x573   :  { %v2226_v52 = vpop.f32.mrf.mxu1 }
 0x574   :  { %v2245_v55 = vadd.f32 %v2226_v52, %v2161_v34  ;;  %v2371_v34 = vmul.f32 50.0, %v4376_v22 }
 0x576   :  { %v2372_v60 = vsub.f32 1.0, %v2371_v34 }
 0x578   :  { %v2373_v52 = vmul.f32 %v4376_v22, %v2372_v60 }
 0x579   :  { %v2147_v32 = vpop.f32.mrf.mxu3 }
 0x57a   :  { %v2163_v63 = vadd.f32 %v2147_v32, %v2071_v59 }
 0x57b   :  { %v2228_v47 = vpop.f32.mrf.mxu1 }
 0x57c   :  { %v2246_v15 = vadd.f32 %v2228_v47, %v2162_v21 }
 0x581   :  { %v2149_v61 = vpop.f32.mrf.mxu3 }
 0x582   :  { %v2164_v14 = vadd.f32 %v2149_v61, %v2073_v56 }
 0x583   :  { %v2231_v27 = vpop.f32.mrf.mxu1 }
 0x584   :  { %v2247_v39 = vadd.f32 %v2231_v27, %v2163_v63  ;;  %v2374_v63 = vadd.f32 %v4376_v22, %v2373_v52 }
 0x586   :  { %v2376_v56 = vsel %vm2375_vm10, %v4376_v22, %v2374_v63  ;;  %v4365_v22 = vld [vmem:[%s6099_s7] ss:$0 sm:$0xff]  ;;  %s4428_s7 = smov 72   ;;  %vm2519_vm10 = vcmask 763232  }
 0x589   :  { %v2152_v42 = vpop.f32.mrf.mxu3 }
 0x58a   :  { %v2165_v45 = vadd.f32 %v2152_v42, %v2076_v3 }
 0x58b   :  { %v2233_v57 = vpop.f32.mrf.mxu1 }
 0x58c   :  { %v2248_v9 = vadd.f32 %v2233_v57, %v2164_v14 }
 0x591   :  { %v2154_v36 = vpop.f32.mrf.mxu3 }
 0x592   :  { %v2166_v50 = vadd.f32 %v2154_v36, %v2078_v7 }
 0x593   :  { %v2236_v31 = vpop.f32.mrf.mxu1 }
 0x594   :  { %v2249_v17 = vadd.f32 %v2236_v31, %v2165_v45 }
 0x596   :  { %v2333_v53 = vadd.f32 %v5765_v37, %v2249_v17 }
 0x598   :  { %v2344_v49 = vadd.f32 %v4364_v1, %v2333_v53 }
 0x599   :  { %v2157_v41 = vpop.f32.mrf.mxu3 }
 0x59a   :  { %v2167_v58 = vadd.f32 %v2157_v41, %v2081_v25  ;;  %v2357_v30 = vsel %vm2349_vm8, %v2344_v49, 0.0 }
 0x59b   :  { %v2238_v8 = vpop.f32.mrf.mxu1 }
 0x59c   :  { %v2250_v33 = vadd.f32 %v2238_v8, %v2166_v50 }
 0x59e   :  { %v2334_v13 = vadd.f32 %v5767_v40, %v2250_v33 }
 0x5a0   :  { %v2345_v25 = vadd.f32 %v4364_v1, %v2334_v13 }
 0x5a1   :  { %v2159_v0 = vpop.f32.mrf.mxu3 }
 0x5a2   :  { %v2359_v2 = vsel %vm2349_vm8, %v2345_v25, 0.0 }
 0x5a3   :  { %v2241_v28 = vpop.f32.mrf.mxu1 }
 0x5a4   :  { %v2251_v3 = vadd.f32 %v2241_v28, %v2167_v58 }
 0x5a6   :  { %v2335_v7 = vadd.f32 %v5769_v43, %v2251_v3 }
 0x5a8   :  { %v2346_v11 = vadd.f32 %v4364_v1, %v2335_v7 }
 0x5aa   :  { %v2362_v40 = vsel %vm2361_vm9, %v2346_v11, 0.0 }
 0x5ab   :  { %v2243_v54 = vpop.f32.mrf.mxu1 }
 0x5b3   :  { %v2310_v23 = vpop.f32.mrf.mxu1 }
 0x5b4   :  { %v2329_v5 = vadd.f32 %v2310_v23, %v2245_v55 }
 0x5b6   :  { %v2340_v62 = vadd.f32 %v4364_v1, %v2329_v5 }
 0x5b8   :  { %v2350_v19 = vsel %vm2349_vm8, %v2340_v62, 0.0 }
 0x5bb   :  { %v2312_v26 = vpop.f32.mrf.mxu1 }
 0x5bc   :  { %v2330_v4 = vadd.f32 %v2312_v26, %v2246_v15 }
 0x5be   :  { %v2341_v44 = vadd.f32 %v4364_v1, %v2330_v4 }
 0x5c0   :  { %v2351_v18 = vsel %vm2349_vm8, %v2341_v44, 0.0 }
 0x5c1   :  { %v2352_v48 = vadd.f32 %v2351_v18, %v2350_v19 }
 0x5c3   :  { %v2315_v35 = vpop.f32.mrf.mxu1 }
 0x5c4   :  { %v2331_v29 = vadd.f32 %v2315_v35, %v2247_v39 }
 0x5c6   :  { %v2342_v59 = vadd.f32 %v4364_v1, %v2331_v29 }
 0x5c8   :  { %v2353_v51 = vsel %vm2349_vm8, %v2342_v59, 0.0 }
 0x5c9   :  { %v2354_v20 = vadd.f32 %v2353_v51, %v2352_v48 }
 0x5cb   :  { %v2317_v46 = vpop.f32.mrf.mxu1 }
 0x5cc   :  { %v2332_v6 = vadd.f32 %v2317_v46, %v2248_v9 }
 0x5ce   :  { %v2343_v16 = vadd.f32 %v4364_v1, %v2332_v6 }
 0x5d0   :  { %v2355_v38 = vsel %vm2349_vm8, %v2343_v16, 0.0 }
 0x5d1   :  { %v2356_v12 = vadd.f32 %v2355_v38, %v2354_v20 }
 0x5d3   :  { %v2358_v37 = vadd.f32 %v2357_v30, %v2356_v12  ;;  %v4366_v30 = vld [vmem:[%s6100_s8] ss:$0 sm:$0xff]  ;;  %s4429_s8 = smov 100  }
 0x5d5   :  { %v2360_v24 = vadd.f32 %v2359_v2, %v2358_v37 }
 0x5d7   :  { %v2363_v21 = vadd.f32 %v2362_v40, %v2360_v24 }
 0x5d9   :  { %v2364_v43 = vrot.slane %v2363_v21, 4 }
 0x5db   :  { %v2365_v55 = vadd.f32 %v2364_v43, %v2363_v21 }
 0x5dd   :  { %v2366_v32 = vrot.slane %v2365_v55, 2 }
 0x5df   :  { %v2367_v47 = vadd.f32 %v2366_v32, %v2365_v55 }
 0x5e1   :  { %v2368_v15 = vrot.slane %v2367_v47, 1 }
 0x5e3   :  { %v2369_v61 = vadd.f32 %v2368_v15, %v2367_v47 }
 0x5e5   :  { %v2377_v14 = vmul.f32 %v2376_v56, %v2369_v61 }
 0x5e7   :  { %v2378_v27 = vsub.f32 %v2340_v62, %v2377_v14  ;;  %v2379_v39 = vsub.f32 %v2341_v44, %v2377_v14  ;;  %v2380_v42 = vsub.f32 %v2342_v59, %v2377_v14  ;;  %v2381_v45 = vsub.f32 %v2343_v16, %v2377_v14 }
 0x5e8   :  { %v2382_v57 = vsub.f32 %v2344_v49, %v2377_v14  ;;  %v2383_v36 = vsub.f32 %v2345_v25, %v2377_v14  ;;  %v2384_v31 = vsub.f32 %v2346_v11, %v2377_v14 }
 0x5e9   :  { %v2385_v41 = vmul.f32 %v2378_v27, %v2378_v27  ;;  %v2386_v8 = vmul.f32 %v2379_v39, %v2379_v39  ;;  %v2387_v0 = vmul.f32 %v2380_v42, %v2380_v42  ;;  %v2388_v28 = vmul.f32 %v2381_v45, %v2381_v45 }
 0x5ea   :  { %v2389_v1 = vmul.f32 %v2382_v57, %v2382_v57  ;;  %v2390_v62 = vmul.f32 %v2383_v36, %v2383_v36  ;;  %v2391_v18 = vmul.f32 %v2384_v31, %v2384_v31 }
 0x5eb   :  { %v2392_v54 = vsel %vm2349_vm8, %v2385_v41, 0.0  ;;  %v2393_v23 = vsel %vm2349_vm8, %v2386_v8, 0.0  ;;  %v2395_v26 = vsel %vm2349_vm8, %v2387_v0, 0.0  ;;  %v2397_v44 = vsel %vm2349_vm8, %v2388_v28, 0.0 }
 0x5ec   :  { %v2394_v5 = vadd.f32 %v2393_v23, %v2392_v54  ;;  %v2399_v48 = vsel %vm2349_vm8, %v2389_v1, 0.0  ;;  %v2401_v29 = vsel %vm2349_vm8, %v2390_v62, 0.0  ;;  %v2403_v17 = vsel %vm2361_vm9, %v2391_v18, 0.0 }
 0x5ed   :  { %vm2506_vm8 = vcmask 998400  }
 0x5ee   :  { %v2396_v4 = vadd.f32 %v2395_v26, %v2394_v5 }
 0x5f0   :  { %v2398_v19 = vadd.f32 %v2397_v44, %v2396_v4 }
 0x5f2   :  { %v2400_v35 = vadd.f32 %v2399_v48, %v2398_v19 }
 0x5f4   :  { %v2402_v50 = vadd.f32 %v2401_v29, %v2400_v35 }
 0x5f6   :  { %v2404_v59 = vadd.f32 %v2403_v17, %v2402_v50 }
 0x5f8   :  { %v2405_v58 = vrot.slane %v2404_v59, 4 }
 0x5fa   :  { %v2406_v33 = vadd.f32 %v2405_v58, %v2404_v59 }
 0x5fc   :  { %v2407_v51 = vrot.slane %v2406_v33, 2 }
 0x5fe   :  { %v2408_v20 = vadd.f32 %v2407_v51, %v2406_v33  ;;  %v4232_v51 = vld [vmem:[%s6101_s9 + $0x38] sm:$0xff] }
 0x5ff   :  { %3370 = vmatpush.bf16.msra.mxu3 %v4232_v51 }
 0x600   :  { %v2409_v10 = vrot.slane %v2408_v20, 1 }
 0x602   :  { %v2410_v9 = vadd.f32 %v2409_v10, %v2408_v20  ;;  %v4231_v20 = vld [vmem:[%s6101_s9 + $0x30] sm:$0xff] }
 0x603   :  { %3371 = vmatpush.bf16.msra.mxu3 %v4231_v20 }
 0x604   :  { %v2411_v53 = vmul.f32 %v2410_v9, %v2376_v56  ;;  %v4230_v9 = vld [vmem:[%s6101_s9 + $0x28] sm:$0xff] }
 0x606   :  { %v2412_v3 = vadd.f32 1e-05, %v2411_v53  ;;  %v4229_v53 = vld [vmem:[%s6101_s9 + $0x20] sm:$0xff] }
 0x607   :  { %3372 = vmatpush.bf16.msra.mxu3 %v4230_v9 }
 0x608   :  { %4377 = vrsqrt.f32 %v2412_v3  ;;  %vm2419_vm12 = vweird.f32 %v2412_v3 }
 0x60b   :  { %3373 = vmatpush.bf16.msra.mxu3 %v4229_v53 }
 0x60e   :  { %v4378_v46 = vpop.eup %4377 }
 0x60f   :  { %v2414_v13 = vmul.f32 %v4378_v46, %v2412_v3  ;;  %vm2420_vm11 = vweird.f32 %v4378_v46  ;;  %v4248_v3 = vld [vmem:[%s6101_s9 + $0xb8] sm:$0xff] }
 0x610   :  { %vm2421_vm13 = vmor %vm2419_vm12, %vm2420_vm11  ;;  %3396 = vmatpush.bf16.msra.mxu1 %v4248_v3  ;;  %vm2530_vm11 = vcmask 1042160   ;;  %vm2531_vm12 = vcmask 125954  }
 0x611   :  { %v2415_v6 = vmul.f32 %v4378_v46, %v2414_v13 }
 0x613   :  { %v2416_v49 = vmul.f32 0.5, %v2415_v6  ;;  %v4228_v6 = vld [vmem:[%s6101_s9 + $0x18] sm:$0xff] }
 0x614   :  { %3374 = vmatpush.bf16.msra.mxu3 %v4228_v6  ;;  %v4263_v6 = vld [vmem:[%s6101_s9 + $0x130] sm:$0xff] }
 0x615   :  { %v2417_v7 = vsub.f32 1.5, %v2416_v49 }
 0x617   :  { %v2418_v16 = vmul.f32 %v4378_v46, %v2417_v7 }
 0x619   :  { %v2422_v25 = vsel %vm2421_vm13, %v4378_v46, %v2418_v16  ;;  %v4256_v46 = vld [vmem:[%s6101_s9 + $0xf8] sm:$0xff]  ;;  %vm2527_vm13 = vcmask 769024  }
 0x61a   :  { %v2423_v38 = vmul.f32 %v2422_v25, %v2378_v27  ;;  %v2426_v12 = vmul.f32 %v2422_v25, %v2381_v45  ;;  %v2424_v11 = vmul.f32 %v2422_v25, %v2379_v39  ;;  %v2425_v34 = vmul.f32 %v2422_v25, %v2380_v42  ;;  %3409 = vmatpush.bf16.msra.mxu2 %v4256_v46  ;;  %v4271_v46 = vld [vmem:[%s6101_s9 + $0x170] sm:$0xff] }
 0x61b   :  { %v2427_v37 = vmul.f32 %v2422_v25, %v2382_v57  ;;  %v2428_v2 = vmul.f32 %v2422_v25, %v2383_v36  ;;  %v2429_v24 = vmul.f32 %v2422_v25, %v2384_v31  ;;  %v4255_v25 = vld [vmem:[%s6101_s9 + $0xf0] sm:$0xff] }
 0x61c   :  { %v2433_v40 = vmul.f32 %v4365_v22, %v2423_v38  ;;  %v2436_v60 = vmul.f32 %v4365_v22, %v2426_v12  ;;  %v2434_v21 = vmul.f32 %v4365_v22, %v2424_v11  ;;  %v2435_v41 = vmul.f32 %v4365_v22, %v2425_v34  ;;  %v4227_v38 = vld [vmem:[%s6101_s9 + $0x10] sm:$0xff]  ;;  %v4254_v11 = vld [vmem:[%s6101_s9 + $0xe8] sm:$0xff] }
 0x61d   :  { %v2437_v43 = vmul.f32 %v4365_v22, %v2427_v37  ;;  %v2438_v52 = vmul.f32 %v4365_v22, %v2428_v2  ;;  %v2439_v55 = vmul.f32 %v4365_v22, %v2429_v24  ;;  %v4247_v22 = vld [vmem:[%s6101_s9 + $0xb0] sm:$0xff]  ;;  %3375 = vmatpush.bf16.msra.mxu3 %v4227_v38  ;;  %v4226_v34 = vld [vmem:[%s6101_s9 + $0x8] sm:$0xff]  ;;  %v4245_v2 = vld [vmem:[%s6101_s9 + $0xa0] sm:$0xff] }
 0x61e   :  { %v2443_v32 = vadd.f32 %v4366_v30, %v2433_v40  ;;  %v2444_v63 = vadd.f32 %v4366_v30, %v2434_v21  ;;  %v2446_v47 = vadd.f32 %v4366_v30, %v2436_v60  ;;  %v2445_v8 = vadd.f32 %v4366_v30, %v2435_v41  ;;  %3397 = vmatpush.bf16.msra.mxu1 %v4247_v22  ;;  %v4253_v24 = vld [vmem:[%s6101_s9 + $0xe0] sm:$0xff]  ;;  %v4240_v60 = vld [vmem:[%s6101_s9 + $0x78] sm:$0xff] }
 0x61f   :  { %v2447_v15 = vadd.f32 %v4366_v30, %v2437_v43  ;;  %v5797_v56 = vadd.f32 %v4366_v30, %v2438_v52  ;;  %v5799_v61 = vadd.f32 %v4366_v30, %v2439_v55  ;;  %3410 = vmatpush.bf16.msra.mxu2 %v4255_v25  ;;  %v4246_v30 = vld [vmem:[%s6101_s9 + $0xa8] sm:$0xff]  ;;  %v4225_v40 = vld [vmem:[%s6101_s9] sm:$0xff]  ;;  %v4244_v43 = vld [vmem:[%s6101_s9 + $0x98] sm:$0xff] }
 0x620   :  { %v2450_v14 = vmax.f32 %v2443_v32, 0.0  ;;  %v2451_v27 = vmax.f32 %v2444_v63, 0.0  ;;  %v2452_v28 = vmax.f32 %v2445_v8, 0.0  ;;  %v2453_v26 = vmax.f32 %v2446_v47, 0.0  ;;  %v4252_v52 = vld [vmem:[%s6101_s9 + $0xd8] sm:$0xff]  ;;  %v4239_v55 = vld [vmem:[%s6101_s9 + $0x70] sm:$0xff] }
 0x621   :  { %v2454_v44 = vmax.f32 %v2447_v15, 0.0  ;;  %v2455_v29 = vmax.f32 %v5797_v56, 0.0  ;;  %3376 = vmatpush.bf16.msra.mxu3 %v4226_v34  ;;  %v2456_v63 = vmax.f32 %v5799_v61, 0.0  ;;  %v4243_v15 = vld [vmem:[%s6101_s9 + $0x90] sm:$0xff]  ;;  %v4242_v61 = vld [vmem:[%s6101_s9 + $0x88] sm:$0xff]  ;;  %v4236_v41 = vld [vmem:[%s6101_s9 + $0x58] sm:$0xff] }
 0x622   :  { %v2457_v39 = vmin.f32 %v2450_v14, 6.0  ;;  %v2458_v42 = vmin.f32 %v2451_v27, 6.0  ;;  %v2459_v54 = vmin.f32 %v2452_v28, 6.0  ;;  %v2460_v4 = vmin.f32 %v2453_v26, 6.0  ;;  %3398 = vmatpush.bf16.msra.mxu1 %v4246_v30  ;;  %v4251_v56 = vld [vmem:[%s6101_s9 + $0xd0] sm:$0xff]  ;;  %v4238_v27 = vld [vmem:[%s6101_s9 + $0x68] sm:$0xff] }
 0x623   :  { %v2461_v19 = vmin.f32 %v2454_v44, 6.0  ;;  %v2462_v50 = vmin.f32 %v2455_v29, 6.0  ;;  %3411 = vmatpush.bf16.msra.mxu2 %v4254_v11  ;;  %v4272_v29 = vld [vmem:[%s6101_s9 + $0x178] sm:$0xff]  ;;  %v4269_v22 = vld [vmem:[%s6101_s9 + $0x160] sm:$0xff] }
 0x624   :  { %2464 = vst.msk [vmem:[#allocation4] sm:$0x3] %vm2361_vm9, %v2457_v39  ;;  %2495 = vrot.lane.b32.xlu2 %v2458_v42, %s4428_s7  ;;  %vm2511_vm9 = vmor %vm2510_vm7, %vm2509_vm6  ;;  %vm2576_vm7 = vcmask 1042112   ;;  %v4277_v25 = vld [vmem:[%s6101_s9 + $0x1a0] sm:$0xff]  ;;  %v4276_v34 = vld [vmem:[%s6101_s9 + $0x198] sm:$0xff] }
 0x625   :  { %2466 = vst.sshfl [vmem:[#allocation1] sm:$0xff pattern:$0x73625140] %v2457_v39  ;;  %3377 = vmatpush.bf16.msra.mxu3 %v4225_v40  ;;  %vm2559_vm6 = vmor %vm2558_vm2, %vm2557_vm15  ;;  %v4261_v38 = vld [vmem:[%s6101_s9 + $0x120] sm:$0xff]  ;;  %v4275_v40 = vld [vmem:[%s6101_s9 + $0x190] sm:$0xff]  ;;  %vm2606_vm15 = vcmask 257026  }
 0x626   :  { %3399 = vmatpush.bf16.msra.mxu1 %v4245_v2  ;;  %v4260_v2 = vld [vmem:[%s6101_s9 + $0x118] sm:$0xff]  ;;  %vm2602_vm2 = vcmask 900096  }
 0x627   :  { %3412 = vmatpush.bf16.msra.mxu2 %v4253_v24  ;;  %v4267_v24 = vld [vmem:[%s6101_s9 + $0x150] sm:$0xff] }
 0x629   :  { %3383 = vmatpush.bf16.msrb.mxu3 %v4240_v60  ;;  %v4259_v60 = vld [vmem:[%s6101_s9 + $0x110] sm:$0xff] }
 0x62a   :  { %3400 = vmatpush.bf16.msra.mxu1 %v4244_v43 }
 0x62b   :  { %3413 = vmatpush.bf16.msra.mxu2 %v4252_v52  ;;  %v4274_v52 = vld [vmem:[%s6101_s9 + $0x188] sm:$0xff] }
 0x62c   :  { %v2468_v45 = vld [vmem:[#allocation1 + $0x1] ss:$4 sm:$0xff] }
 0x62d   :  { %2474 = vst.sshfl [vmem:[#allocation1] sm:$0xff pattern:$0x73625140] %v2457_v39  ;;  %2469 = vrot.lane.b32.xlu2 %v2468_v45, %s4419_s23  ;;  %s4433_s23 = smov 94   ;;  %3384 = vmatpush.bf16.msrb.mxu3 %v4239_v55  ;;  %v4237_v45 = vld [vmem:[%s6101_s9 + $0x60] sm:$0xff] }
 0x62e   :  { %3401 = vmatpush.bf16.msra.mxu1 %v4243_v15  ;;  %v4273_v15 = vld [vmem:[%s6101_s9 + $0x180] sm:$0xff] }
 0x62f   :  { %3414 = vmatpush.bf16.msra.mxu2 %v4251_v56  ;;  %v4296_v56 = vld [vmem:[%s6101_s9 + $0x238] sm:$0xff] }
 0x631   :  { %3385 = vmatpush.bf16.msrb.mxu3 %v4238_v27 }
 0x632   :  { %3402 = vmatpush.bf16.msra.mxu1 %v4242_v61 }
 0x634   :  { %v2476_v57 = vld [vmem:[#allocation1 + $0x2] ss:$4 sm:$0xff] }
 0x635   :  { %2486 = vst.sshfl [vmem:[#allocation1] sm:$0xff pattern:$0x73625140] %v2457_v39  ;;  %2477 = vrot.lane.b32.xlu1 %v2476_v57, %s4429_s8  ;;  %v2463_v39 = vmin.f32 %v2456_v63, 6.0  ;;  %3386 = vmatpush.bf16.msrb.mxu3 %v4237_v45  ;;  %v4258_v63 = vld [vmem:[%s6101_s9 + $0x108] sm:$0xff] }
 0x639   :  { %3387 = vmatpush.bf16.msrb.mxu3 %v4236_v41  ;;  %v4286_v41 = vld [vmem:[%s6101_s9 + $0x1e8] sm:$0xff] }
 0x63c   :  { %v2488_v36 = vld [vmem:[#allocation1 + $0x3] ss:$4 sm:$0xff] }
 0x63d   :  { %2500 = vst.sshfl [vmem:[#allocation1] sm:$0xff pattern:$0x73625140] %v2458_v42  ;;  %2489 = vrot.lane.b32.xlu1 %v2488_v36, %s4430_s30  ;;  %v4241_v36 = vld [vmem:[%s6101_s9 + $0x80] sm:$0xff] }
 0x63e   :  { %3403 = vmatpush.bf16.msra.mxu1 %v4241_v36 }
 0x642   :  { %3435 = vmatpush.bf16.msrb.mxu1 %v4272_v29  ;;  %v4301_v29 = vld [vmem:[%s6101_s9 + $0x260] sm:$0xff] }
 0x644   :  { %v2502_v31 = vld [vmem:[#allocation1 + $0x1] ss:$4 sm:$0xff] }
 0x645   :  { %2513 = vst.sshfl [vmem:[#allocation1] sm:$0xff pattern:$0x73625140] %v2458_v42  ;;  %2503 = vrot.lane.b32.xlu0 %v2502_v31, %s4431_s16  ;;  %v4249_v31 = vld [vmem:[%s6101_s9 + $0xc0] sm:$0xff] }
 0x646   :  { %3436 = vmatpush.bf16.msrb.mxu1 %v4271_v46 }
 0x64c   :  { %v2515_v0 = vld [vmem:[#allocation1 + $0x2] ss:$4 sm:$0xff] }
 0x64d   :  { %2521 = vst.sshfl [vmem:[#allocation1] sm:$0xff pattern:$0x73625140] %v2458_v42  ;;  %2516 = vrot.lane.b32.xlu1 %v2515_v0, %s4432_s3  ;;  %v4250_v42 = vld [vmem:[%s6101_s9 + $0xc8] sm:$0xff]  ;;  %v4235_v0 = vld [vmem:[%s6101_s9 + $0x50] sm:$0xff] }
 0x64e   :  { %3415 = vmatpush.bf16.msra.mxu2 %v4250_v42  ;;  %3388 = vmatpush.bf16.msrb.mxu3 %v4235_v0  ;;  %v2886_v0 = vld [vmem:[%s6101_s9 + $0x270] sm:$0x1] }
 0x652   :  { %3416 = vmatpush.bf16.msra.mxu2 %v4249_v31 }
 0x654   :  { %v2523_v23 = vld [vmem:[#allocation1 + $0x3] ss:$4 sm:$0xff] }
 0x655   :  { %2524 = vrot.lane.b32.xlu0 %v2523_v23, %s4433_s23  ;;  %2540 = vst.sshfl [vmem:[#allocation1] sm:$0xff pattern:$0x73625140] %v2459_v54  ;;  %s4449_s23 = smov [#allocation5]  }
 0x65c   :  { %v2542_v5 = vld [vmem:[#allocation1 + $0x1] ss:$4 sm:$0xff] }
 0x65d   :  { %2535 = vrot.lane.b32.xlu0 %v2459_v54, %s4434_s17  ;;  %2543 = vrot.lane.b32.xlu1 %v2542_v5, %s4435_s18  ;;  %2548 = vst.sshfl [vmem:[#allocation1] sm:$0xff pattern:$0x73625140] %v2459_v54  ;;  %s4444_s17 = smov 26   ;;  %v4234_v5 = vld [vmem:[%s6101_s9 + $0x48] sm:$0xff] }
 0x65e   :  { %3389 = vmatpush.bf16.msrb.mxu3 %v4234_v5  ;;  %v4285_v5 = vld [vmem:[%s6101_s9 + $0x1e0] sm:$0xff] }
 0x664   :  { %v2550_v1 = vld [vmem:[#allocation1 + $0x2] ss:$4 sm:$0xff] }
 0x665   :  { %2551 = vrot.lane.b32.xlu2 %v2550_v1, %s4436_s19  ;;  %2561 = vst.sshfl [vmem:[#allocation1] sm:$0xff pattern:$0x73625140] %v2459_v54  ;;  %s4446_s19 = smov 126  }
 0x66c   :  { %v2563_v62 = vld [vmem:[#allocation1 + $0x3] ss:$4 sm:$0xff] }
 0x66d   :  { %2570 = vrot.lane.b32.xlu2 %v2460_v4, %s4425_s28  ;;  %2564 = vrot.lane.b32.xlu0 %v2563_v62, %s4437_s20  ;;  %2580 = vst.sshfl [vmem:[#allocation1] sm:$0xff pattern:$0x73625140] %v2460_v4  ;;  %s4439_s28 = smov 104  }
 0x674   :  { %v2582_v18 = vld [vmem:[#allocation1 + $0x1] ss:$4 sm:$0xff] }
 0x675   :  { %2610 = vrot.lane.b32.xlu2 %v2461_v19, %s4438_s21  ;;  %2588 = vst.sshfl [vmem:[#allocation1] sm:$0xff pattern:$0x73625140] %v2460_v4 }
 0x67c   :  { %v2590_v48 = vld [vmem:[#allocation1 + $0x2] ss:$4 sm:$0xff] }
 0x67d   :  { %2583 = vrot.lane.b32.xlu2 %v2582_v18, %s4411_s4  ;;  %2591 = vrot.lane.b32.xlu0 %v2590_v48, %s4421_s25  ;;  %2596 = vst.sshfl [vmem:[#allocation1] sm:$0xff pattern:$0x73625140] %v2460_v4  ;;  %s4442_s4 = smov 4   ;;  %v4233_v4 = vld [vmem:[%s6101_s9 + $0x40] sm:$0xff] }
 0x67e   :  { %v5806_v35 = vpop.permute.xlu2 %2495  ;;  %3390 = vmatpush.bf16.msrb.mxu3 %v4233_v4 }
 0x684   :  { %v2598_v17 = vld [vmem:[#allocation1 + $0x3] ss:$4 sm:$0xff] }
 0x685   :  { %2645 = vrot.lane.b32.xlu0 %v2462_v50, %s4439_s28  ;;  %2599 = vrot.lane.b32.xlu1 %v2598_v17, %s4440_s22  ;;  %2615 = vst.sshfl [vmem:[#allocation1] sm:$0xff pattern:$0x73625140] %v2461_v19 }
 0x687   :  { %v2470_v59 = vpop.permute.xlu2 %2469 }
 0x688   :  { %2473 = vst.msk [vmem:[#allocation4] sm:$0x3] %vm2472_vm14, %v2470_v59  ;;  %vm2532_vm14 = vmor %vm2531_vm12, %vm2530_vm11  ;;  %vm2586_vm12 = vcmask 484432  }
 0x68c   :  { %v2617_v58 = vld [vmem:[#allocation1 + $0x1] ss:$4 sm:$0xff] }
 0x68d   :  { %2618 = vrot.lane.b32.xlu1 %v2617_v58, %s4441_s1  ;;  %2628 = vst.sshfl [vmem:[#allocation1] sm:$0xff pattern:$0x73625140] %v2461_v19 }
 0x694   :  { %v2630_v33 = vld [vmem:[#allocation1 + $0x2] ss:$4 sm:$0xff] }
 0x695   :  { %2631 = vrot.lane.b32.xlu1 %v2630_v33, %s4442_s4  ;;  %2636 = vst.sshfl [vmem:[#allocation1] sm:$0xff pattern:$0x73625140] %v2461_v19  ;;  %v4264_v33 = vld [vmem:[%s6101_s9 + $0x138] sm:$0xff] }
 0x69c   :  { %v2638_v10 = vld [vmem:[#allocation1 + $0x3] ss:$4 sm:$0xff] }
 0x69d   :  { %2639 = vrot.lane.b32.xlu2 %v2638_v10, %s4443_s27  ;;  %2655 = vst.sshfl [vmem:[#allocation1] sm:$0xff pattern:$0x73625140] %v2462_v50 }
 0x6a4   :  { %v2657_v13 = vld [vmem:[#allocation1 + $0x1] ss:$4 sm:$0xff] }
 0x6a5   :  { %2658 = vrot.lane.b32.xlu1 %v2657_v13, %s4444_s17  ;;  %2663 = vst.sshfl [vmem:[#allocation1] sm:$0xff pattern:$0x73625140] %v2462_v50  ;;  %v4279_v13 = vld [vmem:[%s6101_s9 + $0x1b0] sm:$0xff]  ;;  %s3633_s17 = sshll.u32 %s4449_s23, 4  ;;  %s3634_s17 = int_to_ptr.vmem [resolvable:$true] %s3633_s17 }
 0x6a7   :  { %v2478_v49 = vpop.permute.xlu1 %2477 }
 0x6a8   :  { %v2479_v7 = vrot.slane %v2478_v49, 6 }
 0x6aa   :  { %v2480_v16 = vsel %vm259_vm1, %v2479_v7, %v2478_v49  ;;  %v4270_v49 = vld [vmem:[%s6101_s9 + $0x168] sm:$0xff] }
 0x6ab   :  { %2485 = vst.msk [vmem:[#allocation4] sm:$0xf] %vm2484_vm3, %v2480_v16  ;;  %vm2538_vm3 = vcmask 533632   ;;  %v4278_v7 = vld [vmem:[%s6101_s9 + $0x1a8] sm:$0xff]  ;;  %3437 = vmatpush.bf16.msrb.mxu1 %v4270_v49 }
 0x6ac   :  { %v2665_v12 = vld [vmem:[#allocation1 + $0x2] ss:$4 sm:$0xff] }
 0x6ad   :  { %2666 = vrot.lane.b32.xlu2 %v2665_v12, %s4445_s26  ;;  %2671 = vst.sshfl [vmem:[#allocation1] sm:$0xff pattern:$0x73625140] %v2462_v50  ;;  %v4280_v50 = vld [vmem:[%s6101_s9 + $0x1b8] sm:$0xff]  ;;  %v4262_v16 = vld [vmem:[%s6101_s9 + $0x128] sm:$0xff] }
 0x6ae   :  { %3448 = vmatpush.bf16.msrb.mxu2 %v4280_v50  ;;  %v4268_v12 = vld [vmem:[%s6101_s9 + $0x158] sm:$0xff] }
 0x6af   :  { %v2490_v37 = vpop.permute.xlu1 %2489  ;;  %3438 = vmatpush.bf16.msrb.mxu1 %v4269_v22  ;;  %v4290_v22 = vld [vmem:[%s6101_s9 + $0x208] sm:$0xff] }
 0x6b0   :  { %2493 = vst.msk [vmem:[#allocation4 + $0x2] sm:$0x3] %vm2492_vm4, %v2490_v37  ;;  %vm2554_vm4 = vcmask 949248  }
 0x6b1   :  { %2499 = vst.msk [vmem:[#allocation4 + $0x2] sm:$0x3] %vm2498_vm5, %v5806_v35  ;;  %vm2546_vm5 = vcmask 943632  }
 0x6b2   :  { %3449 = vmatpush.bf16.msrb.mxu2 %v4279_v13 }
 0x6b3   :  { %3439 = vmatpush.bf16.msrb.mxu1 %v4268_v12  ;;  %v4297_v12 = vld [vmem:[%s6101_s9 + $0x240] sm:$0xff] }
 0x6b4   :  { %v2673_v21 = vld [vmem:[#allocation1 + $0x3] ss:$4 sm:$0xff] }
 0x6b5   :  { %2674 = vrot.lane.b32.xlu0 %v2673_v21, %s4446_s19  ;;  %v4266_v21 = vld [vmem:[%s6101_s9 + $0x148] sm:$0xff]  ;;  %s3635_s19 = sshll.u32 %s6107_s15, 4  ;;  %s3636_s19 = int_to_ptr.hbm [resolvable:$true] %s3635_s19 }
 0x6b6   :  { %3450 = vmatpush.bf16.msrb.mxu2 %v4278_v7  ;;  %v4281_v7 = vld [vmem:[%s6101_s9 + $0x1c0] sm:$0xff] }
 0x6b7   :  { %v2504_v32 = vpop.permute.xlu0 %2503  ;;  %3440 = vmatpush.bf16.msrb.mxu1 %v4267_v24 }
 0x6b8   :  { %v2505_v47 = vrot.slane %v2504_v32, 6 }
 0x6ba   :  { %v2507_v14 = vsel %vm2506_vm8, %v2505_v47, %v2504_v32  ;;  %vm2577_vm8 = vcmask 76802   ;;  %3451 = vmatpush.bf16.msrb.mxu2 %v4277_v25  ;;  %v4265_v47 = vld [vmem:[%s6101_s9 + $0x140] sm:$0xff]  ;;  %v4298_v25 = vld [vmem:[%s6101_s9 + $0x248] sm:$0xff] }
 0x6bb   :  { %2512 = vst.msk [vmem:[#allocation4 + $0x2] sm:$0xf] %vm2511_vm9, %v2507_v14  ;;  %vm2573_vm9 = vcmask 719872   ;;  %vm2578_vm11 = vmor %vm2577_vm8, %vm2576_vm7  ;;  %3441 = vmatpush.bf16.msrb.mxu1 %v4266_v21  ;;  %v4257_v14 = vld [vmem:[%s6101_s9 + $0x100] sm:$0xff]  ;;  %vm2621_vm7 = vcmask 670720  }
 0x6bd   :  { %2685 = vrot.lane.b32.xlu0 %v2463_v39, %s4447_s0  ;;  %v4288_v39 = vld [vmem:[%s6101_s9 + $0x1f8] sm:$0xff] }
 0x6be   :  { %3452 = vmatpush.bf16.msrb.mxu2 %v4276_v34 }
 0x6bf   :  { %v2517_v57 = vpop.permute.xlu1 %2516  ;;  %v2552_v8 = vpop.permute.xlu2 %2551  ;;  %3442 = vmatpush.bf16.msrb.mxu1 %v4265_v47 }
 0x6c0   :  { %2520 = vst.msk [vmem:[#allocation4 + $0x4] sm:$0x3] %vm2519_vm10, %v2517_v57  ;;  %v2553_v1 = vrot.slane %v2552_v8, 6  ;;  %vm2567_vm10 = vcmask 714032   ;;  %v4287_v57 = vld [vmem:[%s6101_s9 + $0x1f0] sm:$0xff] }
 0x6c2   :  { %v2555_v19 = vsel %vm2554_vm4, %v2553_v1, %v2552_v8  ;;  %3453 = vmatpush.bf16.msrb.mxu2 %v4275_v40  ;;  %vm2613_vm4 = vcmask 664832  }
 0x6c6   :  { %3454 = vmatpush.bf16.msrb.mxu2 %v4274_v52 }
 0x6c7   :  { %v2525_v28 = vpop.permute.xlu0 %2524  ;;  %v2571_v26 = vpop.permute.xlu2 %2570 }
 0x6c8   :  { %v2526_v54 = vrot.slane %v2525_v28, 6  ;;  %v2572_v35 = vrot.slane %v2571_v26, 6 }
 0x6ca   :  { %v2528_v23 = vsel %vm2527_vm13, %v2526_v54, %v2525_v28  ;;  %v2574_v59 = vsel %vm2573_vm9, %v2572_v35, %v2571_v26  ;;  %vm2594_vm13 = vcmask 894432   ;;  %3455 = vmatpush.bf16.msrb.mxu2 %v4273_v15  ;;  %vm2651_vm9 = vcmask 1042240   ;;  %v4294_v26 = vld [vmem:[%s6101_s9 + $0x228] sm:$0xff]  ;;  %v4293_v35 = vld [vmem:[%s6101_s9 + $0x220] sm:$0xff] }
 0x6cb   :  { %2533 = vst.msk [vmem:[#allocation4 + $0x4] sm:$0xf] %vm2532_vm14, %v2528_v23  ;;  %vm2605_vm14 = vcmask 1042288   ;;  %v3204_v54 = vunpack.c.l.b16 %v2886_v0  ;;  %v4295_v23 = vld [vmem:[%s6101_s9 + $0x230] sm:$0xff] }
 0x6cd   :  { %v3283_v1 = vpack.c.b16 %v3204_v54, %v3204_v54 }
 0x6cf   :  { %v2536_v62 = vpop.permute.xlu0 %2535  ;;  %v2544_v44 = vpop.permute.xlu1 %2543 }
 0x6d0   :  { %2539 = vst.msk [vmem:[#allocation4 + $0x6] sm:$0x3] %vm2538_vm3, %v2536_v62  ;;  %v5908_v18 = vpop.permute.xlu2 %2610  ;;  %vm2607_vm3 = vmor %vm2606_vm15, %vm2605_vm14  ;;  %vm3366_vm15 = vcmask 1040384   ;;  %v4302_v62 = vld [vmem:[%s6101_s9 + $0x268] sm:$0xff] }
 0x6d1   :  { %2547 = vst.msk [vmem:[#allocation4 + $0x6] sm:$0x3] %vm2546_vm5, %v2544_v44  ;;  %vm2624_vm5 = vcmask 1042064   ;;  %v3368_v4 = vsel %vm3366_vm15, %v3283_v1, 0  ;;  %v4284_v44 = vld [vmem:[%s6101_s9 + $0x1d8] sm:$0xff]  ;;  %v4448_v1 = vmov 2.0  }
 0x6d2   :  { %2560 = vst.msk [vmem:[#allocation4 + $0x6] sm:$0xf] %vm2559_vm6, %v2555_v19  ;;  %vm2625_vm6 = vcmask 27650   ;;  %4379 = vrcp.f32 %v4448_v1 }
 0x6d3   :  { %vm2626_vm8 = vmor %vm2625_vm6, %vm2624_vm5  ;;  %vm2677_vm5 = vcmask 1031168  }
 0x6d8   :  { %v2584_v51 = vpop.permute.xlu2 %2583 }
 0x6d9   :  { %v2690_v48 = vld [vmem:[#allocation4] sm:$0xff] }
 0x6da   :  { %2696 = vst [vmem:[#allocation1] ss:$4 sm:$0xff] %v2690_v48  ;;  %v4283_v48 = vld [vmem:[%s6101_s9 + $0x1d0] sm:$0xff] }
 0x6df   :  { %v2565_v17 = vpop.permute.xlu0 %2564 }
 0x6e0   :  { %2568 = vst.msk [vmem:[#allocation4 + $0x8] sm:$0x3] %vm2567_vm10, %v2565_v17  ;;  %vm2652_vm10 = vcmask 207874  }
 0x6e1   :  { %2579 = vst.msk [vmem:[#allocation4 + $0x8] sm:$0xf] %vm2578_vm11, %v2574_v59  ;;  %v2699_v58 = vld.sshfl [vmem:[#allocation1] sm:$0xff pattern:$0x73625140]  ;;  %vm2634_vm11 = vcmask 435232   ;;  %vm2653_vm14 = vmor %vm2652_vm10, %vm2651_vm9 }
 0x6e2   :  { %v2720_v20 = vpack.c.bf16 %v2699_v58, %v2699_v58  ;;  %v2701_v10 = vld.sshfl [vmem:[#allocation1 + $0x10] sm:$0xff pattern:$0x73625140]  ;;  %v2702_v9 = vld.sshfl [vmem:[#allocation1 + $0x18] sm:$0xff pattern:$0x73625140] }
 0x6e3   :  { %v2722_v53 = vpack.c.bf16 %v2701_v10, %v2701_v10  ;;  %v2723_v3 = vpack.c.bf16 %v2702_v9, %v2702_v9  ;;  %2587 = vst.msk [vmem:[#allocation4 + $0xa] sm:$0x3] %vm2586_vm12, %v2584_v51  ;;  %v2700_v11 = vld.sshfl [vmem:[#allocation1 + $0x8] sm:$0xff pattern:$0x73625140]  ;;  %vm2648_vm12 = vcmask 850944  }
 0x6e4   :  { %3378 = vmatmul.bf16.vlgmr.msra.gmra.mxu3 %v2720_v20  ;;  %v2721_v37 = vpack.c.bf16 %v2700_v11, %v2700_v11  ;;  %v4282_v59 = vld [vmem:[%s6101_s9 + $0x1c8] sm:$0xff]  ;;  %v4300_v51 = vld [vmem:[%s6101_s9 + $0x258] sm:$0xff]  ;;  %v4291_v20 = vld [vmem:[%s6101_s9 + $0x210] sm:$0xff]  ;;  %vm3502_vm9 = vcmask 812032  }
 0x6e5   :  { %3404 = vmatmul.bf16.vlgmr.msra.gmra.mxu1 %v2722_v53  ;;  %3417 = vmatmul.bf16.vlgmr.msra.gmra.mxu2 %v2723_v3  ;;  %v4299_v53 = vld [vmem:[%s6101_s9 + $0x250] sm:$0xff] }
 0x6e6   :  { %3422 = vmatpush.bf16.msra.mxu3 %v4264_v33  ;;  %3474 = vmatpush.bf16.msra.mxu1 %v4296_v56  ;;  %v4292_v33 = vld [vmem:[%s6101_s9 + $0x218] sm:$0xff] }
 0x6e7   :  { %3488 = vmatpush.bf16.msra.mxu2 %v3368_v4  ;;  %v4380_v4 = vpop.eup %4379 }
 0x6e8   :  { %vm3515_vm10 = vweird.f32 %v4380_v4 }
 0x6ea   :  { %3423 = vmatpush.bf16.msra.mxu3 %v4263_v6  ;;  %3475 = vmatpush.bf16.msra.mxu1 %v4295_v23 }
 0x6eb   :  { %3489 = vmatpush.bf16.msra.mxu2 %v4302_v62 }
 0x6ee   :  { %3424 = vmatpush.bf16.msra.mxu3 %v4262_v16  ;;  %3476 = vmatpush.bf16.msra.mxu1 %v4294_v26 }
 0x6ef   :  { %v2592_v30 = vpop.permute.xlu0 %2591  ;;  %3490 = vmatpush.bf16.msra.mxu2 %v4301_v29 }
 0x6f0   :  { %2595 = vst.msk [vmem:[#allocation4 + $0xa] sm:$0x3] %vm2594_vm13, %v2592_v30  ;;  %vm2642_vm13 = vcmask 845232  }
 0x6f2   :  { %3425 = vmatpush.bf16.msra.mxu3 %v4261_v38  ;;  %3477 = vmatpush.bf16.msra.mxu1 %v4293_v35  ;;  %v4289_v38 = vld [vmem:[%s6101_s9 + $0x200] sm:$0xff] }
 0x6f3   :  { %3491 = vmatpush.bf16.msra.mxu2 %v4300_v51 }
 0x6f4   :  { %3391 = vmatmul.bf16.vlgmr.msrb.gmra.mxu3 %v2721_v37 }
 0x6f6   :  { %3426 = vmatpush.bf16.msra.mxu3 %v4260_v2  ;;  %3478 = vmatpush.bf16.msra.mxu1 %v4292_v33 }
 0x6f7   :  { %v2600_v43 = vpop.permute.xlu1 %2599  ;;  %v2646_v42 = vpop.permute.xlu0 %2645  ;;  %3492 = vmatpush.bf16.msra.mxu2 %v4299_v53 }
 0x6f8   :  { %v2601_v55 = vrot.slane %v2600_v43, 6  ;;  %v2647_v36 = vrot.slane %v2646_v42, 6  ;;  %v2640_v8 = vpop.permute.xlu2 %2639 }
 0x6fa   :  { %v2603_v32 = vsel %vm2602_vm2, %v2601_v55, %v2600_v43  ;;  %3427 = vmatpush.bf16.msra.mxu3 %v4259_v60  ;;  %v2649_v28 = vsel %vm2648_vm12, %v2647_v36, %v2646_v42  ;;  %vm2661_vm2 = vcmask 615632   ;;  %3479 = vmatpush.bf16.msra.mxu1 %v4291_v20 }
 0x6fb   :  { %2608 = vst.msk [vmem:[#allocation4 + $0xa] sm:$0xf] %vm2607_vm3, %v2603_v32  ;;  %vm2669_vm3 = vcmask 1025632   ;;  %3493 = vmatpush.bf16.msra.mxu2 %v4298_v25 }
 0x6fc   :  { %2614 = vst.msk [vmem:[#allocation4 + $0xc] sm:$0x3] %vm2613_vm4, %v5908_v18  ;;  %v3563_v18 = vld [vmem:[%s6105_s13 + $0x30] sm:$0x3]  ;;  %vm2681_vm4 = vcmask 388098  }
 0x6fd   :  { %v3593_v50 = vunpack.c.l.b16 %v3563_v18  ;;  %v3511_v18 = vmul.f32 2.0, %v4380_v4 }
 0x6fe   :  { %3428 = vmatpush.bf16.msra.mxu3 %v4258_v63  ;;  %3480 = vmatpush.bf16.msra.mxu1 %v4290_v22 }
 0x6ff   :  { %v2619_v27 = vpop.permute.xlu1 %2618  ;;  %v3600_v10 = vpack.c.b16 %v3593_v50, %v3593_v50  ;;  %3494 = vmatpush.bf16.msra.mxu2 %v4297_v12  ;;  %v3512_v50 = vsub.f32 1.0, %v3511_v18 }
 0x700   :  { %v2620_v61 = vrot.slane %v2619_v27, 6 }
 0x701   :  { %v3611_v16 = vsel %vm326_vm0, %v3600_v10, 0  ;;  %vm2680_vm0 = vcmask 1042416   ;;  %v3513_v33 = vmul.f32 %v4380_v4, %v3512_v50 }
 0x702   :  { %v2622_v45 = vsel %vm2621_vm7, %v2620_v61, %v2619_v27  ;;  %3429 = vmatpush.bf16.msra.mxu3 %v4257_v14  ;;  %3481 = vmatpush.bf16.msra.mxu1 %v4289_v38  ;;  %vm2682_vm6 = vmor %vm2681_vm4, %vm2680_vm0  ;;  %vm2688_vm7 = vcmask 796032   ;;  %v4367_v14 = vld [vmem:[%s6102_s10] ss:$0 sm:$0xff] }
 0x703   :  { %2627 = vst.msk [vmem:[#allocation4 + $0xc] sm:$0xf] %vm2626_vm8, %v2622_v45  ;;  %vm3362_vm8 = vcmask 801792   ;;  %v4307_v38 = vld [vmem:[%s6105_s13 + $0x20] sm:$0xff] }
 0x706   :  { %3461 = vmatpush.bf16.msrb.mxu3 %v4288_v39 }
 0x707   :  { %v2632_v31 = vpop.permute.xlu1 %2631  ;;  %v2667_v58 = vpop.permute.xlu2 %2666 }
 0x708   :  { %2635 = vst.msk [vmem:[#allocation4 + $0xe] sm:$0x3] %vm2634_vm11, %v2632_v31 }
 0x709   :  { %2643 = vst.msk [vmem:[#allocation4 + $0xe] sm:$0x3] %vm2642_vm13, %v2640_v8 }
 0x70a   :  { %3462 = vmatpush.bf16.msrb.mxu3 %v4287_v57  ;;  %2654 = vst.msk [vmem:[#allocation4 + $0xe] sm:$0xf] %vm2653_vm14, %v2649_v28  ;;  %vm3626_vm14 = vcmask 254976  }
 0x70e   :  { %3463 = vmatpush.bf16.msrb.mxu3 %v4286_v41 }
 0x711   :  { %v2691_v19 = vld [vmem:[#allocation4 + $0x8] sm:$0xff] }
 0x712   :  { %3464 = vmatpush.bf16.msrb.mxu3 %v4285_v5  ;;  %2698 = vst [vmem:[#allocation1 + $0x20] ss:$4 sm:$0xff] %v2691_v19 }
 0x716   :  { %3465 = vmatpush.bf16.msrb.mxu3 %v4284_v44 }
 0x717   :  { %v2659_v17 = vpop.permute.xlu1 %2658 }
 0x718   :  { %2662 = vst.msk [vmem:[#allocation4 + $0x10] sm:$0x3] %vm2661_vm2, %v2659_v17 }
 0x719   :  { %2670 = vst.msk [vmem:[#allocation4 + $0x10] sm:$0x3] %vm2669_vm3, %v2667_v58  ;;  %v2703_v9 = vld.sshfl [vmem:[#allocation1 + $0x20] sm:$0xff pattern:$0x73625140] }
 0x71a   :  { %3466 = vmatpush.bf16.msrb.mxu3 %v4283_v48  ;;  %v2724_v3 = vpack.c.bf16 %v2703_v9, %v2703_v9  ;;  %v2704_v46 = vld.sshfl [vmem:[#allocation1 + $0x28] sm:$0xff pattern:$0x73625140]  ;;  %v2705_v13 = vld.sshfl [vmem:[#allocation1 + $0x30] sm:$0xff pattern:$0x73625140]  ;;  %v3514_v9 = vadd.f32 %v4380_v4, %v3513_v33 }
 0x71b   :  { %v2725_v6 = vpack.c.bf16 %v2704_v46, %v2704_v46  ;;  %v2726_v49 = vpack.c.bf16 %v2705_v13, %v2705_v13  ;;  %v2706_v11 = vld.sshfl [vmem:[#allocation1 + $0x38] sm:$0xff pattern:$0x73625140] }
 0x71c   :  { %3430 = vmatmul.bf16.vlgmr.msra.gmra.mxu3 %v2724_v3  ;;  %v2727_v2 = vpack.c.bf16 %v2706_v11, %v2706_v11  ;;  %v3516_v46 = vsel %vm3515_vm10, %v4380_v4, %v3514_v9  ;;  %v4306_v11 = vld [vmem:[%s6105_s13 + $0x18] sm:$0xff] }
 0x71d   :  { %3443 = vmatmul.bf16.vlgmr.msrb.gmra.mxu1 %v2725_v6  ;;  %3456 = vmatmul.bf16.vlgmr.msrb.gmra.mxu2 %v2726_v49 }
 0x71e   :  { %3467 = vmatpush.bf16.msrb.mxu3 %v4282_v59 }
 0x722   :  { %3468 = vmatpush.bf16.msrb.mxu3 %v4281_v7  ;;  %v4308_v7 = vld [vmem:[%s6105_s13 + $0x28] sm:$0xff] }
 0x726   :  { %3614 = vmatpush.bf16.msra.mxu3 %v3611_v16 }
 0x727   :  { %v2675_v30 = vpop.permute.xlu0 %2674 }
 0x728   :  { %v2676_v34 = vrot.slane %v2675_v30, 6 }
 0x72a   :  { %v2678_v37 = vsel %vm2677_vm5, %v2676_v34, %v2675_v30  ;;  %3615 = vmatpush.bf16.msra.mxu3 %v4308_v7 }
 0x72b   :  { %2683 = vst.msk [vmem:[#allocation4 + $0x10] sm:$0xf] %vm2682_vm6, %v2678_v37 }
 0x72c   :  { %3469 = vmatmul.bf16.vlgmr.msrb.gmra.mxu3 %v2727_v2  ;;  %v4305_v2 = vld [vmem:[%s6105_s13 + $0x10] sm:$0xff] }
 0x72e   :  { %3616 = vmatpush.bf16.msra.mxu3 %v4307_v38 }
 0x72f   :  { %v2686_v24 = vpop.permute.xlu0 %2685 }
 0x730   :  { %2689 = vst.msk [vmem:[#allocation4 + $0x12] sm:$0x3] %vm2688_vm7, %v2686_v24 }
 0x732   :  { %3617 = vmatpush.bf16.msra.mxu3 %v4306_v11 }
 0x736   :  { %3618 = vmatpush.bf16.msra.mxu3 %v4305_v2 }
 0x737   :  { %v2692_v40 = vld [vmem:[#allocation4 + $0x10] sm:$0xf] }
 0x738   :  { %2707 = vst [vmem:[#allocation1] ss:$4 sm:$0xff] %v2692_v40 }
 0x73f   :  { %v2708_v60 = vld.sshfl [vmem:[#allocation1] sm:$0xff pattern:$0x73625140]  ;;  %v2709_v21 = vld.sshfl [vmem:[#allocation1 + $0x8] sm:$0xff pattern:$0x73625140] }
 0x740   :  { %v2728_v43 = vpack.c.bf16 %v2708_v60, %v2708_v60  ;;  %v2729_v52 = vpack.c.bf16 %v2709_v21, %v2709_v21  ;;  %v4304_v60 = vld [vmem:[%s6105_s13 + $0x8] sm:$0xff] }
 0x741   :  { %3619 = vmatpush.bf16.msra.mxu3 %v4304_v60 }
 0x742   :  { %3482 = vmatmul.bf16.vlgmr.msra.gmra.mxu1 %v2728_v43  ;;  %4162 = vmatmul.msk.bf16.vlgmr.msra.gmra.mxu2 %vm3362_vm8, %v2729_v52  ;;  %v4303_v43 = vld [vmem:[%s6105_s13] sm:$0xff] }
 0x745   :  { %3620 = vmatpush.bf16.msra.mxu3 %v4303_v43 }
 0x762   :  { %v3405_v55 = vpop.f32.mrf.mxu1 }
 0x767   :  { %v3379_v32 = vpop.f32.mrf.mxu3 }
 0x768   :  { %v3418_v63 = vpop.f32.mrf.mxu2  ;;  %v3380_v27 = vadd.f32 %v4367_v14, %v3379_v32 }
 0x76a   :  { %v3407_v47 = vpop.f32.mrf.mxu1 }
 0x76f   :  { %v3381_v15 = vpop.f32.mrf.mxu3 }
 0x770   :  { %v3420_v56 = vpop.f32.mrf.mxu2 }
 0x771   :  { %v4368_v56 = vld [vmem:[%s6103_s11] ss:$0 sm:$0xff] }
 0x777   :  { %v3392_v39 = vpop.f32.mrf.mxu3 }
 0x778   :  { %v3393_v61 = vadd.f32 %v3392_v39, %v3380_v27  ;;  %v4369_v39 = vld [vmem:[%s6104_s12] ss:$0 sm:$0xff] }
 0x77a   :  { %v3406_v42 = vadd.f32 %v3405_v55, %v3393_v61 }
 0x77c   :  { %v3419_v45 = vadd.f32 %v3418_v63, %v3406_v42 }
 0x77f   :  { %v3394_v57 = vpop.f32.mrf.mxu3 }
 0x79a   :  { %v3444_v36 = vpop.f32.mrf.mxu1 }
 0x79f   :  { %v3431_v31 = vpop.f32.mrf.mxu3 }
 0x7a0   :  { %v3457_v41 = vpop.f32.mrf.mxu2  ;;  %v3432_v5 = vadd.f32 %v3431_v31, %v3419_v45  ;;  %v4370_v31 = vld [vmem:[%s6106_s14] ss:$0 sm:$0xff] }
 0x7a2   :  { %v3446_v8 = vpop.f32.mrf.mxu1  ;;  %v3445_v26 = vadd.f32 %v3444_v36, %v3432_v5 }
 0x7a4   :  { %v3458_v44 = vadd.f32 %v3457_v41, %v3445_v26 }
 0x7a7   :  { %v3433_v0 = vpop.f32.mrf.mxu3 }
 0x7a8   :  { %v3459_v28 = vpop.f32.mrf.mxu2 }
 0x7af   :  { %v3470_v54 = vpop.f32.mrf.mxu3 }
 0x7b0   :  { %v3471_v19 = vadd.f32 %v3470_v54, %v3458_v44 }
 0x7b7   :  { %v3472_v23 = vpop.f32.mrf.mxu3 }
 0x7bf   :  { %v3483_v62 = vpop.f32.mrf.mxu1 }
 0x7c0   :  { %v3484_v48 = vadd.f32 %v3483_v62, %v3471_v19 }
 0x7c5   :  { %v3496_v35 = vpop.f32.mrf.mxu2 }
 0x7c6   :  { %v3497_v29 = vadd.f32 %v3496_v35, %v3484_v48 }
 0x7c7   :  { %v3485_v17 = vpop.f32.mrf.mxu1 }
 0x7c8   :  { %v3503_v59 = vsel %vm3502_vm9, %v3497_v29, 0.0 }
 0x7c9   :  { %v3504_v58 = vrot.slane %v3503_v59, 4 }
 0x7cb   :  { %v3505_v51 = vadd.f32 %v3504_v58, %v3503_v59 }
 0x7cd   :  { %v3506_v20 = vrot.slane %v3505_v51, 2  ;;  %v3498_v10 = vpop.f32.mrf.mxu2 }
 0x7cf   :  { %v3507_v53 = vadd.f32 %v3506_v20, %v3505_v51 }
 0x7d1   :  { %v3508_v3 = vrot.slane %v3507_v53, 1 }
 0x7d3   :  { %v3509_v13 = vadd.f32 %v3508_v3, %v3507_v53 }
 0x7d5   :  { %v3517_v6 = vmul.f32 %v3516_v46, %v3509_v13 }
 0x7d7   :  { %v3518_v49 = vsub.f32 %v3497_v29, %v3517_v6 }
 0x7d9   :  { %v3519_v16 = vmul.f32 %v3518_v49, %v3518_v49 }
 0x7db   :  { %v3520_v22 = vsel %vm3502_vm9, %v3519_v16, 0.0 }
 0x7dc   :  { %v3521_v25 = vrot.slane %v3520_v22, 4 }
 0x7de   :  { %v3522_v12 = vadd.f32 %v3521_v25, %v3520_v22 }
 0x7e0   :  { %v3523_v30 = vrot.slane %v3522_v12, 2 }
 0x7e2   :  { %v3524_v34 = vadd.f32 %v3523_v30, %v3522_v12 }
 0x7e4   :  { %v3525_v37 = vrot.slane %v3524_v34, 1 }
 0x7e6   :  { %v3526_v24 = vadd.f32 %v3525_v37, %v3524_v34 }
 0x7e8   :  { %v3527_v40 = vmul.f32 %v3526_v24, %v3516_v46 }
 0x7ea   :  { %v3528_v21 = vadd.f32 1e-05, %v3527_v40 }
 0x7ec   :  { %4381 = vrsqrt.f32 %v3528_v21  ;;  %vm3535_vm12 = vweird.f32 %v3528_v21 }
 0x7f2   :  { %v4382_v52 = vpop.eup %4381 }
 0x7f3   :  { %v3530_v55 = vmul.f32 %v4382_v52, %v3528_v21  ;;  %vm3536_vm11 = vweird.f32 %v4382_v52 }
 0x7f4   :  { %vm3537_vm13 = vmor %vm3535_vm12, %vm3536_vm11 }
 0x7f5   :  { %v3531_v32 = vmul.f32 %v4382_v52, %v3530_v55 }
 0x7f7   :  { %v3532_v63 = vmul.f32 0.5, %v3531_v32 }
 0x7f9   :  { %v3533_v47 = vsub.f32 1.5, %v3532_v63 }
 0x7fb   :  { %v3534_v15 = vmul.f32 %v4382_v52, %v3533_v47 }
 0x7fd   :  { %v3538_v14 = vsel %vm3537_vm13, %v4382_v52, %v3534_v15 }
 0x7fe   :  { %v3539_v27 = vmul.f32 %v3538_v14, %v3518_v49 }
 0x800   :  { %v3543_v61 = vmul.f32 %v4368_v56, %v3539_v27 }
 0x802   :  { %v3547_v42 = vadd.f32 %v4369_v39, %v3543_v61 }
 0x804   :  { %v3548_v45 = vmax.f32 %v3547_v42, 0.0 }
 0x806   :  { %v3549_v57 = vmin.f32 %v3548_v45, 6.0 }
 0x808   :  { %v3550_v36 = vpack.c.bf16 %v3549_v57, %v3549_v57 }
 0x80a   :  { %4187 = vmatmul.msk.bf16.vlgmr.msra.gmra.mxu3 %vm259_vm1, %v3550_v36 }
 0x88d   :  { %v3622_v41 = vpop.f32.mrf.mxu3 }
 0x88e   :  { %v3623_v8 = vadd.f32 %v4370_v31, %v3622_v41 }
 0x890   :  { %3627 = vst.msk [vmem:[#allocation5] sm:$0x3] %vm3626_vm14, %v3623_v8 }
 0x891   :  { %3638 = dma.vmem_to_hbm [thread:$0]  %s3634_s17, 32, %s3636_s19, [#allocation6]  }
 0x895   :  { %v3624_v0 = vpop.f32.mrf.mxu3 }
 0x896   :  { %4407 = dma.done.wait [#allocation6], 32  }
 0x897   :  { %4408 = vsyncadd [#allocation6], 4294967264 }
 0x898   :  { %3643 = vsyncpa [#allocation6], 1 }

</bundles_post_ra>
